<compile_context>
chip_gen: v5e
topology: v5e:2x2
jax: 0.10.0
libtpu: 0.0.40
codegen_flags: <defaults>
</compile_context>

<pallas_src>
import math

import jax
import jax.numpy as jnp
from jax import lax
from jax.experimental import pallas as pl
from jax.experimental.pallas import tpu as pltpu

# ---- scaled-down config (structure mirrors the PyTorch Encoder) -------------
IN_CH        = [16, 32]     # torch: [513, 1024, 512, 256]
OUT_CH       = [32, 16]     # torch: [1024, 512, 256, 128]
STACKS       = [2, 2]       # residual stacks per stage (dilation = 2**j); torch: [3,3,3,3]
STACK_LAYERS = 2            # conv layers inside each EncodeResidualStack
KSIZE        = 5            # stage conv kernel size
STACK_K      = 3            # residual-stack conv kernel size
Z_CH         = 8            # z_channels (torch: 128)
NEG_SLOPE    = 0.2          # LeakyReLU negative_slope
EPS          = 1e-5         # GroupNorm eps (num_groups=1, affine=True)
B, T         = 2, 128       # batch, time (T multiple of 128 -> lane-dense)


# ----------------------- shared math helpers (pure jnp) ----------------------
# Used identically inside the Pallas kernel and in the pure-JAX reference so
# the correctness check compares bit-equivalent math.

def _reflect_pad_t(x, p):
    """ReflectionPad1d(p) on the last axis of a (C, T) slab, built from static
    single-column slices (no lax.rev needed; p <= 2 here)."""
    if p == 0:
        return x
    t = x.shape[-1]
    left = [x[:, p - i:p - i + 1] for i in range(p)]          # x[p], x[p-1], ...
    right = [x[:, t - 2 - i:t - 1 - i] for i in range(p)]      # x[t-2], x[t-3], ...
    return jnp.concatenate(left + [x] + right, axis=1)


def _leaky_relu(x):
    return jnp.where(x >= 0, x, NEG_SLOPE * x)


def _group_norm(x, gamma, beta):
    """GroupNorm with num_groups=1: stats over the full (C, T) slab, single pass."""
    n = x.shape[0] * x.shape[1]
    s = jnp.sum(x)
    ss = jnp.sum(x * x)
    mu = s / n
    var = ss / n - mu * mu
    return (x - mu) * lax.rsqrt(var + EPS) * gamma + beta


def _conv_mm(x, w2d, b, k, dilation):
    """Stride-1 (dilated) Conv1d with reflection padding as ONE im2col matmul.

    x:   (C_in, T)  f32
    w2d: (C_out, k*C_in) bf16, with w2d[o, tap*C_in + i] = W_torch[o, i, tap]
    b:   (C_out, 1) f32

    Cast to bf16 up front so the padding/im2col lane shuffles move half the
    bytes; the MXU consumes bf16 either way and accumulates in f32.
    """
    t_out = x.shape[-1]
    p = dilation * (k - 1) // 2
    xb = x.astype(jnp.bfloat16)
    xp = _reflect_pad_t(xb, p)
    cols = [xp[:, i * dilation:i * dilation + t_out] for i in range(k)]
    xim = jnp.concatenate(cols, axis=0)                        # (k*C_in, T) bf16
    return jnp.dot(w2d, xim, preferred_element_type=jnp.float32) + b


def _forward_single(weights, x):
    """Full encoder forward on one (C_in0, T) slab. `weights` is a flat list of
    loaded values in the canonical flatten_params() order."""
    it = iter(weights)
    for _, _, n_stacks in zip(IN_CH, OUT_CH, STACKS):
        # ReflectionPad1d((K-1)//2) + Conv1d(in_c, out_c, K, stride=1)
        x = _conv_mm(x, next(it), next(it), KSIZE, 1)
        # residual stacks
        for j in range(n_stacks):
            d = 2 ** j
            h = x
            for _ in range(STACK_LAYERS):
                gamma, beta, wl, bl = next(it), next(it), next(it), next(it)
                h = _group_norm(h, gamma, beta)
                h = _leaky_relu(h)
                h = _conv_mm(h, wl, bl, STACK_K, d)
            x = x + h                      # residual connection
        x = _leaky_relu(x)                 # stage-final activation
    wf, bf = next(it), next(it)            # final 1x1 conv -> z_channels
    return jnp.dot(wf, x.astype(jnp.bfloat16),
                   preferred_element_type=jnp.float32) + bf


# ------------------------------- Pallas kernel --------------------------------
def _encoder_kernel(*refs):
    x_ref, o_ref = refs[0], refs[-1]
    weights = [r[...] for r in refs[1:-1]]      # all weights VMEM-resident, tiny
    o_ref[0] = _forward_single(weights, x_ref[0])


def flatten_params(params):
    flat = []
    for stage in params['stages']:
        flat += [stage['w'], stage['b']]
        for block in stage['blocks']:
            for layer in block:
                flat += [layer['gamma'], layer['beta'], layer['w'], layer['b']]
    flat += [params['final']['w'], params['final']['b']]
    return flat


def encoder_forward(params, x):
    b, c_in, t = x.shape
    flat = flatten_params(params)
    in_specs = [pl.BlockSpec((1, c_in, t), lambda i: (i, 0, 0))]
    for arr in flat:                       # full (small) weight arrays, constant index
        in_specs.append(pl.BlockSpec(arr.shape, lambda i, nd=arr.ndim: (0,) * nd))
    return pl.pallas_call(
        _encoder_kernel,
        out_shape=jax.ShapeDtypeStruct((b, Z_CH, t), jnp.float32),
        grid=(b,),
        in_specs=in_specs,
        out_specs=pl.BlockSpec((1, Z_CH, t), lambda i: (i, 0, 0)),
        compiler_params=pltpu.CompilerParams(
            dimension_semantics=("parallel",)),
    )(x, *flat)


# ----------------------------- pure-JAX reference ------------------------------
def encoder_reference(params, x):
    flat = flatten_params(params)
    return jax.vmap(lambda xi: _forward_single(flat, xi))(x)


# -------------------------------- parameters -----------------------------------
def _kaiming(key, shape, fan_in):
    return jax.random.normal(key, shape, jnp.float32) * math.sqrt(2.0 / fan_in)


def _to_mm(w):
    """torch Conv1d weight (C_out, C_in, K) -> (C_out, K*C_in) bf16 im2col layout."""
    c_out, c_in, k = w.shape
    return w.transpose(0, 2, 1).reshape(c_out, k * c_in).astype(jnp.bfloat16)


def make_params(key):
    stages = []
    for in_c, out_c, n_stacks in zip(IN_CH, OUT_CH, STACKS):
        key, kw, kb = jax.random.split(key, 3)
        w = _kaiming(kw, (out_c, in_c, KSIZE), fan_in=in_c * KSIZE)
        blocks = []
        for _ in range(n_stacks):
            layers = []
            for _ in range(STACK_LAYERS):
                key, k1, k2 = jax.random.split(key, 3)
                wl = _kaiming(k1, (out_c, out_c, STACK_K), fan_in=out_c * STACK_K)
                layers.append(dict(
                    gamma=jnp.ones((out_c, 1), jnp.float32),
                    beta=jnp.zeros((out_c, 1), jnp.float32),
                    w=_to_mm(wl),
                    b=jax.random.normal(k2, (out_c, 1), jnp.float32) * 0.01,
                ))
            blocks.append(layers)
        stages.append(dict(
            w=_to_mm(w),
            b=jax.random.normal(kb, (out_c, 1), jnp.float32) * 0.01,
            blocks=blocks,
        ))
    key, kw, kb = jax.random.split(key, 3)
    final = dict(
        w=_kaiming(kw, (Z_CH, OUT_CH[-1]), fan_in=OUT_CH[-1]).astype(jnp.bfloat16),
        b=jax.random.normal(kb, (Z_CH, 1), jnp.float32) * 0.01,
    )
    return dict(stages=stages, final=final)


# ----------------------------------- main ---------------------------------------
if __name__ == "__main__":
    key = jax.random.PRNGKey(0)
    pk, xk = jax.random.split(key)
    params = make_params(pk)
    x = jax.random.normal(xk, (B, IN_CH[0], T), jnp.float32)

    out = jax.block_until_ready(encoder_forward(params, x))
    assert out.shape == (B, Z_CH, T), out.shape
    assert bool(jnp.all(jnp.isfinite(out)))

    ref = jax.block_until_ready(encoder_reference(params, x))
    err = float(jnp.max(jnp.abs(out - ref)))
    scale = float(jnp.max(jnp.abs(ref))) + 1e-6
    assert err <= 1e-2 * scale + 1e-3, ("kernel/reference mismatch", err, scale)

    print("KERNEL_OK")
</pallas_src>

<mosaic_0001>
module attributes {stable_mosaic.version = 11 : i64} {
  func.func @_encoder_kernel(%arg0: i32, %arg1: memref<1x16x128xf32, #tpu.memory_space<vmem>>, %arg2: memref<32x80xbf16, #tpu.memory_space<vmem>>, %arg3: memref<32x1xf32, #tpu.memory_space<vmem>>, %arg4: memref<32x1xf32, #tpu.memory_space<vmem>>, %arg5: memref<32x1xf32, #tpu.memory_space<vmem>>, %arg6: memref<32x96xbf16, #tpu.memory_space<vmem>>, %arg7: memref<32x1xf32, #tpu.memory_space<vmem>>, %arg8: memref<32x1xf32, #tpu.memory_space<vmem>>, %arg9: memref<32x1xf32, #tpu.memory_space<vmem>>, %arg10: memref<32x96xbf16, #tpu.memory_space<vmem>>, %arg11: memref<32x1xf32, #tpu.memory_space<vmem>>, %arg12: memref<32x1xf32, #tpu.memory_space<vmem>>, %arg13: memref<32x1xf32, #tpu.memory_space<vmem>>, %arg14: memref<32x96xbf16, #tpu.memory_space<vmem>>, %arg15: memref<32x1xf32, #tpu.memory_space<vmem>>, %arg16: memref<32x1xf32, #tpu.memory_space<vmem>>, %arg17: memref<32x1xf32, #tpu.memory_space<vmem>>, %arg18: memref<32x96xbf16, #tpu.memory_space<vmem>>, %arg19: memref<32x1xf32, #tpu.memory_space<vmem>>, %arg20: memref<16x160xbf16, #tpu.memory_space<vmem>>, %arg21: memref<16x1xf32, #tpu.memory_space<vmem>>, %arg22: memref<16x1xf32, #tpu.memory_space<vmem>>, %arg23: memref<16x1xf32, #tpu.memory_space<vmem>>, %arg24: memref<16x48xbf16, #tpu.memory_space<vmem>>, %arg25: memref<16x1xf32, #tpu.memory_space<vmem>>, %arg26: memref<16x1xf32, #tpu.memory_space<vmem>>, %arg27: memref<16x1xf32, #tpu.memory_space<vmem>>, %arg28: memref<16x48xbf16, #tpu.memory_space<vmem>>, %arg29: memref<16x1xf32, #tpu.memory_space<vmem>>, %arg30: memref<16x1xf32, #tpu.memory_space<vmem>>, %arg31: memref<16x1xf32, #tpu.memory_space<vmem>>, %arg32: memref<16x48xbf16, #tpu.memory_space<vmem>>, %arg33: memref<16x1xf32, #tpu.memory_space<vmem>>, %arg34: memref<16x1xf32, #tpu.memory_space<vmem>>, %arg35: memref<16x1xf32, #tpu.memory_space<vmem>>, %arg36: memref<16x48xbf16, #tpu.memory_space<vmem>>, %arg37: memref<16x1xf32, #tpu.memory_space<vmem>>, %arg38: memref<8x16xbf16, #tpu.memory_space<vmem>>, %arg39: memref<8x1xf32, #tpu.memory_space<vmem>>, %arg40: memref<1x8x128xf32, #tpu.memory_space<vmem>>) attributes {dimension_semantics = [#tpu.dimension_semantics<parallel>], iteration_bounds = array<i64: 2>, scalar_prefetch = 0 : i64, scratch_operands = 0 : i64, tpu.core_type = #tpu.core_type<tc>, window_params = [{transform_indices = @transform_0, window_bounds = array<i64: 1, 16, 128>}, {pipeline_mode = #tpu.pipeline_mode<synchronous>, transform_indices = @transform_1, window_bounds = array<i64: 32, 80>}, {pipeline_mode = #tpu.pipeline_mode<synchronous>, transform_indices = @transform_2, window_bounds = array<i64: 32, 1>}, {pipeline_mode = #tpu.pipeline_mode<synchronous>, transform_indices = @transform_3, window_bounds = array<i64: 32, 1>}, {pipeline_mode = #tpu.pipeline_mode<synchronous>, transform_indices = @transform_4, window_bounds = array<i64: 32, 1>}, {pipeline_mode = #tpu.pipeline_mode<synchronous>, transform_indices = @transform_5, window_bounds = array<i64: 32, 96>}, {pipeline_mode = #tpu.pipeline_mode<synchronous>, transform_indices = @transform_6, window_bounds = array<i64: 32, 1>}, {pipeline_mode = #tpu.pipeline_mode<synchronous>, transform_indices = @transform_7, window_bounds = array<i64: 32, 1>}, {pipeline_mode = #tpu.pipeline_mode<synchronous>, transform_indices = @transform_8, window_bounds = array<i64: 32, 1>}, {pipeline_mode = #tpu.pipeline_mode<synchronous>, transform_indices = @transform_9, window_bounds = array<i64: 32, 96>}, {pipeline_mode = #tpu.pipeline_mode<synchronous>, transform_indices = @transform_10, window_bounds = array<i64: 32, 1>}, {pipeline_mode = #tpu.pipeline_mode<synchronous>, transform_indices = @transform_11, window_bounds = array<i64: 32, 1>}, {pipeline_mode = #tpu.pipeline_mode<synchronous>, transform_indices = @transform_12, window_bounds = array<i64: 32, 1>}, {pipeline_mode = #tpu.pipeline_mode<synchronous>, transform_indices = @transform_13, window_bounds = array<i64: 32, 96>}, {pipeline_mode = #tpu.pipeline_mode<synchronous>, transform_indices = @transform_14, window_bounds = array<i64: 32, 1>}, {pipeline_mode = #tpu.pipeline_mode<synchronous>, transform_indices = @transform_15, window_bounds = array<i64: 32, 1>}, {pipeline_mode = #tpu.pipeline_mode<synchronous>, transform_indices = @transform_16, window_bounds = array<i64: 32, 1>}, {pipeline_mode = #tpu.pipeline_mode<synchronous>, transform_indices = @transform_17, window_bounds = array<i64: 32, 96>}, {pipeline_mode = #tpu.pipeline_mode<synchronous>, transform_indices = @transform_18, window_bounds = array<i64: 32, 1>}, {pipeline_mode = #tpu.pipeline_mode<synchronous>, transform_indices = @transform_19, window_bounds = array<i64: 16, 160>}, {pipeline_mode = #tpu.pipeline_mode<synchronous>, transform_indices = @transform_20, window_bounds = array<i64: 16, 1>}, {pipeline_mode = #tpu.pipeline_mode<synchronous>, transform_indices = @transform_21, window_bounds = array<i64: 16, 1>}, {pipeline_mode = #tpu.pipeline_mode<synchronous>, transform_indices = @transform_22, window_bounds = array<i64: 16, 1>}, {pipeline_mode = #tpu.pipeline_mode<synchronous>, transform_indices = @transform_23, window_bounds = array<i64: 16, 48>}, {pipeline_mode = #tpu.pipeline_mode<synchronous>, transform_indices = @transform_24, window_bounds = array<i64: 16, 1>}, {pipeline_mode = #tpu.pipeline_mode<synchronous>, transform_indices = @transform_25, window_bounds = array<i64: 16, 1>}, {pipeline_mode = #tpu.pipeline_mode<synchronous>, transform_indices = @transform_26, window_bounds = array<i64: 16, 1>}, {pipeline_mode = #tpu.pipeline_mode<synchronous>, transform_indices = @transform_27, window_bounds = array<i64: 16, 48>}, {pipeline_mode = #tpu.pipeline_mode<synchronous>, transform_indices = @transform_28, window_bounds = array<i64: 16, 1>}, {pipeline_mode = #tpu.pipeline_mode<synchronous>, transform_indices = @transform_29, window_bounds = array<i64: 16, 1>}, {pipeline_mode = #tpu.pipeline_mode<synchronous>, transform_indices = @transform_30, window_bounds = array<i64: 16, 1>}, {pipeline_mode = #tpu.pipeline_mode<synchronous>, transform_indices = @transform_31, window_bounds = array<i64: 16, 48>}, {pipeline_mode = #tpu.pipeline_mode<synchronous>, transform_indices = @transform_32, window_bounds = array<i64: 16, 1>}, {pipeline_mode = #tpu.pipeline_mode<synchronous>, transform_indices = @transform_33, window_bounds = array<i64: 16, 1>}, {pipeline_mode = #tpu.pipeline_mode<synchronous>, transform_indices = @transform_34, window_bounds = array<i64: 16, 1>}, {pipeline_mode = #tpu.pipeline_mode<synchronous>, transform_indices = @transform_35, window_bounds = array<i64: 16, 48>}, {pipeline_mode = #tpu.pipeline_mode<synchronous>, transform_indices = @transform_36, window_bounds = array<i64: 16, 1>}, {pipeline_mode = #tpu.pipeline_mode<synchronous>, transform_indices = @transform_37, window_bounds = array<i64: 8, 16>}, {pipeline_mode = #tpu.pipeline_mode<synchronous>, transform_indices = @transform_38, window_bounds = array<i64: 8, 1>}, {transform_indices = @transform_39, window_bounds = array<i64: 1, 8, 128>}]} {
    %c0 = arith.constant 0 : index
    %c0_0 = arith.constant 0 : index
    %0 = vector.load %arg2[%c0, %c0_0] : memref<32x80xbf16, #tpu.memory_space<vmem>>, vector<32x80xbf16>
    %c0_1 = arith.constant 0 : index
    %c0_2 = arith.constant 0 : index
    %1 = vector.load %arg3[%c0_1, %c0_2] : memref<32x1xf32, #tpu.memory_space<vmem>>, vector<32x1xf32>
    %c0_3 = arith.constant 0 : index
    %c0_4 = arith.constant 0 : index
    %2 = vector.load %arg4[%c0_3, %c0_4] : memref<32x1xf32, #tpu.memory_space<vmem>>, vector<32x1xf32>
    %c0_5 = arith.constant 0 : index
    %c0_6 = arith.constant 0 : index
    %3 = vector.load %arg5[%c0_5, %c0_6] : memref<32x1xf32, #tpu.memory_space<vmem>>, vector<32x1xf32>
    %c0_7 = arith.constant 0 : index
    %c0_8 = arith.constant 0 : index
    %4 = vector.load %arg6[%c0_7, %c0_8] : memref<32x96xbf16, #tpu.memory_space<vmem>>, vector<32x96xbf16>
    %c0_9 = arith.constant 0 : index
    %c0_10 = arith.constant 0 : index
    %5 = vector.load %arg7[%c0_9, %c0_10] : memref<32x1xf32, #tpu.memory_space<vmem>>, vector<32x1xf32>
    %c0_11 = arith.constant 0 : index
    %c0_12 = arith.constant 0 : index
    %6 = vector.load %arg8[%c0_11, %c0_12] : memref<32x1xf32, #tpu.memory_space<vmem>>, vector<32x1xf32>
    %c0_13 = arith.constant 0 : index
    %c0_14 = arith.constant 0 : index
    %7 = vector.load %arg9[%c0_13, %c0_14] : memref<32x1xf32, #tpu.memory_space<vmem>>, vector<32x1xf32>
    %c0_15 = arith.constant 0 : index
    %c0_16 = arith.constant 0 : index
    %8 = vector.load %arg10[%c0_15, %c0_16] : memref<32x96xbf16, #tpu.memory_space<vmem>>, vector<32x96xbf16>
    %c0_17 = arith.constant 0 : index
    %c0_18 = arith.constant 0 : index
    %9 = vector.load %arg11[%c0_17, %c0_18] : memref<32x1xf32, #tpu.memory_space<vmem>>, vector<32x1xf32>
    %c0_19 = arith.constant 0 : index
    %c0_20 = arith.constant 0 : index
    %10 = vector.load %arg12[%c0_19, %c0_20] : memref<32x1xf32, #tpu.memory_space<vmem>>, vector<32x1xf32>
    %c0_21 = arith.constant 0 : index
    %c0_22 = arith.constant 0 : index
    %11 = vector.load %arg13[%c0_21, %c0_22] : memref<32x1xf32, #tpu.memory_space<vmem>>, vector<32x1xf32>
    %c0_23 = arith.constant 0 : index
    %c0_24 = arith.constant 0 : index
    %12 = vector.load %arg14[%c0_23, %c0_24] : memref<32x96xbf16, #tpu.memory_space<vmem>>, vector<32x96xbf16>
    %c0_25 = arith.constant 0 : index
    %c0_26 = arith.constant 0 : index
    %13 = vector.load %arg15[%c0_25, %c0_26] : memref<32x1xf32, #tpu.memory_space<vmem>>, vector<32x1xf32>
    %c0_27 = arith.constant 0 : index
    %c0_28 = arith.constant 0 : index
    %14 = vector.load %arg16[%c0_27, %c0_28] : memref<32x1xf32, #tpu.memory_space<vmem>>, vector<32x1xf32>
    %c0_29 = arith.constant 0 : index
    %c0_30 = arith.constant 0 : index
    %15 = vector.load %arg17[%c0_29, %c0_30] : memref<32x1xf32, #tpu.memory_space<vmem>>, vector<32x1xf32>
    %c0_31 = arith.constant 0 : index
    %c0_32 = arith.constant 0 : index
    %16 = vector.load %arg18[%c0_31, %c0_32] : memref<32x96xbf16, #tpu.memory_space<vmem>>, vector<32x96xbf16>
    %c0_33 = arith.constant 0 : index
    %c0_34 = arith.constant 0 : index
    %17 = vector.load %arg19[%c0_33, %c0_34] : memref<32x1xf32, #tpu.memory_space<vmem>>, vector<32x1xf32>
    %c0_35 = arith.constant 0 : index
    %c0_36 = arith.constant 0 : index
    %18 = vector.load %arg20[%c0_35, %c0_36] : memref<16x160xbf16, #tpu.memory_space<vmem>>, vector<16x160xbf16>
    %c0_37 = arith.constant 0 : index
    %c0_38 = arith.constant 0 : index
    %19 = vector.load %arg21[%c0_37, %c0_38] : memref<16x1xf32, #tpu.memory_space<vmem>>, vector<16x1xf32>
    %c0_39 = arith.constant 0 : index
    %c0_40 = arith.constant 0 : index
    %20 = vector.load %arg22[%c0_39, %c0_40] : memref<16x1xf32, #tpu.memory_space<vmem>>, vector<16x1xf32>
    %c0_41 = arith.constant 0 : index
    %c0_42 = arith.constant 0 : index
    %21 = vector.load %arg23[%c0_41, %c0_42] : memref<16x1xf32, #tpu.memory_space<vmem>>, vector<16x1xf32>
    %c0_43 = arith.constant 0 : index
    %c0_44 = arith.constant 0 : index
    %22 = vector.load %arg24[%c0_43, %c0_44] : memref<16x48xbf16, #tpu.memory_space<vmem>>, vector<16x48xbf16>
    %c0_45 = arith.constant 0 : index
    %c0_46 = arith.constant 0 : index
    %23 = vector.load %arg25[%c0_45, %c0_46] : memref<16x1xf32, #tpu.memory_space<vmem>>, vector<16x1xf32>
    %c0_47 = arith.constant 0 : index
    %c0_48 = arith.constant 0 : index
    %24 = vector.load %arg26[%c0_47, %c0_48] : memref<16x1xf32, #tpu.memory_space<vmem>>, vector<16x1xf32>
    %c0_49 = arith.constant 0 : index
    %c0_50 = arith.constant 0 : index
    %25 = vector.load %arg27[%c0_49, %c0_50] : memref<16x1xf32, #tpu.memory_space<vmem>>, vector<16x1xf32>
    %c0_51 = arith.constant 0 : index
    %c0_52 = arith.constant 0 : index
    %26 = vector.load %arg28[%c0_51, %c0_52] : memref<16x48xbf16, #tpu.memory_space<vmem>>, vector<16x48xbf16>
    %c0_53 = arith.constant 0 : index
    %c0_54 = arith.constant 0 : index
    %27 = vector.load %arg29[%c0_53, %c0_54] : memref<16x1xf32, #tpu.memory_space<vmem>>, vector<16x1xf32>
    %c0_55 = arith.constant 0 : index
    %c0_56 = arith.constant 0 : index
    %28 = vector.load %arg30[%c0_55, %c0_56] : memref<16x1xf32, #tpu.memory_space<vmem>>, vector<16x1xf32>
    %c0_57 = arith.constant 0 : index
    %c0_58 = arith.constant 0 : index
    %29 = vector.load %arg31[%c0_57, %c0_58] : memref<16x1xf32, #tpu.memory_space<vmem>>, vector<16x1xf32>
    %c0_59 = arith.constant 0 : index
    %c0_60 = arith.constant 0 : index
    %30 = vector.load %arg32[%c0_59, %c0_60] : memref<16x48xbf16, #tpu.memory_space<vmem>>, vector<16x48xbf16>
    %c0_61 = arith.constant 0 : index
    %c0_62 = arith.constant 0 : index
    %31 = vector.load %arg33[%c0_61, %c0_62] : memref<16x1xf32, #tpu.memory_space<vmem>>, vector<16x1xf32>
    %c0_63 = arith.constant 0 : index
    %c0_64 = arith.constant 0 : index
    %32 = vector.load %arg34[%c0_63, %c0_64] : memref<16x1xf32, #tpu.memory_space<vmem>>, vector<16x1xf32>
    %c0_65 = arith.constant 0 : index
    %c0_66 = arith.constant 0 : index
    %33 = vector.load %arg35[%c0_65, %c0_66] : memref<16x1xf32, #tpu.memory_space<vmem>>, vector<16x1xf32>
    %c0_67 = arith.constant 0 : index
    %c0_68 = arith.constant 0 : index
    %34 = vector.load %arg36[%c0_67, %c0_68] : memref<16x48xbf16, #tpu.memory_space<vmem>>, vector<16x48xbf16>
    %c0_69 = arith.constant 0 : index
    %c0_70 = arith.constant 0 : index
    %35 = vector.load %arg37[%c0_69, %c0_70] : memref<16x1xf32, #tpu.memory_space<vmem>>, vector<16x1xf32>
    %c0_71 = arith.constant 0 : index
    %c0_72 = arith.constant 0 : index
    %36 = vector.load %arg38[%c0_71, %c0_72] : memref<8x16xbf16, #tpu.memory_space<vmem>>, vector<8x16xbf16>
    %c0_73 = arith.constant 0 : index
    %c0_74 = arith.constant 0 : index
    %37 = vector.load %arg39[%c0_73, %c0_74] : memref<8x1xf32, #tpu.memory_space<vmem>>, vector<8x1xf32>
    %c0_75 = arith.constant 0 : index
    %c0_76 = arith.constant 0 : index
    %c0_77 = arith.constant 0 : index
    %38 = vector.load %arg1[%c0_75, %c0_76, %c0_77] : memref<1x16x128xf32, #tpu.memory_space<vmem>>, vector<1x16x128xf32>
    %39 = vector.shape_cast %38 : vector<1x16x128xf32> to vector<16x128xf32>
    %40 = arith.truncf %39 : vector<16x128xf32> to vector<16x128xbf16>
    %41 = vector.extract_strided_slice %40 {offsets = [0, 2], sizes = [16, 1], strides = [1, 1]} : vector<16x128xbf16> to vector<16x1xbf16>
    %42 = vector.extract_strided_slice %40 {offsets = [0, 1], sizes = [16, 1], strides = [1, 1]} : vector<16x128xbf16> to vector<16x1xbf16>
    %43 = vector.extract_strided_slice %40 {offsets = [0, 126], sizes = [16, 1], strides = [1, 1]} : vector<16x128xbf16> to vector<16x1xbf16>
    %44 = vector.extract_strided_slice %40 {offsets = [0, 125], sizes = [16, 1], strides = [1, 1]} : vector<16x128xbf16> to vector<16x1xbf16>
    %45 = tpu.concatenate %41, %42, %40, %43, %44 in 1 : vector<16x1xbf16>, vector<16x1xbf16>, vector<16x128xbf16>, vector<16x1xbf16>, vector<16x1xbf16> -> vector<16x132xbf16>
    %46 = vector.extract_strided_slice %45 {offsets = [0, 0], sizes = [16, 128], strides = [1, 1]} : vector<16x132xbf16> to vector<16x128xbf16>
    %47 = vector.extract_strided_slice %45 {offsets = [0, 1], sizes = [16, 128], strides = [1, 1]} : vector<16x132xbf16> to vector<16x128xbf16>
    %48 = vector.extract_strided_slice %45 {offsets = [0, 2], sizes = [16, 128], strides = [1, 1]} : vector<16x132xbf16> to vector<16x128xbf16>
    %49 = vector.extract_strided_slice %45 {offsets = [0, 3], sizes = [16, 128], strides = [1, 1]} : vector<16x132xbf16> to vector<16x128xbf16>
    %50 = vector.extract_strided_slice %45 {offsets = [0, 4], sizes = [16, 128], strides = [1, 1]} : vector<16x132xbf16> to vector<16x128xbf16>
    %51 = tpu.concatenate %46, %47, %48, %49, %50 in 0 : vector<16x128xbf16>, vector<16x128xbf16>, vector<16x128xbf16>, vector<16x128xbf16>, vector<16x128xbf16> -> vector<80x128xbf16>
    %cst = arith.constant dense<0.000000e+00> : vector<32x128xf32>
    %52 = tpu.matmul %0, %51, %cst {dimension_numbers = #tpu.dot_dimension_numbers<[1], [0], [0], [1], [0, 0, 1, 1], [], []>} : vector<32x80xbf16>, vector<80x128xbf16>, vector<32x128xf32> -> vector<32x128xf32>
    %53 = vector.broadcast %1 : vector<32x1xf32> to vector<32x128xf32>
    %54 = arith.addf %52, %53 : vector<32x128xf32>
    %55 = vector.shape_cast %54 : vector<32x128xf32> to vector<1x32x128xf32>
    %cst_78 = arith.constant dense<0.000000e+00> : vector<1xf32>
    %56 = vector.multi_reduction <add>, %55, %cst_78 [1, 2] : vector<1x32x128xf32> to vector<1xf32>
    %57 = vector.shape_cast %56 : vector<1xf32> to vector<1x1x1xf32>
    %58 = vector.extract %57[0, 0, 0] : f32 from vector<1x1x1xf32>
    %59 = arith.mulf %54, %54 : vector<32x128xf32>
    %60 = vector.shape_cast %59 : vector<32x128xf32> to vector<1x32x128xf32>
    %cst_79 = arith.constant dense<0.000000e+00> : vector<1xf32>
    %61 = vector.multi_reduction <add>, %60, %cst_79 [1, 2] : vector<1x32x128xf32> to vector<1xf32>
    %62 = vector.shape_cast %61 : vector<1xf32> to vector<1x1x1xf32>
    %63 = vector.extract %62[0, 0, 0] : f32 from vector<1x1x1xf32>
    %cst_80 = arith.constant 4.096000e+03 : f32
    %64 = arith.divf %58, %cst_80 : f32
    %cst_81 = arith.constant 4.096000e+03 : f32
    %65 = arith.divf %63, %cst_81 : f32
    %66 = arith.mulf %64, %64 : f32
    %67 = arith.subf %65, %66 : f32
    %68 = vector.broadcast %64 : f32 to vector<32x128xf32>
    %69 = arith.subf %54, %68 : vector<32x128xf32>
    %cst_82 = arith.constant 9.99999974E-6 : f32
    %70 = arith.addf %67, %cst_82 : f32
    %71 = math.rsqrt %70 : f32
    %72 = vector.broadcast %71 : f32 to vector<32x128xf32>
    %73 = arith.mulf %69, %72 : vector<32x128xf32>
    %74 = vector.broadcast %2 : vector<32x1xf32> to vector<32x128xf32>
    %75 = arith.mulf %73, %74 : vector<32x128xf32>
    %76 = vector.broadcast %3 : vector<32x1xf32> to vector<32x128xf32>
    %77 = arith.addf %75, %76 : vector<32x128xf32>
    %cst_83 = arith.constant 0.000000e+00 : f32
    %78 = vector.broadcast %cst_83 : f32 to vector<32x128xf32>
    %79 = arith.cmpf oge, %77, %78 : vector<32x128xf32>
    %cst_84 = arith.constant 2.000000e-01 : f32
    %80 = vector.broadcast %cst_84 : f32 to vector<32x128xf32>
    %81 = arith.mulf %80, %77 : vector<32x128xf32>
    %82 = arith.select %79, %77, %81 : vector<32x128xi1>, vector<32x128xf32>
    %83 = arith.truncf %82 : vector<32x128xf32> to vector<32x128xbf16>
    %84 = vector.extract_strided_slice %83 {offsets = [0, 1], sizes = [32, 1], strides = [1, 1]} : vector<32x128xbf16> to vector<32x1xbf16>
    %85 = vector.extract_strided_slice %83 {offsets = [0, 126], sizes = [32, 1], strides = [1, 1]} : vector<32x128xbf16> to vector<32x1xbf16>
    %86 = tpu.concatenate %84, %83, %85 in 1 : vector<32x1xbf16>, vector<32x128xbf16>, vector<32x1xbf16> -> vector<32x130xbf16>
    %87 = vector.extract_strided_slice %86 {offsets = [0, 0], sizes = [32, 128], strides = [1, 1]} : vector<32x130xbf16> to vector<32x128xbf16>
    %88 = vector.extract_strided_slice %86 {offsets = [0, 1], sizes = [32, 128], strides = [1, 1]} : vector<32x130xbf16> to vector<32x128xbf16>
    %89 = vector.extract_strided_slice %86 {offsets = [0, 2], sizes = [32, 128], strides = [1, 1]} : vector<32x130xbf16> to vector<32x128xbf16>
    %90 = tpu.concatenate %87, %88, %89 in 0 : vector<32x128xbf16>, vector<32x128xbf16>, vector<32x128xbf16> -> vector<96x128xbf16>
    %cst_85 = arith.constant dense<0.000000e+00> : vector<32x128xf32>
    %91 = tpu.matmul %4, %90, %cst_85 {dimension_numbers = #tpu.dot_dimension_numbers<[1], [0], [0], [1], [0, 0, 1, 1], [], []>} : vector<32x96xbf16>, vector<96x128xbf16>, vector<32x128xf32> -> vector<32x128xf32>
    %92 = vector.broadcast %5 : vector<32x1xf32> to vector<32x128xf32>
    %93 = arith.addf %91, %92 : vector<32x128xf32>
    %94 = vector.shape_cast %93 : vector<32x128xf32> to vector<1x32x128xf32>
    %cst_86 = arith.constant dense<0.000000e+00> : vector<1xf32>
    %95 = vector.multi_reduction <add>, %94, %cst_86 [1, 2] : vector<1x32x128xf32> to vector<1xf32>
    %96 = vector.shape_cast %95 : vector<1xf32> to vector<1x1x1xf32>
    %97 = vector.extract %96[0, 0, 0] : f32 from vector<1x1x1xf32>
    %98 = arith.mulf %93, %93 : vector<32x128xf32>
    %99 = vector.shape_cast %98 : vector<32x128xf32> to vector<1x32x128xf32>
    %cst_87 = arith.constant dense<0.000000e+00> : vector<1xf32>
    %100 = vector.multi_reduction <add>, %99, %cst_87 [1, 2] : vector<1x32x128xf32> to vector<1xf32>
    %101 = vector.shape_cast %100 : vector<1xf32> to vector<1x1x1xf32>
    %102 = vector.extract %101[0, 0, 0] : f32 from vector<1x1x1xf32>
    %cst_88 = arith.constant 4.096000e+03 : f32
    %103 = arith.divf %97, %cst_88 : f32
    %cst_89 = arith.constant 4.096000e+03 : f32
    %104 = arith.divf %102, %cst_89 : f32
    %105 = arith.mulf %103, %103 : f32
    %106 = arith.subf %104, %105 : f32
    %107 = vector.broadcast %103 : f32 to vector<32x128xf32>
    %108 = arith.subf %93, %107 : vector<32x128xf32>
    %cst_90 = arith.constant 9.99999974E-6 : f32
    %109 = arith.addf %106, %cst_90 : f32
    %110 = math.rsqrt %109 : f32
    %111 = vector.broadcast %110 : f32 to vector<32x128xf32>
    %112 = arith.mulf %108, %111 : vector<32x128xf32>
    %113 = vector.broadcast %6 : vector<32x1xf32> to vector<32x128xf32>
    %114 = arith.mulf %112, %113 : vector<32x128xf32>
    %115 = vector.broadcast %7 : vector<32x1xf32> to vector<32x128xf32>
    %116 = arith.addf %114, %115 : vector<32x128xf32>
    %cst_91 = arith.constant 0.000000e+00 : f32
    %117 = vector.broadcast %cst_91 : f32 to vector<32x128xf32>
    %118 = arith.cmpf oge, %116, %117 : vector<32x128xf32>
    %cst_92 = arith.constant 2.000000e-01 : f32
    %119 = vector.broadcast %cst_92 : f32 to vector<32x128xf32>
    %120 = arith.mulf %119, %116 : vector<32x128xf32>
    %121 = arith.select %118, %116, %120 : vector<32x128xi1>, vector<32x128xf32>
    %122 = arith.truncf %121 : vector<32x128xf32> to vector<32x128xbf16>
    %123 = vector.extract_strided_slice %122 {offsets = [0, 1], sizes = [32, 1], strides = [1, 1]} : vector<32x128xbf16> to vector<32x1xbf16>
    %124 = vector.extract_strided_slice %122 {offsets = [0, 126], sizes = [32, 1], strides = [1, 1]} : vector<32x128xbf16> to vector<32x1xbf16>
    %125 = tpu.concatenate %123, %122, %124 in 1 : vector<32x1xbf16>, vector<32x128xbf16>, vector<32x1xbf16> -> vector<32x130xbf16>
    %126 = vector.extract_strided_slice %125 {offsets = [0, 0], sizes = [32, 128], strides = [1, 1]} : vector<32x130xbf16> to vector<32x128xbf16>
    %127 = vector.extract_strided_slice %125 {offsets = [0, 1], sizes = [32, 128], strides = [1, 1]} : vector<32x130xbf16> to vector<32x128xbf16>
    %128 = vector.extract_strided_slice %125 {offsets = [0, 2], sizes = [32, 128], strides = [1, 1]} : vector<32x130xbf16> to vector<32x128xbf16>
    %129 = tpu.concatenate %126, %127, %128 in 0 : vector<32x128xbf16>, vector<32x128xbf16>, vector<32x128xbf16> -> vector<96x128xbf16>
    %cst_93 = arith.constant dense<0.000000e+00> : vector<32x128xf32>
    %130 = tpu.matmul %8, %129, %cst_93 {dimension_numbers = #tpu.dot_dimension_numbers<[1], [0], [0], [1], [0, 0, 1, 1], [], []>} : vector<32x96xbf16>, vector<96x128xbf16>, vector<32x128xf32> -> vector<32x128xf32>
    %131 = vector.broadcast %9 : vector<32x1xf32> to vector<32x128xf32>
    %132 = arith.addf %130, %131 : vector<32x128xf32>
    %133 = arith.addf %54, %132 : vector<32x128xf32>
    %134 = vector.shape_cast %133 : vector<32x128xf32> to vector<1x32x128xf32>
    %cst_94 = arith.constant dense<0.000000e+00> : vector<1xf32>
    %135 = vector.multi_reduction <add>, %134, %cst_94 [1, 2] : vector<1x32x128xf32> to vector<1xf32>
    %136 = vector.shape_cast %135 : vector<1xf32> to vector<1x1x1xf32>
    %137 = vector.extract %136[0, 0, 0] : f32 from vector<1x1x1xf32>
    %138 = arith.mulf %133, %133 : vector<32x128xf32>
    %139 = vector.shape_cast %138 : vector<32x128xf32> to vector<1x32x128xf32>
    %cst_95 = arith.constant dense<0.000000e+00> : vector<1xf32>
    %140 = vector.multi_reduction <add>, %139, %cst_95 [1, 2] : vector<1x32x128xf32> to vector<1xf32>
    %141 = vector.shape_cast %140 : vector<1xf32> to vector<1x1x1xf32>
    %142 = vector.extract %141[0, 0, 0] : f32 from vector<1x1x1xf32>
    %cst_96 = arith.constant 4.096000e+03 : f32
    %143 = arith.divf %137, %cst_96 : f32
    %cst_97 = arith.constant 4.096000e+03 : f32
    %144 = arith.divf %142, %cst_97 : f32
    %145 = arith.mulf %143, %143 : f32
    %146 = arith.subf %144, %145 : f32
    %147 = vector.broadcast %143 : f32 to vector<32x128xf32>
    %148 = arith.subf %133, %147 : vector<32x128xf32>
    %cst_98 = arith.constant 9.99999974E-6 : f32
    %149 = arith.addf %146, %cst_98 : f32
    %150 = math.rsqrt %149 : f32
    %151 = vector.broadcast %150 : f32 to vector<32x128xf32>
    %152 = arith.mulf %148, %151 : vector<32x128xf32>
    %153 = vector.broadcast %10 : vector<32x1xf32> to vector<32x128xf32>
    %154 = arith.mulf %152, %153 : vector<32x128xf32>
    %155 = vector.broadcast %11 : vector<32x1xf32> to vector<32x128xf32>
    %156 = arith.addf %154, %155 : vector<32x128xf32>
    %cst_99 = arith.constant 0.000000e+00 : f32
    %157 = vector.broadcast %cst_99 : f32 to vector<32x128xf32>
    %158 = arith.cmpf oge, %156, %157 : vector<32x128xf32>
    %cst_100 = arith.constant 2.000000e-01 : f32
    %159 = vector.broadcast %cst_100 : f32 to vector<32x128xf32>
    %160 = arith.mulf %159, %156 : vector<32x128xf32>
    %161 = arith.select %158, %156, %160 : vector<32x128xi1>, vector<32x128xf32>
    %162 = arith.truncf %161 : vector<32x128xf32> to vector<32x128xbf16>
    %163 = vector.extract_strided_slice %162 {offsets = [0, 2], sizes = [32, 1], strides = [1, 1]} : vector<32x128xbf16> to vector<32x1xbf16>
    %164 = vector.extract_strided_slice %162 {offsets = [0, 1], sizes = [32, 1], strides = [1, 1]} : vector<32x128xbf16> to vector<32x1xbf16>
    %165 = vector.extract_strided_slice %162 {offsets = [0, 126], sizes = [32, 1], strides = [1, 1]} : vector<32x128xbf16> to vector<32x1xbf16>
    %166 = vector.extract_strided_slice %162 {offsets = [0, 125], sizes = [32, 1], strides = [1, 1]} : vector<32x128xbf16> to vector<32x1xbf16>
    %167 = tpu.concatenate %163, %164, %162, %165, %166 in 1 : vector<32x1xbf16>, vector<32x1xbf16>, vector<32x128xbf16>, vector<32x1xbf16>, vector<32x1xbf16> -> vector<32x132xbf16>
    %168 = vector.extract_strided_slice %167 {offsets = [0, 0], sizes = [32, 128], strides = [1, 1]} : vector<32x132xbf16> to vector<32x128xbf16>
    %169 = vector.extract_strided_slice %167 {offsets = [0, 2], sizes = [32, 128], strides = [1, 1]} : vector<32x132xbf16> to vector<32x128xbf16>
    %170 = vector.extract_strided_slice %167 {offsets = [0, 4], sizes = [32, 128], strides = [1, 1]} : vector<32x132xbf16> to vector<32x128xbf16>
    %171 = tpu.concatenate %168, %169, %170 in 0 : vector<32x128xbf16>, vector<32x128xbf16>, vector<32x128xbf16> -> vector<96x128xbf16>
    %cst_101 = arith.constant dense<0.000000e+00> : vector<32x128xf32>
    %172 = tpu.matmul %12, %171, %cst_101 {dimension_numbers = #tpu.dot_dimension_numbers<[1], [0], [0], [1], [0, 0, 1, 1], [], []>} : vector<32x96xbf16>, vector<96x128xbf16>, vector<32x128xf32> -> vector<32x128xf32>
    %173 = vector.broadcast %13 : vector<32x1xf32> to vector<32x128xf32>
    %174 = arith.addf %172, %173 : vector<32x128xf32>
    %175 = vector.shape_cast %174 : vector<32x128xf32> to vector<1x32x128xf32>
    %cst_102 = arith.constant dense<0.000000e+00> : vector<1xf32>
    %176 = vector.multi_reduction <add>, %175, %cst_102 [1, 2] : vector<1x32x128xf32> to vector<1xf32>
    %177 = vector.shape_cast %176 : vector<1xf32> to vector<1x1x1xf32>
    %178 = vector.extract %177[0, 0, 0] : f32 from vector<1x1x1xf32>
    %179 = arith.mulf %174, %174 : vector<32x128xf32>
    %180 = vector.shape_cast %179 : vector<32x128xf32> to vector<1x32x128xf32>
    %cst_103 = arith.constant dense<0.000000e+00> : vector<1xf32>
    %181 = vector.multi_reduction <add>, %180, %cst_103 [1, 2] : vector<1x32x128xf32> to vector<1xf32>
    %182 = vector.shape_cast %181 : vector<1xf32> to vector<1x1x1xf32>
    %183 = vector.extract %182[0, 0, 0] : f32 from vector<1x1x1xf32>
    %cst_104 = arith.constant 4.096000e+03 : f32
    %184 = arith.divf %178, %cst_104 : f32
    %cst_105 = arith.constant 4.096000e+03 : f32
    %185 = arith.divf %183, %cst_105 : f32
    %186 = arith.mulf %184, %184 : f32
    %187 = arith.subf %185, %186 : f32
    %188 = vector.broadcast %184 : f32 to vector<32x128xf32>
    %189 = arith.subf %174, %188 : vector<32x128xf32>
    %cst_106 = arith.constant 9.99999974E-6 : f32
    %190 = arith.addf %187, %cst_106 : f32
    %191 = math.rsqrt %190 : f32
    %192 = vector.broadcast %191 : f32 to vector<32x128xf32>
    %193 = arith.mulf %189, %192 : vector<32x128xf32>
    %194 = vector.broadcast %14 : vector<32x1xf32> to vector<32x128xf32>
    %195 = arith.mulf %193, %194 : vector<32x128xf32>
    %196 = vector.broadcast %15 : vector<32x1xf32> to vector<32x128xf32>
    %197 = arith.addf %195, %196 : vector<32x128xf32>
    %cst_107 = arith.constant 0.000000e+00 : f32
    %198 = vector.broadcast %cst_107 : f32 to vector<32x128xf32>
    %199 = arith.cmpf oge, %197, %198 : vector<32x128xf32>
    %cst_108 = arith.constant 2.000000e-01 : f32
    %200 = vector.broadcast %cst_108 : f32 to vector<32x128xf32>
    %201 = arith.mulf %200, %197 : vector<32x128xf32>
    %202 = arith.select %199, %197, %201 : vector<32x128xi1>, vector<32x128xf32>
    %203 = arith.truncf %202 : vector<32x128xf32> to vector<32x128xbf16>
    %204 = vector.extract_strided_slice %203 {offsets = [0, 2], sizes = [32, 1], strides = [1, 1]} : vector<32x128xbf16> to vector<32x1xbf16>
    %205 = vector.extract_strided_slice %203 {offsets = [0, 1], sizes = [32, 1], strides = [1, 1]} : vector<32x128xbf16> to vector<32x1xbf16>
    %206 = vector.extract_strided_slice %203 {offsets = [0, 126], sizes = [32, 1], strides = [1, 1]} : vector<32x128xbf16> to vector<32x1xbf16>
    %207 = vector.extract_strided_slice %203 {offsets = [0, 125], sizes = [32, 1], strides = [1, 1]} : vector<32x128xbf16> to vector<32x1xbf16>
    %208 = tpu.concatenate %204, %205, %203, %206, %207 in 1 : vector<32x1xbf16>, vector<32x1xbf16>, vector<32x128xbf16>, vector<32x1xbf16>, vector<32x1xbf16> -> vector<32x132xbf16>
    %209 = vector.extract_strided_slice %208 {offsets = [0, 0], sizes = [32, 128], strides = [1, 1]} : vector<32x132xbf16> to vector<32x128xbf16>
    %210 = vector.extract_strided_slice %208 {offsets = [0, 2], sizes = [32, 128], strides = [1, 1]} : vector<32x132xbf16> to vector<32x128xbf16>
    %211 = vector.extract_strided_slice %208 {offsets = [0, 4], sizes = [32, 128], strides = [1, 1]} : vector<32x132xbf16> to vector<32x128xbf16>
    %212 = tpu.concatenate %209, %210, %211 in 0 : vector<32x128xbf16>, vector<32x128xbf16>, vector<32x128xbf16> -> vector<96x128xbf16>
    %cst_109 = arith.constant dense<0.000000e+00> : vector<32x128xf32>
    %213 = tpu.matmul %16, %212, %cst_109 {dimension_numbers = #tpu.dot_dimension_numbers<[1], [0], [0], [1], [0, 0, 1, 1], [], []>} : vector<32x96xbf16>, vector<96x128xbf16>, vector<32x128xf32> -> vector<32x128xf32>
    %214 = vector.broadcast %17 : vector<32x1xf32> to vector<32x128xf32>
    %215 = arith.addf %213, %214 : vector<32x128xf32>
    %216 = arith.addf %133, %215 : vector<32x128xf32>
    %cst_110 = arith.constant 0.000000e+00 : f32
    %217 = vector.broadcast %cst_110 : f32 to vector<32x128xf32>
    %218 = arith.cmpf oge, %216, %217 : vector<32x128xf32>
    %cst_111 = arith.constant 2.000000e-01 : f32
    %219 = vector.broadcast %cst_111 : f32 to vector<32x128xf32>
    %220 = arith.mulf %219, %216 : vector<32x128xf32>
    %221 = arith.select %218, %216, %220 : vector<32x128xi1>, vector<32x128xf32>
    %222 = arith.truncf %221 : vector<32x128xf32> to vector<32x128xbf16>
    %223 = vector.extract_strided_slice %222 {offsets = [0, 2], sizes = [32, 1], strides = [1, 1]} : vector<32x128xbf16> to vector<32x1xbf16>
    %224 = vector.extract_strided_slice %222 {offsets = [0, 1], sizes = [32, 1], strides = [1, 1]} : vector<32x128xbf16> to vector<32x1xbf16>
    %225 = vector.extract_strided_slice %222 {offsets = [0, 126], sizes = [32, 1], strides = [1, 1]} : vector<32x128xbf16> to vector<32x1xbf16>
    %226 = vector.extract_strided_slice %222 {offsets = [0, 125], sizes = [32, 1], strides = [1, 1]} : vector<32x128xbf16> to vector<32x1xbf16>
    %227 = tpu.concatenate %223, %224, %222, %225, %226 in 1 : vector<32x1xbf16>, vector<32x1xbf16>, vector<32x128xbf16>, vector<32x1xbf16>, vector<32x1xbf16> -> vector<32x132xbf16>
    %228 = vector.extract_strided_slice %227 {offsets = [0, 0], sizes = [32, 128], strides = [1, 1]} : vector<32x132xbf16> to vector<32x128xbf16>
    %229 = vector.extract_strided_slice %227 {offsets = [0, 1], sizes = [32, 128], strides = [1, 1]} : vector<32x132xbf16> to vector<32x128xbf16>
    %230 = vector.extract_strided_slice %227 {offsets = [0, 2], sizes = [32, 128], strides = [1, 1]} : vector<32x132xbf16> to vector<32x128xbf16>
    %231 = vector.extract_strided_slice %227 {offsets = [0, 3], sizes = [32, 128], strides = [1, 1]} : vector<32x132xbf16> to vector<32x128xbf16>
    %232 = vector.extract_strided_slice %227 {offsets = [0, 4], sizes = [32, 128], strides = [1, 1]} : vector<32x132xbf16> to vector<32x128xbf16>
    %233 = tpu.concatenate %228, %229, %230, %231, %232 in 0 : vector<32x128xbf16>, vector<32x128xbf16>, vector<32x128xbf16>, vector<32x128xbf16>, vector<32x128xbf16> -> vector<160x128xbf16>
    %cst_112 = arith.constant dense<0.000000e+00> : vector<16x128xf32>
    %234 = tpu.matmul %18, %233, %cst_112 {dimension_numbers = #tpu.dot_dimension_numbers<[1], [0], [0], [1], [0, 0, 1, 1], [], []>} : vector<16x160xbf16>, vector<160x128xbf16>, vector<16x128xf32> -> vector<16x128xf32>
    %235 = vector.broadcast %19 : vector<16x1xf32> to vector<16x128xf32>
    %236 = arith.addf %234, %235 : vector<16x128xf32>
    %237 = vector.shape_cast %236 : vector<16x128xf32> to vector<1x16x128xf32>
    %cst_113 = arith.constant dense<0.000000e+00> : vector<1xf32>
    %238 = vector.multi_reduction <add>, %237, %cst_113 [1, 2] : vector<1x16x128xf32> to vector<1xf32>
    %239 = vector.shape_cast %238 : vector<1xf32> to vector<1x1x1xf32>
    %240 = vector.extract %239[0, 0, 0] : f32 from vector<1x1x1xf32>
    %241 = arith.mulf %236, %236 : vector<16x128xf32>
    %242 = vector.shape_cast %241 : vector<16x128xf32> to vector<1x16x128xf32>
    %cst_114 = arith.constant dense<0.000000e+00> : vector<1xf32>
    %243 = vector.multi_reduction <add>, %242, %cst_114 [1, 2] : vector<1x16x128xf32> to vector<1xf32>
    %244 = vector.shape_cast %243 : vector<1xf32> to vector<1x1x1xf32>
    %245 = vector.extract %244[0, 0, 0] : f32 from vector<1x1x1xf32>
    %cst_115 = arith.constant 2.048000e+03 : f32
    %246 = arith.divf %240, %cst_115 : f32
    %cst_116 = arith.constant 2.048000e+03 : f32
    %247 = arith.divf %245, %cst_116 : f32
    %248 = arith.mulf %246, %246 : f32
    %249 = arith.subf %247, %248 : f32
    %250 = vector.broadcast %246 : f32 to vector<16x128xf32>
    %251 = arith.subf %236, %250 : vector<16x128xf32>
    %cst_117 = arith.constant 9.99999974E-6 : f32
    %252 = arith.addf %249, %cst_117 : f32
    %253 = math.rsqrt %252 : f32
    %254 = vector.broadcast %253 : f32 to vector<16x128xf32>
    %255 = arith.mulf %251, %254 : vector<16x128xf32>
    %256 = vector.broadcast %20 : vector<16x1xf32> to vector<16x128xf32>
    %257 = arith.mulf %255, %256 : vector<16x128xf32>
    %258 = vector.broadcast %21 : vector<16x1xf32> to vector<16x128xf32>
    %259 = arith.addf %257, %258 : vector<16x128xf32>
    %cst_118 = arith.constant 0.000000e+00 : f32
    %260 = vector.broadcast %cst_118 : f32 to vector<16x128xf32>
    %261 = arith.cmpf oge, %259, %260 : vector<16x128xf32>
    %cst_119 = arith.constant 2.000000e-01 : f32
    %262 = vector.broadcast %cst_119 : f32 to vector<16x128xf32>
    %263 = arith.mulf %262, %259 : vector<16x128xf32>
    %264 = arith.select %261, %259, %263 : vector<16x128xi1>, vector<16x128xf32>
    %265 = arith.truncf %264 : vector<16x128xf32> to vector<16x128xbf16>
    %266 = vector.extract_strided_slice %265 {offsets = [0, 1], sizes = [16, 1], strides = [1, 1]} : vector<16x128xbf16> to vector<16x1xbf16>
    %267 = vector.extract_strided_slice %265 {offsets = [0, 126], sizes = [16, 1], strides = [1, 1]} : vector<16x128xbf16> to vector<16x1xbf16>
    %268 = tpu.concatenate %266, %265, %267 in 1 : vector<16x1xbf16>, vector<16x128xbf16>, vector<16x1xbf16> -> vector<16x130xbf16>
    %269 = vector.extract_strided_slice %268 {offsets = [0, 0], sizes = [16, 128], strides = [1, 1]} : vector<16x130xbf16> to vector<16x128xbf16>
    %270 = vector.extract_strided_slice %268 {offsets = [0, 1], sizes = [16, 128], strides = [1, 1]} : vector<16x130xbf16> to vector<16x128xbf16>
    %271 = vector.extract_strided_slice %268 {offsets = [0, 2], sizes = [16, 128], strides = [1, 1]} : vector<16x130xbf16> to vector<16x128xbf16>
    %272 = tpu.concatenate %269, %270, %271 in 0 : vector<16x128xbf16>, vector<16x128xbf16>, vector<16x128xbf16> -> vector<48x128xbf16>
    %cst_120 = arith.constant dense<0.000000e+00> : vector<16x128xf32>
    %273 = tpu.matmul %22, %272, %cst_120 {dimension_numbers = #tpu.dot_dimension_numbers<[1], [0], [0], [1], [0, 0, 1, 1], [], []>} : vector<16x48xbf16>, vector<48x128xbf16>, vector<16x128xf32> -> vector<16x128xf32>
    %274 = vector.broadcast %23 : vector<16x1xf32> to vector<16x128xf32>
    %275 = arith.addf %273, %274 : vector<16x128xf32>
    %276 = vector.shape_cast %275 : vector<16x128xf32> to vector<1x16x128xf32>
    %cst_121 = arith.constant dense<0.000000e+00> : vector<1xf32>
    %277 = vector.multi_reduction <add>, %276, %cst_121 [1, 2] : vector<1x16x128xf32> to vector<1xf32>
    %278 = vector.shape_cast %277 : vector<1xf32> to vector<1x1x1xf32>
    %279 = vector.extract %278[0, 0, 0] : f32 from vector<1x1x1xf32>
    %280 = arith.mulf %275, %275 : vector<16x128xf32>
    %281 = vector.shape_cast %280 : vector<16x128xf32> to vector<1x16x128xf32>
    %cst_122 = arith.constant dense<0.000000e+00> : vector<1xf32>
    %282 = vector.multi_reduction <add>, %281, %cst_122 [1, 2] : vector<1x16x128xf32> to vector<1xf32>
    %283 = vector.shape_cast %282 : vector<1xf32> to vector<1x1x1xf32>
    %284 = vector.extract %283[0, 0, 0] : f32 from vector<1x1x1xf32>
    %cst_123 = arith.constant 2.048000e+03 : f32
    %285 = arith.divf %279, %cst_123 : f32
    %cst_124 = arith.constant 2.048000e+03 : f32
    %286 = arith.divf %284, %cst_124 : f32
    %287 = arith.mulf %285, %285 : f32
    %288 = arith.subf %286, %287 : f32
    %289 = vector.broadcast %285 : f32 to vector<16x128xf32>
    %290 = arith.subf %275, %289 : vector<16x128xf32>
    %cst_125 = arith.constant 9.99999974E-6 : f32
    %291 = arith.addf %288, %cst_125 : f32
    %292 = math.rsqrt %291 : f32
    %293 = vector.broadcast %292 : f32 to vector<16x128xf32>
    %294 = arith.mulf %290, %293 : vector<16x128xf32>
    %295 = vector.broadcast %24 : vector<16x1xf32> to vector<16x128xf32>
    %296 = arith.mulf %294, %295 : vector<16x128xf32>
    %297 = vector.broadcast %25 : vector<16x1xf32> to vector<16x128xf32>
    %298 = arith.addf %296, %297 : vector<16x128xf32>
    %cst_126 = arith.constant 0.000000e+00 : f32
    %299 = vector.broadcast %cst_126 : f32 to vector<16x128xf32>
    %300 = arith.cmpf oge, %298, %299 : vector<16x128xf32>
    %cst_127 = arith.constant 2.000000e-01 : f32
    %301 = vector.broadcast %cst_127 : f32 to vector<16x128xf32>
    %302 = arith.mulf %301, %298 : vector<16x128xf32>
    %303 = arith.select %300, %298, %302 : vector<16x128xi1>, vector<16x128xf32>
    %304 = arith.truncf %303 : vector<16x128xf32> to vector<16x128xbf16>
    %305 = vector.extract_strided_slice %304 {offsets = [0, 1], sizes = [16, 1], strides = [1, 1]} : vector<16x128xbf16> to vector<16x1xbf16>
    %306 = vector.extract_strided_slice %304 {offsets = [0, 126], sizes = [16, 1], strides = [1, 1]} : vector<16x128xbf16> to vector<16x1xbf16>
    %307 = tpu.concatenate %305, %304, %306 in 1 : vector<16x1xbf16>, vector<16x128xbf16>, vector<16x1xbf16> -> vector<16x130xbf16>
    %308 = vector.extract_strided_slice %307 {offsets = [0, 0], sizes = [16, 128], strides = [1, 1]} : vector<16x130xbf16> to vector<16x128xbf16>
    %309 = vector.extract_strided_slice %307 {offsets = [0, 1], sizes = [16, 128], strides = [1, 1]} : vector<16x130xbf16> to vector<16x128xbf16>
    %310 = vector.extract_strided_slice %307 {offsets = [0, 2], sizes = [16, 128], strides = [1, 1]} : vector<16x130xbf16> to vector<16x128xbf16>
    %311 = tpu.concatenate %308, %309, %310 in 0 : vector<16x128xbf16>, vector<16x128xbf16>, vector<16x128xbf16> -> vector<48x128xbf16>
    %cst_128 = arith.constant dense<0.000000e+00> : vector<16x128xf32>
    %312 = tpu.matmul %26, %311, %cst_128 {dimension_numbers = #tpu.dot_dimension_numbers<[1], [0], [0], [1], [0, 0, 1, 1], [], []>} : vector<16x48xbf16>, vector<48x128xbf16>, vector<16x128xf32> -> vector<16x128xf32>
    %313 = vector.broadcast %27 : vector<16x1xf32> to vector<16x128xf32>
    %314 = arith.addf %312, %313 : vector<16x128xf32>
    %315 = arith.addf %236, %314 : vector<16x128xf32>
    %316 = vector.shape_cast %315 : vector<16x128xf32> to vector<1x16x128xf32>
    %cst_129 = arith.constant dense<0.000000e+00> : vector<1xf32>
    %317 = vector.multi_reduction <add>, %316, %cst_129 [1, 2] : vector<1x16x128xf32> to vector<1xf32>
    %318 = vector.shape_cast %317 : vector<1xf32> to vector<1x1x1xf32>
    %319 = vector.extract %318[0, 0, 0] : f32 from vector<1x1x1xf32>
    %320 = arith.mulf %315, %315 : vector<16x128xf32>
    %321 = vector.shape_cast %320 : vector<16x128xf32> to vector<1x16x128xf32>
    %cst_130 = arith.constant dense<0.000000e+00> : vector<1xf32>
    %322 = vector.multi_reduction <add>, %321, %cst_130 [1, 2] : vector<1x16x128xf32> to vector<1xf32>
    %323 = vector.shape_cast %322 : vector<1xf32> to vector<1x1x1xf32>
    %324 = vector.extract %323[0, 0, 0] : f32 from vector<1x1x1xf32>
    %cst_131 = arith.constant 2.048000e+03 : f32
    %325 = arith.divf %319, %cst_131 : f32
    %cst_132 = arith.constant 2.048000e+03 : f32
    %326 = arith.divf %324, %cst_132 : f32
    %327 = arith.mulf %325, %325 : f32
    %328 = arith.subf %326, %327 : f32
    %329 = vector.broadcast %325 : f32 to vector<16x128xf32>
    %330 = arith.subf %315, %329 : vector<16x128xf32>
    %cst_133 = arith.constant 9.99999974E-6 : f32
    %331 = arith.addf %328, %cst_133 : f32
    %332 = math.rsqrt %331 : f32
    %333 = vector.broadcast %332 : f32 to vector<16x128xf32>
    %334 = arith.mulf %330, %333 : vector<16x128xf32>
    %335 = vector.broadcast %28 : vector<16x1xf32> to vector<16x128xf32>
    %336 = arith.mulf %334, %335 : vector<16x128xf32>
    %337 = vector.broadcast %29 : vector<16x1xf32> to vector<16x128xf32>
    %338 = arith.addf %336, %337 : vector<16x128xf32>
    %cst_134 = arith.constant 0.000000e+00 : f32
    %339 = vector.broadcast %cst_134 : f32 to vector<16x128xf32>
    %340 = arith.cmpf oge, %338, %339 : vector<16x128xf32>
    %cst_135 = arith.constant 2.000000e-01 : f32
    %341 = vector.broadcast %cst_135 : f32 to vector<16x128xf32>
    %342 = arith.mulf %341, %338 : vector<16x128xf32>
    %343 = arith.select %340, %338, %342 : vector<16x128xi1>, vector<16x128xf32>
    %344 = arith.truncf %343 : vector<16x128xf32> to vector<16x128xbf16>
    %345 = vector.extract_strided_slice %344 {offsets = [0, 2], sizes = [16, 1], strides = [1, 1]} : vector<16x128xbf16> to vector<16x1xbf16>
    %346 = vector.extract_strided_slice %344 {offsets = [0, 1], sizes = [16, 1], strides = [1, 1]} : vector<16x128xbf16> to vector<16x1xbf16>
    %347 = vector.extract_strided_slice %344 {offsets = [0, 126], sizes = [16, 1], strides = [1, 1]} : vector<16x128xbf16> to vector<16x1xbf16>
    %348 = vector.extract_strided_slice %344 {offsets = [0, 125], sizes = [16, 1], strides = [1, 1]} : vector<16x128xbf16> to vector<16x1xbf16>
    %349 = tpu.concatenate %345, %346, %344, %347, %348 in 1 : vector<16x1xbf16>, vector<16x1xbf16>, vector<16x128xbf16>, vector<16x1xbf16>, vector<16x1xbf16> -> vector<16x132xbf16>
    %350 = vector.extract_strided_slice %349 {offsets = [0, 0], sizes = [16, 128], strides = [1, 1]} : vector<16x132xbf16> to vector<16x128xbf16>
    %351 = vector.extract_strided_slice %349 {offsets = [0, 2], sizes = [16, 128], strides = [1, 1]} : vector<16x132xbf16> to vector<16x128xbf16>
    %352 = vector.extract_strided_slice %349 {offsets = [0, 4], sizes = [16, 128], strides = [1, 1]} : vector<16x132xbf16> to vector<16x128xbf16>
    %353 = tpu.concatenate %350, %351, %352 in 0 : vector<16x128xbf16>, vector<16x128xbf16>, vector<16x128xbf16> -> vector<48x128xbf16>
    %cst_136 = arith.constant dense<0.000000e+00> : vector<16x128xf32>
    %354 = tpu.matmul %30, %353, %cst_136 {dimension_numbers = #tpu.dot_dimension_numbers<[1], [0], [0], [1], [0, 0, 1, 1], [], []>} : vector<16x48xbf16>, vector<48x128xbf16>, vector<16x128xf32> -> vector<16x128xf32>
    %355 = vector.broadcast %31 : vector<16x1xf32> to vector<16x128xf32>
    %356 = arith.addf %354, %355 : vector<16x128xf32>
    %357 = vector.shape_cast %356 : vector<16x128xf32> to vector<1x16x128xf32>
    %cst_137 = arith.constant dense<0.000000e+00> : vector<1xf32>
    %358 = vector.multi_reduction <add>, %357, %cst_137 [1, 2] : vector<1x16x128xf32> to vector<1xf32>
    %359 = vector.shape_cast %358 : vector<1xf32> to vector<1x1x1xf32>
    %360 = vector.extract %359[0, 0, 0] : f32 from vector<1x1x1xf32>
    %361 = arith.mulf %356, %356 : vector<16x128xf32>
    %362 = vector.shape_cast %361 : vector<16x128xf32> to vector<1x16x128xf32>
    %cst_138 = arith.constant dense<0.000000e+00> : vector<1xf32>
    %363 = vector.multi_reduction <add>, %362, %cst_138 [1, 2] : vector<1x16x128xf32> to vector<1xf32>
    %364 = vector.shape_cast %363 : vector<1xf32> to vector<1x1x1xf32>
    %365 = vector.extract %364[0, 0, 0] : f32 from vector<1x1x1xf32>
    %cst_139 = arith.constant 2.048000e+03 : f32
    %366 = arith.divf %360, %cst_139 : f32
    %cst_140 = arith.constant 2.048000e+03 : f32
    %367 = arith.divf %365, %cst_140 : f32
    %368 = arith.mulf %366, %366 : f32
    %369 = arith.subf %367, %368 : f32
    %370 = vector.broadcast %366 : f32 to vector<16x128xf32>
    %371 = arith.subf %356, %370 : vector<16x128xf32>
    %cst_141 = arith.constant 9.99999974E-6 : f32
    %372 = arith.addf %369, %cst_141 : f32
    %373 = math.rsqrt %372 : f32
    %374 = vector.broadcast %373 : f32 to vector<16x128xf32>
    %375 = arith.mulf %371, %374 : vector<16x128xf32>
    %376 = vector.broadcast %32 : vector<16x1xf32> to vector<16x128xf32>
    %377 = arith.mulf %375, %376 : vector<16x128xf32>
    %378 = vector.broadcast %33 : vector<16x1xf32> to vector<16x128xf32>
    %379 = arith.addf %377, %378 : vector<16x128xf32>
    %cst_142 = arith.constant 0.000000e+00 : f32
    %380 = vector.broadcast %cst_142 : f32 to vector<16x128xf32>
    %381 = arith.cmpf oge, %379, %380 : vector<16x128xf32>
    %cst_143 = arith.constant 2.000000e-01 : f32
    %382 = vector.broadcast %cst_143 : f32 to vector<16x128xf32>
    %383 = arith.mulf %382, %379 : vector<16x128xf32>
    %384 = arith.select %381, %379, %383 : vector<16x128xi1>, vector<16x128xf32>
    %385 = arith.truncf %384 : vector<16x128xf32> to vector<16x128xbf16>
    %386 = vector.extract_strided_slice %385 {offsets = [0, 2], sizes = [16, 1], strides = [1, 1]} : vector<16x128xbf16> to vector<16x1xbf16>
    %387 = vector.extract_strided_slice %385 {offsets = [0, 1], sizes = [16, 1], strides = [1, 1]} : vector<16x128xbf16> to vector<16x1xbf16>
    %388 = vector.extract_strided_slice %385 {offsets = [0, 126], sizes = [16, 1], strides = [1, 1]} : vector<16x128xbf16> to vector<16x1xbf16>
    %389 = vector.extract_strided_slice %385 {offsets = [0, 125], sizes = [16, 1], strides = [1, 1]} : vector<16x128xbf16> to vector<16x1xbf16>
    %390 = tpu.concatenate %386, %387, %385, %388, %389 in 1 : vector<16x1xbf16>, vector<16x1xbf16>, vector<16x128xbf16>, vector<16x1xbf16>, vector<16x1xbf16> -> vector<16x132xbf16>
    %391 = vector.extract_strided_slice %390 {offsets = [0, 0], sizes = [16, 128], strides = [1, 1]} : vector<16x132xbf16> to vector<16x128xbf16>
    %392 = vector.extract_strided_slice %390 {offsets = [0, 2], sizes = [16, 128], strides = [1, 1]} : vector<16x132xbf16> to vector<16x128xbf16>
    %393 = vector.extract_strided_slice %390 {offsets = [0, 4], sizes = [16, 128], strides = [1, 1]} : vector<16x132xbf16> to vector<16x128xbf16>
    %394 = tpu.concatenate %391, %392, %393 in 0 : vector<16x128xbf16>, vector<16x128xbf16>, vector<16x128xbf16> -> vector<48x128xbf16>
    %cst_144 = arith.constant dense<0.000000e+00> : vector<16x128xf32>
    %395 = tpu.matmul %34, %394, %cst_144 {dimension_numbers = #tpu.dot_dimension_numbers<[1], [0], [0], [1], [0, 0, 1, 1], [], []>} : vector<16x48xbf16>, vector<48x128xbf16>, vector<16x128xf32> -> vector<16x128xf32>
    %396 = vector.broadcast %35 : vector<16x1xf32> to vector<16x128xf32>
    %397 = arith.addf %395, %396 : vector<16x128xf32>
    %398 = arith.addf %315, %397 : vector<16x128xf32>
    %cst_145 = arith.constant 0.000000e+00 : f32
    %399 = vector.broadcast %cst_145 : f32 to vector<16x128xf32>
    %400 = arith.cmpf oge, %398, %399 : vector<16x128xf32>
    %cst_146 = arith.constant 2.000000e-01 : f32
    %401 = vector.broadcast %cst_146 : f32 to vector<16x128xf32>
    %402 = arith.mulf %401, %398 : vector<16x128xf32>
    %403 = arith.select %400, %398, %402 : vector<16x128xi1>, vector<16x128xf32>
    %404 = arith.truncf %403 : vector<16x128xf32> to vector<16x128xbf16>
    %cst_147 = arith.constant dense<0.000000e+00> : vector<8x128xf32>
    %405 = tpu.matmul %36, %404, %cst_147 {dimension_numbers = #tpu.dot_dimension_numbers<[1], [0], [0], [1], [0, 0, 1, 1], [], []>} : vector<8x16xbf16>, vector<16x128xbf16>, vector<8x128xf32> -> vector<8x128xf32>
    %406 = vector.broadcast %37 : vector<8x1xf32> to vector<8x128xf32>
    %407 = arith.addf %405, %406 : vector<8x128xf32>
    %c0_148 = arith.constant 0 : index
    %c0_149 = arith.constant 0 : index
    %c0_150 = arith.constant 0 : index
    %408 = vector.load %arg40[%c0_148, %c0_149, %c0_150] : memref<1x8x128xf32, #tpu.memory_space<vmem>>, vector<1x8x128xf32>
    %409 = vector.shape_cast %408 : vector<1x8x128xf32> to vector<8x128xf32>
    %410 = vector.shape_cast %407 : vector<8x128xf32> to vector<1x8x128xf32>
    tpu.vector_store %arg40[%c0_148, %c0_149, %c0_150], %410 {strides = array<i32>} : memref<1x8x128xf32, #tpu.memory_space<vmem>>, vector<1x8x128xf32>,
    return
  }
  func.func @transform_0(%arg0: i32) -> (i32, i32, i32) {
    %c0_i32 = arith.constant 0 : i32
    %c0_i32_0 = arith.constant 0 : i32
    %c0_i32_1 = arith.constant 0 : i32
    return %arg0, %c0_i32, %c0_i32_0 : i32, i32, i32
  }
  func.func @transform_1(%arg0: i32) -> (i32, i32) {
    %c0_i32 = arith.constant 0 : i32
    %c0_i32_0 = arith.constant 0 : i32
    %c0_i32_1 = arith.constant 0 : i32
    return %c0_i32, %c0_i32_0 : i32, i32
  }
  func.func @transform_2(%arg0: i32) -> (i32, i32) {
    %c0_i32 = arith.constant 0 : i32
    %c0_i32_0 = arith.constant 0 : i32
    %c0_i32_1 = arith.constant 0 : i32
    return %c0_i32, %c0_i32_0 : i32, i32
  }
  func.func @transform_3(%arg0: i32) -> (i32, i32) {
    %c0_i32 = arith.constant 0 : i32
    %c0_i32_0 = arith.constant 0 : i32
    %c0_i32_1 = arith.constant 0 : i32
    return %c0_i32, %c0_i32_0 : i32, i32
  }
  func.func @transform_4(%arg0: i32) -> (i32, i32) {
    %c0_i32 = arith.constant 0 : i32
    %c0_i32_0 = arith.constant 0 : i32
    %c0_i32_1 = arith.constant 0 : i32
    return %c0_i32, %c0_i32_0 : i32, i32
  }
  func.func @transform_5(%arg0: i32) -> (i32, i32) {
    %c0_i32 = arith.constant 0 : i32
    %c0_i32_0 = arith.constant 0 : i32
    %c0_i32_1 = arith.constant 0 : i32
    return %c0_i32, %c0_i32_0 : i32, i32
  }
  func.func @transform_6(%arg0: i32) -> (i32, i32) {
    %c0_i32 = arith.constant 0 : i32
    %c0_i32_0 = arith.constant 0 : i32
    %c0_i32_1 = arith.constant 0 : i32
    return %c0_i32, %c0_i32_0 : i32, i32
  }
  func.func @transform_7(%arg0: i32) -> (i32, i32) {
    %c0_i32 = arith.constant 0 : i32
    %c0_i32_0 = arith.constant 0 : i32
    %c0_i32_1 = arith.constant 0 : i32
    return %c0_i32, %c0_i32_0 : i32, i32
  }
  func.func @transform_8(%arg0: i32) -> (i32, i32) {
    %c0_i32 = arith.constant 0 : i32
    %c0_i32_0 = arith.constant 0 : i32
    %c0_i32_1 = arith.constant 0 : i32
    return %c0_i32, %c0_i32_0 : i32, i32
  }
  func.func @transform_9(%arg0: i32) -> (i32, i32) {
    %c0_i32 = arith.constant 0 : i32
    %c0_i32_0 = arith.constant 0 : i32
    %c0_i32_1 = arith.constant 0 : i32
    return %c0_i32, %c0_i32_0 : i32, i32
  }
  func.func @transform_10(%arg0: i32) -> (i32, i32) {
    %c0_i32 = arith.constant 0 : i32
    %c0_i32_0 = arith.constant 0 : i32
    %c0_i32_1 = arith.constant 0 : i32
    return %c0_i32, %c0_i32_0 : i32, i32
  }
  func.func @transform_11(%arg0: i32) -> (i32, i32) {
    %c0_i32 = arith.constant 0 : i32
    %c0_i32_0 = arith.constant 0 : i32
    %c0_i32_1 = arith.constant 0 : i32
    return %c0_i32, %c0_i32_0 : i32, i32
  }
  func.func @transform_12(%arg0: i32) -> (i32, i32) {
    %c0_i32 = arith.constant 0 : i32
    %c0_i32_0 = arith.constant 0 : i32
    %c0_i32_1 = arith.constant 0 : i32
    return %c0_i32, %c0_i32_0 : i32, i32
  }
  func.func @transform_13(%arg0: i32) -> (i32, i32) {
    %c0_i32 = arith.constant 0 : i32
    %c0_i32_0 = arith.constant 0 : i32
    %c0_i32_1 = arith.constant 0 : i32
    return %c0_i32, %c0_i32_0 : i32, i32
  }
  func.func @transform_14(%arg0: i32) -> (i32, i32) {
    %c0_i32 = arith.constant 0 : i32
    %c0_i32_0 = arith.constant 0 : i32
    %c0_i32_1 = arith.constant 0 : i32
    return %c0_i32, %c0_i32_0 : i32, i32
  }
  func.func @transform_15(%arg0: i32) -> (i32, i32) {
    %c0_i32 = arith.constant 0 : i32
    %c0_i32_0 = arith.constant 0 : i32
    %c0_i32_1 = arith.constant 0 : i32
    return %c0_i32, %c0_i32_0 : i32, i32
  }
  func.func @transform_16(%arg0: i32) -> (i32, i32) {
    %c0_i32 = arith.constant 0 : i32
    %c0_i32_0 = arith.constant 0 : i32
    %c0_i32_1 = arith.constant 0 : i32
    return %c0_i32, %c0_i32_0 : i32, i32
  }
  func.func @transform_17(%arg0: i32) -> (i32, i32) {
    %c0_i32 = arith.constant 0 : i32
    %c0_i32_0 = arith.constant 0 : i32
    %c0_i32_1 = arith.constant 0 : i32
    return %c0_i32, %c0_i32_0 : i32, i32
  }
  func.func @transform_18(%arg0: i32) -> (i32, i32) {
    %c0_i32 = arith.constant 0 : i32
    %c0_i32_0 = arith.constant 0 : i32
    %c0_i32_1 = arith.constant 0 : i32
    return %c0_i32, %c0_i32_0 : i32, i32
  }
  func.func @transform_19(%arg0: i32) -> (i32, i32) {
    %c0_i32 = arith.constant 0 : i32
    %c0_i32_0 = arith.constant 0 : i32
    %c0_i32_1 = arith.constant 0 : i32
    return %c0_i32, %c0_i32_0 : i32, i32
  }
  func.func @transform_20(%arg0: i32) -> (i32, i32) {
    %c0_i32 = arith.constant 0 : i32
    %c0_i32_0 = arith.constant 0 : i32
    %c0_i32_1 = arith.constant 0 : i32
    return %c0_i32, %c0_i32_0 : i32, i32
  }
  func.func @transform_21(%arg0: i32) -> (i32, i32) {
    %c0_i32 = arith.constant 0 : i32
    %c0_i32_0 = arith.constant 0 : i32
    %c0_i32_1 = arith.constant 0 : i32
    return %c0_i32, %c0_i32_0 : i32, i32
  }
  func.func @transform_22(%arg0: i32) -> (i32, i32) {
    %c0_i32 = arith.constant 0 : i32
    %c0_i32_0 = arith.constant 0 : i32
    %c0_i32_1 = arith.constant 0 : i32
    return %c0_i32, %c0_i32_0 : i32, i32
  }
  func.func @transform_23(%arg0: i32) -> (i32, i32) {
    %c0_i32 = arith.constant 0 : i32
    %c0_i32_0 = arith.constant 0 : i32
    %c0_i32_1 = arith.constant 0 : i32
    return %c0_i32, %c0_i32_0 : i32, i32
  }
  func.func @transform_24(%arg0: i32) -> (i32, i32) {
    %c0_i32 = arith.constant 0 : i32
    %c0_i32_0 = arith.constant 0 : i32
    %c0_i32_1 = arith.constant 0 : i32
    return %c0_i32, %c0_i32_0 : i32, i32
  }
  func.func @transform_25(%arg0: i32) -> (i32, i32) {
    %c0_i32 = arith.constant 0 : i32
    %c0_i32_0 = arith.constant 0 : i32
    %c0_i32_1 = arith.constant 0 : i32
    return %c0_i32, %c0_i32_0 : i32, i32
  }
  func.func @transform_26(%arg0: i32) -> (i32, i32) {
    %c0_i32 = arith.constant 0 : i32
    %c0_i32_0 = arith.constant 0 : i32
    %c0_i32_1 = arith.constant 0 : i32
    return %c0_i32, %c0_i32_0 : i32, i32
  }
  func.func @transform_27(%arg0: i32) -> (i32, i32) {
    %c0_i32 = arith.constant 0 : i32
    %c0_i32_0 = arith.constant 0 : i32
    %c0_i32_1 = arith.constant 0 : i32
    return %c0_i32, %c0_i32_0 : i32, i32
  }
  func.func @transform_28(%arg0: i32) -> (i32, i32) {
    %c0_i32 = arith.constant 0 : i32
    %c0_i32_0 = arith.constant 0 : i32
    %c0_i32_1 = arith.constant 0 : i32
    return %c0_i32, %c0_i32_0 : i32, i32
  }
  func.func @transform_29(%arg0: i32) -> (i32, i32) {
    %c0_i32 = arith.constant 0 : i32
    %c0_i32_0 = arith.constant 0 : i32
    %c0_i32_1 = arith.constant 0 : i32
    return %c0_i32, %c0_i32_0 : i32, i32
  }
  func.func @transform_30(%arg0: i32) -> (i32, i32) {
    %c0_i32 = arith.constant 0 : i32
    %c0_i32_0 = arith.constant 0 : i32
    %c0_i32_1 = arith.constant 0 : i32
    return %c0_i32, %c0_i32_0 : i32, i32
  }
  func.func @transform_31(%arg0: i32) -> (i32, i32) {
    %c0_i32 = arith.constant 0 : i32
    %c0_i32_0 = arith.constant 0 : i32
    %c0_i32_1 = arith.constant 0 : i32
    return %c0_i32, %c0_i32_0 : i32, i32
  }
  func.func @transform_32(%arg0: i32) -> (i32, i32) {
    %c0_i32 = arith.constant 0 : i32
    %c0_i32_0 = arith.constant 0 : i32
    %c0_i32_1 = arith.constant 0 : i32
    return %c0_i32, %c0_i32_0 : i32, i32
  }
  func.func @transform_33(%arg0: i32) -> (i32, i32) {
    %c0_i32 = arith.constant 0 : i32
    %c0_i32_0 = arith.constant 0 : i32
    %c0_i32_1 = arith.constant 0 : i32
    return %c0_i32, %c0_i32_0 : i32, i32
  }
  func.func @transform_34(%arg0: i32) -> (i32, i32) {
    %c0_i32 = arith.constant 0 : i32
    %c0_i32_0 = arith.constant 0 : i32
    %c0_i32_1 = arith.constant 0 : i32
    return %c0_i32, %c0_i32_0 : i32, i32
  }
  func.func @transform_35(%arg0: i32) -> (i32, i32) {
    %c0_i32 = arith.constant 0 : i32
    %c0_i32_0 = arith.constant 0 : i32
    %c0_i32_1 = arith.constant 0 : i32
    return %c0_i32, %c0_i32_0 : i32, i32
  }
  func.func @transform_36(%arg0: i32) -> (i32, i32) {
    %c0_i32 = arith.constant 0 : i32
    %c0_i32_0 = arith.constant 0 : i32
    %c0_i32_1 = arith.constant 0 : i32
    return %c0_i32, %c0_i32_0 : i32, i32
  }
  func.func @transform_37(%arg0: i32) -> (i32, i32) {
    %c0_i32 = arith.constant 0 : i32
    %c0_i32_0 = arith.constant 0 : i32
    %c0_i32_1 = arith.constant 0 : i32
    return %c0_i32, %c0_i32_0 : i32, i32
  }
  func.func @transform_38(%arg0: i32) -> (i32, i32) {
    %c0_i32 = arith.constant 0 : i32
    %c0_i32_0 = arith.constant 0 : i32
    %c0_i32_1 = arith.constant 0 : i32
    return %c0_i32, %c0_i32_0 : i32, i32
  }
  func.func @transform_39(%arg0: i32) -> (i32, i32, i32) {
    %c0_i32 = arith.constant 0 : i32
    %c0_i32_0 = arith.constant 0 : i32
    %c0_i32_1 = arith.constant 0 : i32
    return %arg0, %c0_i32, %c0_i32_0 : i32, i32, i32
  }
}

</mosaic_0001>

<bundles_post_ra>
// kernel: tpu_custom_call.1
= control target key start
LH: loop header
LB: loop body
LE: loop exit
PB: predicated region body
PF: predicated region fallthrough
CT: control target
= control target key end

     0   :  { %s3736_s6 = smov 1   ;;  %s3737_s10 = smov 2   ;;  %s4548_s0 = inlined_call_operand.smem [shape: u32[40], index: -1, kind: input, shape index: {}] }
   0x1   :  { %s3795_s5 = sld [smem:[%s4548_s0]]   ;;  %s3738_s14 = smov 3  }
   0x2   :  { %s3800_s9 = sld [smem:[%s4548_s0 + %s3736_s6]]   ;;  %s3739_s18 = smov 4  }
   0x3   :  { %s3805_s13 = sld [smem:[%s4548_s0 + %s3737_s10]]   ;;  %s3740_s22 = smov 5  }
   0x4   :  { %s3810_s17 = sld [smem:[%s4548_s0 + %s3738_s14]]   ;;  %s3741_s26 = smov 6  }
   0x5   :  { %s3815_s21 = sld [smem:[%s4548_s0 + %s3739_s18]]   ;;  %s3742_s30 = smov 7  }
   0x6   :  { %s3820_s25 = sld [smem:[%s4548_s0 + %s3740_s22]]   ;;  %s3743_s4 = smov 8  }
   0x7   :  { %4611 = sst [smem:[#allocation5_spill]] %s3795_s5  ;;  %s3744_s10 = smov 9  }
   0x8   :  { %4612 = sst [smem:[#allocation6_spill]] %s3800_s9  ;;  %s3745_s15 = smov 10  }
   0x9   :  { %4613 = sst [smem:[#allocation7_spill]] %s3805_s13  ;;  %s3746_s20 = smov 11  }
   0xa   :  { %4614 = sst [smem:[#allocation8_spill]] %s3810_s17  ;;  %s3748_s1 = smov 13  }
   0xb   :  { %s3825_s29 = sld [smem:[%s4548_s0 + %s3741_s26]]   ;;  %s3747_s26 = smov 12  }
   0xc   :  { %s3830_s3 = sld [smem:[%s4548_s0 + %s3742_s30]]   ;;  %s3749_s7 = smov 14  }
   0xd   :  { %s3835_s8 = sld [smem:[%s4548_s0 + %s3743_s4]]   ;;  %s3751_s22 = smov 16  }
   0xe   :  { %s3840_s14 = sld [smem:[%s4548_s0 + %s3744_s10]]   ;;  %s3752_s28 = smov 17  }
   0xf   :  { %s3845_s19 = sld [smem:[%s4548_s0 + %s3745_s15]]   ;;  %s3750_s15 = smov 15  }
  0x10   :  { %s3850_s24 = sld [smem:[%s4548_s0 + %s3746_s20]]  }
  0x11   :  { %s3855_s30 = sld [smem:[%s4548_s0 + %s3747_s26]]  }
  0x12   :  { %4615 = sst [smem:[#allocation9_spill]] %s3830_s3 }
  0x13   :  { %4616 = sst [smem:[#allocation10_spill]] %s3835_s8 }
  0x14   :  { %4617 = sst [smem:[#allocation11_spill]] %s3840_s14 }
  0x15   :  { %4618 = sst [smem:[#allocation12_spill]] %s3845_s19 }
  0x16   :  { %s3860_s6 = sld [smem:[%s4548_s0 + %s3748_s1]]  }
  0x17   :  { %s3865_s12 = sld [smem:[%s4548_s0 + %s3749_s7]]   ;;  %s3753_s7 = smov 18  }
  0x18   :  { %s3870_s20 = sld [smem:[%s4548_s0 + %s3750_s15]]   ;;  %s3754_s15 = smov 19  }
  0x19   :  { %s3875_s27 = sld [smem:[%s4548_s0 + %s3751_s22]]   ;;  %s3755_s22 = smov 20  }
  0x1a   :  { %s3880_s4 = sld [smem:[%s4548_s0 + %s3752_s28]]   ;;  %s3756_s28 = smov 21  }
  0x1c   :  { %4619 = sst [smem:[#allocation13_spill]] %s3860_s6 }
  0x1d   :  { %4620 = sst [smem:[#allocation14_spill]] %s3865_s12 }
  0x1e   :  { %4621 = sst [smem:[#allocation15_spill]] %s3870_s20 }
  0x1f   :  { %4622 = sst [smem:[#allocation16_spill]] %s3875_s27 }
  0x20   :  { %4623 = sst [smem:[#allocation17_spill]] %s3880_s4 }
  0x21   :  { %s3885_s6 = sld [smem:[%s4548_s0 + %s3753_s7]]   ;;  %s3757_s7 = smov 22  }
  0x22   :  { %s3890_s20 = sld [smem:[%s4548_s0 + %s3754_s15]]   ;;  %s3758_s15 = smov 23  }
  0x23   :  { %s3895_s27 = sld [smem:[%s4548_s0 + %s3755_s22]]   ;;  %s3759_s22 = smov 24  }
  0x24   :  { %s3900_s4 = sld [smem:[%s4548_s0 + %s3756_s28]]   ;;  %s3760_s28 = smov 25  }
  0x27   :  { %4624 = sst [smem:[#allocation18_spill]] %s3885_s6 }
  0x28   :  { %4625 = sst [smem:[#allocation19_spill]] %s3890_s20 }
  0x29   :  { %4626 = sst [smem:[#allocation20_spill]] %s3895_s27 }
  0x2a   :  { %4627 = sst [smem:[#allocation21_spill]] %s3900_s4 }
  0x2b   :  { %s3905_s6 = sld [smem:[%s4548_s0 + %s3757_s7]]   ;;  %s3761_s7 = smov 26  }
  0x2c   :  { %s3910_s20 = sld [smem:[%s4548_s0 + %s3758_s15]]   ;;  %s3762_s15 = smov 27  }
  0x2d   :  { %s3915_s27 = sld [smem:[%s4548_s0 + %s3759_s22]]   ;;  %s3763_s22 = smov 28  }
  0x2e   :  { %s3920_s4 = sld [smem:[%s4548_s0 + %s3760_s28]]   ;;  %s3764_s28 = smov 29  }
  0x31   :  { %4628 = sst [smem:[#allocation22_spill]] %s3905_s6 }
  0x32   :  { %4629 = sst [smem:[#allocation23_spill]] %s3910_s20 }
  0x33   :  { %4630 = sst [smem:[#allocation24_spill]] %s3915_s27 }
  0x34   :  { %4631 = sst [smem:[#allocation25_spill]] %s3920_s4 }
  0x35   :  { %s3925_s6 = sld [smem:[%s4548_s0 + %s3761_s7]]   ;;  %s3765_s7 = smov 30  }
  0x36   :  { %s3930_s20 = sld [smem:[%s4548_s0 + %s3762_s15]]   ;;  %s3766_s15 = smov 31  }
  0x37   :  { %s3935_s27 = sld [smem:[%s4548_s0 + %s3763_s22]]   ;;  %s3767_s22 = smov 32  }
  0x38   :  { %s3940_s4 = sld [smem:[%s4548_s0 + %s3764_s28]]   ;;  %s3768_s28 = smov 33  }
  0x3b   :  { %4632 = sst [smem:[#allocation26_spill]] %s3925_s6 }
  0x3c   :  { %4633 = sst [smem:[#allocation27_spill]] %s3930_s20 }
  0x3d   :  { %4634 = sst [smem:[#allocation28_spill]] %s3935_s27 }
  0x3e   :  { %4635 = sst [smem:[#allocation29_spill]] %s3940_s4 }
  0x3f   :  { %s3945_s6 = sld [smem:[%s4548_s0 + %s3765_s7]]   ;;  %s3769_s7 = smov 34  }
  0x40   :  { %s3950_s20 = sld [smem:[%s4548_s0 + %s3766_s15]]   ;;  %s3770_s15 = smov 35  }
  0x41   :  { %s3955_s27 = sld [smem:[%s4548_s0 + %s3767_s22]]   ;;  %s3771_s22 = smov 36  }
  0x42   :  { %s3960_s4 = sld [smem:[%s4548_s0 + %s3768_s28]]   ;;  %s3772_s28 = smov 37  }
  0x45   :  { %4636 = sst [smem:[#allocation30_spill]] %s3945_s6 }
  0x46   :  { %4637 = sst [smem:[#allocation31_spill]] %s3950_s20 }
  0x47   :  { %4638 = sst [smem:[#allocation32_spill]] %s3955_s27 }
  0x48   :  { %4639 = sst [smem:[#allocation33_spill]] %s3960_s4 }
  0x49   :  { %s3965_s6 = sld [smem:[%s4548_s0 + %s3769_s7]]   ;;  %s3773_s7 = smov 38  }
  0x4a   :  { %s3970_s20 = sld [smem:[%s4548_s0 + %s3770_s15]]   ;;  %s3774_s15 = smov 39  }
  0x4b   :  { %s3975_s27 = sld [smem:[%s4548_s0 + %s3771_s22]]  }
  0x4c   :  { %s3980_s4 = sld [smem:[%s4548_s0 + %s3772_s28]]  }
  0x4f   :  { %4640 = sst [smem:[#allocation34_spill]] %s3965_s6 }
  0x50   :  { %4641 = sst [smem:[#allocation35_spill]] %s3970_s20 }
  0x51   :  { %s3985_s6 = sld [smem:[%s4548_s0 + %s3773_s7]]  }
  0x52   :  { %s3990_s20 = sld [smem:[%s4548_s0 + %s3774_s15]]  }
  0x53   :  { %84 = vsyncpa [#allocation3], 0 }
  0x54   :  { %86 = vsyncpa [#allocation3 + $0x1], 0  ;;  %s3992_s22 = smov 0   ;;  %s3994_s23 = smov 0  }
  0x55   :  { %s3996_s26 = smov 0   ;;  %s3998_s28 = smov 0  }
  0x56 LB: > { %s4642_s19 = sld [smem:[#allocation12_spill]]  ;;  %s4013_s0 = sadd.s32 4294967295, %s3734_s28   ;;  %s3734_s28 = sphi %s3998_s28, %s4689_s28   ;;  %s3730_s26 = sphi %s3996_s26, %s4691_s26   ;;  %s3726_s23 = sphi %s3994_s23, %s4693_s23   ;;  %s3722_s22 = sphi %s3992_s22, %s4692_s22  }
  0x57   : > { %s4643_s17 = sld [smem:[#allocation8_spill]]  ;;  %s3399_s1 = sadd.s32 4294967294, %s3734_s28  }
  0x58   : > { %s4644_s14 = sld [smem:[#allocation11_spill]]  ;;  %s4017_s2 = sadd.s32 1, %s3734_s28  }
  0x59   : > { %s4645_s12 = sld [smem:[#allocation14_spill]]  ;;  %s923_s7 = sadd.s32 1, %s3730_s26 }
  0x5a   : > { %s4646_s13 = sld [smem:[#allocation7_spill]]  ;;  %s920_s10 = ssub.s32 %s3734_s28, %s4017_s2 }
  0x5b   : > { %s4647_s9 = sld [smem:[#allocation6_spill]]  ;;  %p933_p0 = scmp.ne.s32.totalorder %s3730_s26, %s3726_s23 }
  0x5c   : > { %s4648_s8 = sld [smem:[#allocation10_spill]]  ;;  %p921_p1 = scmp.eq.s32.totalorder %s920_s10, 0 }
  0x5d   : > { %s4649_s3 = sld [smem:[#allocation9_spill]]  ;;  %p934_p2 = scmp.eq.s32.totalorder %s4013_s0, 1 }
  0x5e   : > { %4650 = sst [smem:[#allocation36_spill]] %s3730_s26  ;;  %p939_p3 = scmp.ne.s32.totalorder %s3726_s23, %s3722_s22 }
  0x5f   : > { %4651 = sst [smem:[#allocation37_spill]] %s4017_s2  ;;  %p940_p4 = scmp.eq.s32.totalorder %s3399_s1, 1 }
  0x60   : > { %s4028_s11 = scalar_select %p921_p1, %s3730_s26, %s923_s7  }
  0x61   : > { %p4030_p5 = por %p934_p2, %p933_p0  ;;  %p4034_p6 = por %p940_p4, %p939_p3 }
  0x62   : > { %4652 = sst [smem:[#allocation38_spill]] %s4028_s11  ;;  %p3402_p7 = scmp.ge.s32.totalorder %s3734_s28, 1 }
  0x63   : > { %p1080_p8 = scmp.lt.s32.totalorder %s3734_s28, 3 }
  0x65   : > { %p1081_p9 = pnand %p3402_p7, %p1080_p8 }
  0x66   : > { %s4655_s5 = sld [smem:[#allocation5_spill]] (!%p1081_p9)  ;;  %p1176_p10 = scmp.lt.s32.totalorder (!%p1081_p9), %s4013_s0, 1 }
  0x67   : > { %1084 = sbr.rel (%p1081_p9) target bundleno = 6550 (0x1996), region = 176  ;;  %s4580_s10 = smov (!%p1081_p9), 126  }
  0x68   : > { %s4578_s11 = smov (!%p1081_p9), 4   ;;  %s4574_s26 = smov (!%p1081_p9), 2  }
  0x69   : > { %s4576_s2 = smov (!%p1081_p9), 6  }
  0x6c   : > { %s1177_s18 = scalar_select %p1176_p10, %s4013_s0, 1  ;;  %vm1309_vm0 = vcmask 7168   ;;  %vm1313_vm1 = vcmask 15360   ;;  %vm1319_vm2 = vcmask 23552   ;;  %v1187_v15 = vld [vmem:[%s4646_s13 + $0x8] sm:$0xff]  ;;  %v3782_v16 = vmov 0  }
  0x6d   : > { %3650 = vset.pattern.permute.xlu1 %v3782_v16  ;;  %3649 = vset.pattern.permute.xlu0 %v3782_v16  ;;  %v1189_v17 = vld [vmem:[%s4646_s13 + $0x18] sm:$0xff]  ;;  %v1192_v18 = vld [vmem:[%s4643_s17 + $0x10] sm:$0xff]  ;;  %vm1349_vm3 = vcmask 1014784   ;;  %v1186_v24 = vld [vmem:[%s4646_s13] sm:$0xff]  ;;  %vm1342_vm4 = vcmask 1022976   ;;  %vm1335_vm5 = vcmask 1031168  }
  0x6e   : > { %s3490_s1 = sshll.u32 %s1177_s18, 4  ;;  %s4570_s18 = smov 125   ;;  %3651 = vset.pattern.permute.xlu2 %v3782_v16  ;;  %v1193_v20 = vld [vmem:[%s4643_s17 + $0x18] sm:$0xff]  ;;  %v1196_v23 = vld [vmem:[%s3815_s21 + $0x10] sm:$0xff]  ;;  %v1190_v30 = vld [vmem:[%s4643_s17] sm:$0xff]  ;;  %vm1328_vm6 = vcmask 1039360  }
  0x6f   : > { %s1180_s7 = scalar_lea.vmem %s4655_s5, %s3490_s1  ;;  %s4572_s1 = smov 124   ;;  %v1197_v25 = vld [vmem:[%s3815_s21 + $0x18] sm:$0xff]  ;;  %v1188_v31 = vld [vmem:[%s4646_s13 + $0x10] sm:$0xff]  ;;  %v1194_v36 = vld [vmem:[%s3815_s21] sm:$0xff]  ;;  %vm1382_vm7 = vcmask 654336  }
  0x70   : > { %v1292_v0 = vld [vmem:[%s1180_s7] sm:$0xff]  ;;  %v1293_v1 = vld [vmem:[%s1180_s7 + $0x8] sm:$0xff]  ;;  %s4582_s7 = smov 127  }
  0x71   : > { %v1294_v2 = vpack.c.bf16 %v1292_v0, %v1292_v0  ;;  %v1295_v3 = vpack.c.bf16 %v1293_v1, %v1293_v1  ;;  %v3491_v38 = vld [vmem:[%s4647_s9] sm:$0xff]  ;;  %v3492_v39 = vld [vmem:[%s4647_s9 + $0x8] sm:$0xff]  ;;  %v3783_v0 = vmov 4096.0  }
  0x72   : > { %v1195_v62 = vld [vmem:[%s3815_s21 + $0x8] sm:$0xff]  ;;  %3652 = vrcp.f32 %v3783_v0 }
  0x73   : > { %v1298_v4 = vunpack.c.l.b16 %v1294_v2  ;;  %v1299_v5 = vunpack.c.l.b16 %v1295_v3  ;;  %v1191_v63 = vld [vmem:[%s4643_s17 + $0x8] sm:$0xff] }
  0x75   : > { %v1300_v6 = vpack.c.b16 %v1299_v5, %v1298_v4 }
  0x77   : > { %1301 = vrot.lane.b32.xlu0 %v1300_v6, %s4580_s10  ;;  %1305 = vrot.lane.b32.xlu1 %v1300_v6, %s4578_s11 }
  0x78   : > { %v3653_v1 = vpop.eup %3652 }
  0x79   : > { %v1437_v2 = vmul.f32 4096.0, %v3653_v1  ;;  %vm1441_vm8 = vweird.f32 %v3653_v1 }
  0x7b   : > { %v1438_v5 = vsub.f32 1.0, %v1437_v2 }
  0x7f   : > { %1303 = vrot.lane.b32.xlu0 %v1300_v6, %s4574_s26  ;;  %1307 = vrot.lane.b32.xlu1 %v1300_v6, %s4576_s2 }
  0xe9   : > { %v1302_v7 = vpop.permute.xlu0 %1301  ;;  %v1306_v8 = vpop.permute.xlu1 %1305 }
  0xea   : > { %v1312_v9 = vsel %vm1309_vm0, %v1302_v7, %v1300_v6 }
  0xf1   : > { %v1304_v10 = vpop.permute.xlu0 %1303  ;;  %v1308_v11 = vpop.permute.xlu1 %1307 }
  0xf2   : > { %v1315_v12 = vsel %vm1313_vm1, %v1312_v9, %v1304_v10  ;;  %v1318_v13 = vsel %vm1313_vm1, %v1304_v10, %v1306_v8 }
  0xf3   : > { %v1321_v14 = vsel %vm1319_vm2, %v1318_v13, %v1308_v11  ;;  %1338 = vrot.lane.b32.xlu0 %v1315_v12, %s4570_s18  ;;  %1345 = vrot.lane.b32.xlu2 %v1315_v12, %s4572_s1  ;;  %v1439_v11 = vmul.f32 %v3653_v1, %v1438_v5 }
  0xf4   : > { %1340 = vrot.lane.b32.xlu1 %v1321_v14, %s4570_s18 }
  0xf5   : > { %v1440_v16 = vadd.f32 %v3653_v1, %v1439_v11 }
  0xfb   : > { %1333 = vrot.lane.b32.xlu0 %v1321_v14, %s4580_s10  ;;  %1347 = vrot.lane.b32.xlu2 %v1321_v14, %s4572_s1 }
  0xfc   : > { %1324 = vrot.lane.b32.xlu1 %v1315_v12, %s4582_s7 }
 0x103   : > { %1331 = vrot.lane.b32.xlu2 %v1315_v12, %s4580_s10  ;;  %1354 = vperm.xlu0 %3649, %v1186_v24  }
 0x104   : > { %1359 = vperm.xlu1 %3650, %v1187_v15  }
 0x10b   : > { %1326 = vrot.lane.b32.xlu2 %v1321_v14, %s4582_s7 }
 0x10c   : > { %1369 = vperm.xlu1 %3650, %v1189_v17  }
 0x113   : > { %1364 = vperm.xlu2 %3651, %v1188_v31  }
 0x114   : > { %1491 = vperm.xlu1 %3650, %v1192_v18  }
 0x11c   : > { %1496 = vperm.xlu1 %3650, %v1193_v20   ;;  %v1442_v20 = vsel %vm1441_vm8, %v3653_v1, %v1440_v16 }
 0x124   : > { %1515 = vperm.xlu1 %3650, %v1196_v23  }
 0x12c   : > { %1520 = vperm.xlu1 %3650, %v1197_v25  }
 0x134   : > { %1481 = vperm.xlu1 %3650, %v1190_v30  }
 0x13c   : > { %1505 = vperm.xlu1 %3650, %v1194_v36  }
 0x14d   : > { %v1346_v19 = vpop.permute.xlu2 %1345 }
 0x155   : > { %v1348_v21 = vpop.permute.xlu2 %1347 }
 0x156   : > { %v1350_v22 = vsel %vm1349_vm3, %v1346_v19, %v1348_v21 }
 0x157   : > { %1392 = vmatpush.bf16.msra.mxu0 %v1350_v22 }
 0x15d   : > { %v1332_v28 = vpop.permute.xlu2 %1331 }
 0x165   : > { %v1339_v26 = vpop.permute.xlu0 %1338  ;;  %v1327_v35 = vpop.permute.xlu2 %1326 }
 0x166   : > { %v1341_v27 = vpop.permute.xlu1 %1340 }
 0x167   : > { %v1343_v29 = vsel %vm1342_vm4, %v1339_v26, %v1341_v27 }
 0x168   : > { %1393 = vmatpush.bf16.msra.mxu0 %v1343_v29 }
 0x16d   : > { %v1334_v32 = vpop.permute.xlu0 %1333  ;;  %v1365_v45 = vpop.permute.xlu2 %1364 }
 0x16e   : > { %v1336_v33 = vsel %vm1335_vm5, %v1332_v28, %v1334_v32  ;;  %v1325_v34 = vpop.permute.xlu1 %1324 }
 0x16f   : > { %1394 = vmatpush.bf16.msra.mxu0 %v1336_v33  ;;  %v1329_v37 = vsel %vm1328_vm6, %v1325_v34, %v1327_v35 }
 0x173   : > { %1395 = vmatpush.bf16.msra.mxu0 %v1329_v37 }
 0x175   : > { %v1355_v43 = vpop.permute.xlu0 %1354 }
 0x176   : > { %v1360_v42 = vpop.permute.xlu1 %1359 }
 0x177   : > { %1396 = vmatpush.bf16.msra.mxu0 %v1315_v12 }
 0x17a   : > { %3414 = vmatmul.msk.bf16.vlgmr.msra.gmra.mxu0 %vm1382_vm7, %v3491_v38 }
 0x17e   : > { %v1370_v53 = vpop.permute.xlu1 %1369 }
 0x186   : > { %v1492_v29 = vpop.permute.xlu1 %1491 }
 0x18a   : > { %3415 = vmatmul.msk.bf16.gmra.mxu0 %vm1382_vm7, %v3492_v39  ;;  %vm1635_vm7 = vcmask 785408  }
 0x18e   : > { %v1497_v30 = vpop.permute.xlu1 %1496 }
 0x196   : > { %v1516_v31 = vpop.permute.xlu1 %1515 }
 0x19e   : > { %v1521_v32 = vpop.permute.xlu1 %1520 }
 0x1a6   : > { %v1482_v33 = vpop.permute.xlu1 %1481 }
 0x1f7   : > { %v1398_v40 = vpop.f32.mrf.mxu0 }
 0x1f8   : > { %v4077_v47 = vadd.f32 %v1398_v40, %v1355_v43 }
 0x1fa   : > { %v1420_v51 = vmul.f32 %v4077_v47, %v4077_v47 }
 0x1ff   : > { %v1400_v41 = vpop.f32.mrf.mxu0 }
 0x200   : > { %v4075_v46 = vadd.f32 %v1400_v41, %v1360_v42 }
 0x202   : > { %v1421_v49 = vmul.f32 %v4075_v46, %v4075_v46  ;;  %v1408_v50 = vadd.f32 %v4075_v46, %v4077_v47 }
 0x204   : > { %v1424_v57 = vadd.f32 %v1421_v49, %v1420_v51 }
 0x207   : > { %v1403_v44 = vpop.f32.mrf.mxu0 }
 0x208   : > { %v4079_v48 = vadd.f32 %v1403_v44, %v1365_v45 }
 0x20a   : > { %v1422_v52 = vmul.f32 %v4079_v48, %v4079_v48  ;;  %v1409_v56 = vadd.f32 %v1408_v50, %v4079_v48 }
 0x20c   : > { %v1425_v60 = vadd.f32 %v1424_v57, %v1422_v52  ;;  %v1506_v52 = vpop.permute.xlu1 %1505 }
 0x20f   : > { %v1405_v54 = vpop.f32.mrf.mxu0 }
 0x210   : > { %v4089_v55 = vadd.f32 %v1405_v54, %v1370_v53 }
 0x212   : > { %v1410_v58 = vadd.f32 %v1409_v56, %v4089_v55  ;;  %v1423_v59 = vmul.f32 %v4089_v55, %v4089_v55 }
 0x214   : > { %1411 = vadd.xlane.f32.xlu2 %v1410_v58  ;;  %v1426_v61 = vadd.f32 %v1425_v60, %v1423_v59 }
 0x216   : > { %1427 = vadd.xlane.f32.xlu0 %v1426_v61 }
 0x22a   : > { %1510 = vperm.xlu0 %3649, %v1195_v62  }
 0x22c   : > { %1486 = vperm.xlu2 %3651, %v1191_v63  }
 0x287   : > { %v1412_v3 = vpop.xlane.xlu2 %1411 }
 0x288   : > { %v1413_v4 = vrot.slane %v1412_v3, 4 }
 0x289   : > { %v1428_v6 = vpop.xlane.xlu0 %1427 }
 0x28a   : > { %v1414_v7 = vadd.f32 %v1413_v4, %v1412_v3  ;;  %v1429_v8 = vrot.slane %v1428_v6, 4 }
 0x28c   : > { %v1430_v9 = vadd.f32 %v1429_v8, %v1428_v6  ;;  %v1415_v10 = vrot.slane %v1414_v7, 2 }
 0x28e   : > { %v1416_v12 = vadd.f32 %v1415_v10, %v1414_v7  ;;  %v1431_v13 = vrot.slane %v1430_v9, 2 }
 0x28f   : > { %v1487_v44 = vpop.permute.xlu2 %1486 }
 0x290   : > { %v1417_v14 = vrot.slane %v1416_v12, 1  ;;  %v1432_v15 = vadd.f32 %v1431_v13, %v1430_v9 }
 0x292   : > { %v1418_v17 = vadd.f32 %v1417_v14, %v1416_v12  ;;  %v1433_v18 = vrot.slane %v1432_v15, 1 }
 0x294   : > { %3507 = vpush %v1418_v17  ;;  %v1434_v19 = vadd.f32 %v1433_v18, %v1432_v15 }
 0x296   : > { %3509 = vpush %v1434_v19 }
 0x297   : > { %3511 = vpush %v1442_v20 }
 0x29c   : > { %v1511_v53 = vpop.permute.xlu0 %1510 }
 0x2c5   : > { %s3508_s18 = spop %3507 }
 0x2c7   : > { %s3510_s1 = spop %3509 }
 0x2c8   : > { %s4097_s26 = spop %3511 }
 0x2c9   : > { %s1444_s2 = smul.f32 %s4097_s26, %s3508_s18  ;;  %s4657_s18 = smov 126  }
 0x2ca   : > { %s1453_s11 = smul.f32 %s4097_s26, %s3510_s1 }
 0x2cb   : > { %s1454_s10 = smul.f32 %s1444_s2, %s1444_s2  ;;  %v1456_v34 = vstv %s1444_s2  ;;  %s4586_s2 = smov 3  }
 0x2cc   : > { %v1457_v35 = vsub.f32 %v4077_v47, %v1456_v34  ;;  %v1458_v36 = vsub.f32 %v4075_v46, %v1456_v34  ;;  %v1459_v37 = vsub.f32 %v4079_v48, %v1456_v34  ;;  %v1460_v38 = vsub.f32 %v4089_v55, %v1456_v34 }
 0x2cd   : > { %s1455_s7 = ssub.f32 %s1453_s11, %s1454_s10  ;;  %s4656_s11 = smov 127  }
 0x2ce   : > { %s4584_s10 = smov 1  }
 0x2cf   : > { %s1461_s5 = sadd.f32 1e-05, %s1455_s7 }
 0x2d1   : > { %v1462_v21 = vstv %s1461_s5 }
 0x2d2   : > { %3654 = vrsqrt.f32 %v1462_v21  ;;  %vm1469_vm10 = vweird.f32 %v1462_v21 }
 0x2d8   : > { %v3655_v22 = vpop.eup %3654 }
 0x2d9   : > { %v1464_v23 = vmul.f32 %v3655_v22, %v1462_v21  ;;  %vm1470_vm9 = vweird.f32 %v3655_v22 }
 0x2da   : > { %vm1471_vm11 = vmor %vm1469_vm10, %vm1470_vm9 }
 0x2db   : > { %v1465_v24 = vmul.f32 %v3655_v22, %v1464_v23  ;;  %v1202_v23 = vld [vmem:[%s3825_s29] sm:$0xff] }
 0x2dd   : > { %v1466_v25 = vmul.f32 0.5, %v1465_v24  ;;  %v1204_v24 = vld [vmem:[%s3825_s29 + $0x10] sm:$0xff] }
 0x2df   : > { %v1467_v26 = vsub.f32 1.5, %v1466_v25  ;;  %v1203_v25 = vld [vmem:[%s3825_s29 + $0x8] sm:$0xff] }
 0x2e1   : > { %v1468_v27 = vmul.f32 %v3655_v22, %v1467_v26  ;;  %v1205_v26 = vld [vmem:[%s3825_s29 + $0x18] sm:$0xff] }
 0x2e3   : > { %v1472_v28 = vsel %vm1471_vm11, %v3655_v22, %v1468_v27  ;;  %v1208_v27 = vld [vmem:[%s4649_s3 + $0x10] sm:$0xff] }
 0x2e4   : > { %3513 = vpush %v1472_v28  ;;  %v1209_v28 = vld [vmem:[%s4649_s3 + $0x18] sm:$0xff] }
 0x315   : > { %s3514_s5 = spop %3513 }
 0x316   : > { %v1474_v39 = vstv %s3514_s5 }
 0x317   : > { %v1475_v40 = vmul.f32 %v1474_v39, %v1457_v35  ;;  %v1476_v41 = vmul.f32 %v1474_v39, %v1458_v36  ;;  %v1477_v42 = vmul.f32 %v1474_v39, %v1459_v37  ;;  %v1478_v43 = vmul.f32 %v1474_v39, %v1460_v38 }
 0x319   : > { %v1499_v45 = vmul.f32 %v1482_v33, %v1475_v40  ;;  %v1500_v49 = vmul.f32 %v1487_v44, %v1476_v41  ;;  %v1501_v50 = vmul.f32 %v1492_v29, %v1477_v42  ;;  %v1502_v51 = vmul.f32 %v1497_v30, %v1478_v43  ;;  %v1212_v29 = vld [vmem:[%s4648_s8 + $0x10] sm:$0xff]  ;;  %v1213_v30 = vld [vmem:[%s4648_s8 + $0x18] sm:$0xff] }
 0x31b   : > { %v1523_v54 = vadd.f32 %v1506_v52, %v1499_v45  ;;  %v1524_v56 = vadd.f32 %v1511_v53, %v1500_v49  ;;  %v1525_v57 = vadd.f32 %v1516_v31, %v1501_v50  ;;  %v1526_v58 = vadd.f32 %v1521_v32, %v1502_v51  ;;  %v1206_v31 = vld [vmem:[%s4649_s3] sm:$0xff]  ;;  %v3494_v49 = vld [vmem:[%s3820_s25 + $0x8] sm:$0xff] }
 0x31c   : > { %v1210_v32 = vld [vmem:[%s4648_s8] sm:$0xff] }
 0x31d   : > { %vm1529_vm12 = vcmp.ge.f32.partialorder %v1525_v57, 0.0  ;;  %vm1530_vm13 = vcmp.ge.f32.partialorder %v1526_v58, 0.0  ;;  %v1533_v59 = vmul.f32 0.2, %v1525_v57  ;;  %v1534_v60 = vmul.f32 0.2, %v1526_v58 }
 0x31e   : > { %vm1527_vm14 = vcmp.ge.f32.partialorder %v1523_v54, 0.0  ;;  %vm1528_vm15 = vcmp.ge.f32.partialorder %v1524_v56, 0.0  ;;  %v1531_v61 = vmul.f32 0.2, %v1523_v54  ;;  %v1532_v62 = vmul.f32 0.2, %v1524_v56 }
 0x31f   : > { %v1537_v63 = vsel %vm1529_vm12, %v1525_v57, %v1533_v59  ;;  %v1538_v0 = vsel %vm1530_vm13, %v1526_v58, %v1534_v60  ;;  %v3493_v45 = vld [vmem:[%s3820_s25] sm:$0xff] }
 0x320   : > { %v1541_v1 = vpack.c.bf16 %v1537_v63, %v1537_v63  ;;  %v1542_v2 = vpack.c.bf16 %v1538_v0, %v1538_v0  ;;  %v1535_v3 = vsel %vm1527_vm14, %v1523_v54, %v1531_v61  ;;  %v1536_v4 = vsel %vm1528_vm15, %v1524_v56, %v1532_v62 }
 0x321   : > { %v1539_v5 = vpack.c.bf16 %v1535_v3, %v1535_v3  ;;  %v1540_v6 = vpack.c.bf16 %v1536_v4, %v1536_v4 }
 0x322   : > { %v1549_v7 = vunpack.c.l.b16 %v1541_v1  ;;  %v1550_v8 = vunpack.c.l.b16 %v1542_v2 }
 0x323   : > { %v1547_v9 = vunpack.c.l.b16 %v1539_v5  ;;  %v1548_v10 = vunpack.c.l.b16 %v1540_v6 }
 0x324   : > { %v1552_v11 = vpack.c.b16 %v1550_v8, %v1549_v7 }
 0x325   : > { %v1551_v12 = vpack.c.b16 %v1548_v10, %v1547_v9  ;;  %v1207_v9 = vld [vmem:[%s4649_s3 + $0x8] sm:$0xff] }
 0x326   : > { %1563 = vrot.lane.b32.xlu2 %v1552_v11, %s4586_s2  ;;  %1555 = vrot.lane.b32.xlu1 %v1552_v11, %s4656_s11  ;;  %v1211_v10 = vld [vmem:[%s4648_s8 + $0x8] sm:$0xff] }
 0x327   : > { %1553 = vrot.lane.b32.xlu0 %v1551_v12, %s4656_s11 }
 0x32e   : > { %1559 = vrot.lane.b32.xlu1 %v1552_v11, %s4584_s10  ;;  %1561 = vrot.lane.b32.xlu2 %v1551_v12, %s4586_s2 }
 0x336   : > { %1557 = vrot.lane.b32.xlu1 %v1551_v12, %s4584_s10 }
 0x380   : > { %v1564_v14 = vpop.permute.xlu2 %1563 }
 0x388   : > { %v1562_v18 = vpop.permute.xlu2 %1561 }
 0x398   : > { %v1556_v13 = vpop.permute.xlu1 %1555 }
 0x399   : > { %v1554_v19 = vpop.permute.xlu0 %1553 }
 0x3a0   : > { %v1560_v15 = vpop.permute.xlu1 %1559 }
 0x3a1   : > { %v1571_v16 = vsel %vm1309_vm0, %v1556_v13, %v1560_v15  ;;  %v1576_v17 = vsel %vm1309_vm0, %v1560_v15, %v1564_v14 }
 0x3a2   : > { %1597 = vrot.lane.b32.xlu0 %v1571_v16, %s4657_s18  ;;  %1599 = vrot.lane.b32.xlu1 %v1576_v17, %s4657_s18 }
 0x3a8   : > { %v1558_v20 = vpop.permute.xlu1 %1557 }
 0x3a9   : > { %v1567_v21 = vsel %vm1309_vm0, %v1554_v19, %v1558_v20  ;;  %v1574_v22 = vsel %vm1309_vm0, %v1558_v20, %v1562_v18 }
 0x3aa   : > { %1593 = vrot.lane.b32.xlu2 %v1567_v21, %s4657_s18  ;;  %1585 = vrot.lane.b32.xlu1 %v1571_v16, %s4656_s11 }
 0x3ab   : > { %1595 = vrot.lane.b32.xlu0 %v1574_v22, %s4657_s18 }
 0x3b2   : > { %1587 = vrot.lane.b32.xlu2 %v1576_v17, %s4656_s11  ;;  %1583 = vrot.lane.b32.xlu1 %v1574_v22, %s4656_s11 }
 0x3b3   : > { %1581 = vrot.lane.b32.xlu0 %v1567_v21, %s4656_s11 }
 0x3ba   : > { %1607 = vperm.xlu2 %3651, %v1202_v23   ;;  %1617 = vperm.xlu1 %3650, %v1204_v24  }
 0x3bb   : > { %1612 = vperm.xlu0 %3649, %v1203_v25  }
 0x3c2   : > { %1622 = vperm.xlu2 %3651, %v1205_v26  }
 0x3ca   : > { %1744 = vperm.xlu2 %3651, %v1208_v27  }
 0x3d2   : > { %1749 = vperm.xlu2 %3651, %v1209_v28  }
 0x3da   : > { %1768 = vperm.xlu2 %3651, %v1212_v29  }
 0x3e2   : > { %1773 = vperm.xlu2 %3651, %v1213_v30  }
 0x3ea   : > { %1734 = vperm.xlu2 %3651, %v1206_v31  }
 0x3f2   : > { %1758 = vperm.xlu2 %3651, %v1210_v32  }
 0x404   : > { %v1594_v36 = vpop.permute.xlu2 %1593 }
 0x40c   : > { %v1588_v40 = vpop.permute.xlu2 %1587 }
 0x414   : > { %v1598_v33 = vpop.permute.xlu0 %1597  ;;  %v1600_v34 = vpop.permute.xlu1 %1599 }
 0x415   : > { %v1602_v35 = vsel %vm1335_vm5, %v1598_v33, %v1600_v34  ;;  %v1608_v52 = vpop.permute.xlu2 %1607 }
 0x416   : > { %1644 = vmatpush.bf16.msra.mxu1 %v1602_v35 }
 0x41c   : > { %v1586_v37 = vpop.permute.xlu1 %1585 }
 0x41d   : > { %v1596_v38 = vpop.permute.xlu0 %1595  ;;  %v1590_v41 = vsel %vm1328_vm6, %v1586_v37, %v1588_v40  ;;  %v1623_v0 = vpop.permute.xlu2 %1622 }
 0x41e   : > { %v1601_v39 = vsel %vm1335_vm5, %v1594_v36, %v1596_v38 }
 0x41f   : > { %1645 = vmatpush.bf16.msra.mxu1 %v1601_v39 }
 0x423   : > { %1646 = vmatpush.bf16.msra.mxu1 %v1590_v41 }
 0x424   : > { %v1584_v42 = vpop.permute.xlu1 %1583 }
 0x425   : > { %v1582_v43 = vpop.permute.xlu0 %1581  ;;  %v1745_v33 = vpop.permute.xlu2 %1744 }
 0x426   : > { %v1589_v44 = vsel %vm1328_vm6, %v1582_v43, %v1584_v42 }
 0x427   : > { %1647 = vmatpush.bf16.msra.mxu1 %v1589_v44 }
 0x42b   : > { %1648 = vmatpush.bf16.msra.mxu1 %v1571_v16 }
 0x42c   : > { %v1618_v57 = vpop.permute.xlu1 %1617 }
 0x42d   : > { %v1613_v53 = vpop.permute.xlu0 %1612  ;;  %v1750_v34 = vpop.permute.xlu2 %1749 }
 0x42f   : > { %1649 = vmatpush.bf16.msra.mxu1 %v1567_v21 }
 0x432   : > { %3424 = vmatmul.msk.bf16.vlgmr.msra.gmra.mxu1 %vm1635_vm7, %v3493_v45 }
 0x435   : > { %v1769_v35 = vpop.permute.xlu2 %1768 }
 0x43d   : > { %v1774_v36 = vpop.permute.xlu2 %1773 }
 0x442   : > { %3425 = vmatmul.msk.bf16.gmra.mxu1 %vm1635_vm7, %v3494_v49 }
 0x445   : > { %v1735_v37 = vpop.permute.xlu2 %1734 }
 0x4af   : > { %v1651_v50 = vpop.f32.mrf.mxu1 }
 0x4b0   : > { %v4143_v58 = vadd.f32 %v1651_v50, %v1608_v52 }
 0x4b2   : > { %v1673_v61 = vmul.f32 %v4143_v58, %v4143_v58 }
 0x4b7   : > { %v1653_v51 = vpop.f32.mrf.mxu1 }
 0x4b8   : > { %v4141_v56 = vadd.f32 %v1653_v51, %v1613_v53 }
 0x4ba   : > { %v1674_v60 = vmul.f32 %v4141_v56, %v4141_v56  ;;  %v1661_v62 = vadd.f32 %v4141_v56, %v4143_v58 }
 0x4bc   : > { %v1677_v4 = vadd.f32 %v1674_v60, %v1673_v61  ;;  %v1759_v60 = vpop.permute.xlu2 %1758 }
 0x4bf   : > { %v1656_v54 = vpop.f32.mrf.mxu1 }
 0x4c0   : > { %v4145_v59 = vadd.f32 %v1656_v54, %v1618_v57 }
 0x4c2   : > { %v1675_v63 = vmul.f32 %v4145_v59, %v4145_v59  ;;  %v1662_v3 = vadd.f32 %v1661_v62, %v4145_v59 }
 0x4c4   : > { %v1678_v7 = vadd.f32 %v1677_v4, %v1675_v63 }
 0x4c7   : > { %v1658_v1 = vpop.f32.mrf.mxu1 }
 0x4c8   : > { %v4155_v2 = vadd.f32 %v1658_v1, %v1623_v0 }
 0x4ca   : > { %v1663_v5 = vadd.f32 %v1662_v3, %v4155_v2  ;;  %v1676_v6 = vmul.f32 %v4155_v2, %v4155_v2 }
 0x4cc   : > { %1664 = vadd.xlane.f32.xlu0 %v1663_v5  ;;  %v1679_v8 = vadd.f32 %v1678_v7, %v1676_v6 }
 0x4ce   : > { %1680 = vadd.xlane.f32.xlu1 %v1679_v8 }
 0x4e0   : > { %1739 = vperm.xlu0 %3649, %v1207_v9  }
 0x4e7   : > { %1763 = vperm.xlu1 %3650, %v1211_v10  }
 0x53f   : > { %v1665_v11 = vpop.xlane.xlu0 %1664 }
 0x540   : > { %v1666_v12 = vrot.slane %v1665_v11, 4 }
 0x541   : > { %v1681_v13 = vpop.xlane.xlu1 %1680 }
 0x542   : > { %v1667_v14 = vadd.f32 %v1666_v12, %v1665_v11  ;;  %v1682_v15 = vrot.slane %v1681_v13, 4 }
 0x544   : > { %v1683_v16 = vadd.f32 %v1682_v15, %v1681_v13  ;;  %v1668_v17 = vrot.slane %v1667_v14, 2 }
 0x546   : > { %v1669_v18 = vadd.f32 %v1668_v17, %v1667_v14  ;;  %v1684_v19 = vrot.slane %v1683_v16, 2 }
 0x548   : > { %v1670_v20 = vrot.slane %v1669_v18, 1  ;;  %v1685_v21 = vadd.f32 %v1684_v19, %v1683_v16 }
 0x54a   : > { %v1671_v22 = vadd.f32 %v1670_v20, %v1669_v18  ;;  %v1686_v23 = vrot.slane %v1685_v21, 1 }
 0x54c   : > { %3515 = vpush %v1671_v22  ;;  %v1687_v24 = vadd.f32 %v1686_v23, %v1685_v21 }
 0x54e   : > { %3517 = vpush %v1687_v24 }
 0x552   : > { %v1740_v51 = vpop.permute.xlu0 %1739 }
 0x559   : > { %v1764_v61 = vpop.permute.xlu1 %1763 }
 0x57d   : > { %s3516_s1 = spop %3515 }
 0x57e   : > { %s1697_s7 = smul.f32 %s3516_s1, %s4097_s26 }
 0x57f   : > { %s3518_s5 = spop %3517 }
 0x580   : > { %s1707_s10 = smul.f32 %s1697_s7, %s1697_s7  ;;  %v1709_v38 = vstv %s1697_s7 }
 0x581   : > { %s1706_s2 = smul.f32 %s3518_s5, %s4097_s26  ;;  %v1710_v39 = vsub.f32 %v4143_v58, %v1709_v38  ;;  %v1711_v40 = vsub.f32 %v4141_v56, %v1709_v38  ;;  %v1712_v41 = vsub.f32 %v4145_v59, %v1709_v38  ;;  %v1713_v42 = vsub.f32 %v4155_v2, %v1709_v38 }
 0x583   : > { %s1708_s3 = ssub.f32 %s1706_s2, %s1707_s10  ;;  %s4659_s2 = smov 1  }
 0x585   : > { %s1714_s8 = sadd.f32 1e-05, %s1708_s3 }
 0x587   : > { %v1715_v25 = vstv %s1714_s8  ;;  %s4658_s8 = smov 3  }
 0x588   : > { %3656 = vrsqrt.f32 %v1715_v25  ;;  %vm1722_vm9 = vweird.f32 %v1715_v25 }
 0x58e   : > { %v3657_v26 = vpop.eup %3656 }
 0x58f   : > { %v1717_v27 = vmul.f32 %v3657_v26, %v1715_v25  ;;  %vm1723_vm8 = vweird.f32 %v3657_v26 }
 0x590   : > { %vm1724_vm10 = vmor %vm1722_vm9, %vm1723_vm8 }
 0x591   : > { %v1718_v28 = vmul.f32 %v3657_v26, %v1717_v27  ;;  %v1218_v27 = vld [vmem:[%s4642_s19] sm:$0xff] }
 0x593   : > { %v1719_v29 = vmul.f32 0.5, %v1718_v28  ;;  %v1220_v28 = vld [vmem:[%s4642_s19 + $0x10] sm:$0xff] }
 0x595   : > { %v1720_v30 = vsub.f32 1.5, %v1719_v29  ;;  %v1219_v29 = vld [vmem:[%s4642_s19 + $0x8] sm:$0xff] }
 0x597   : > { %v1721_v31 = vmul.f32 %v3657_v26, %v1720_v30  ;;  %v1221_v30 = vld [vmem:[%s4642_s19 + $0x18] sm:$0xff] }
 0x599   : > { %v1725_v32 = vsel %vm1724_vm10, %v3657_v26, %v1721_v31  ;;  %v1224_v31 = vld [vmem:[%s3850_s24 + $0x10] sm:$0xff] }
 0x59a   : > { %3519 = vpush %v1725_v32  ;;  %v1225_v32 = vld [vmem:[%s3850_s24 + $0x18] sm:$0xff] }
 0x5cb   : > { %s3520_s3 = spop %3519 }
 0x5cc   : > { %v1727_v43 = vstv %s3520_s3 }
 0x5cd   : > { %v1728_v44 = vmul.f32 %v1727_v43, %v1710_v39  ;;  %v1729_v45 = vmul.f32 %v1727_v43, %v1711_v40  ;;  %v1730_v49 = vmul.f32 %v1727_v43, %v1712_v41  ;;  %v1731_v50 = vmul.f32 %v1727_v43, %v1713_v42 }
 0x5cf   : > { %v1752_v52 = vmul.f32 %v1735_v37, %v1728_v44  ;;  %v1753_v53 = vmul.f32 %v1740_v51, %v1729_v45  ;;  %v1754_v54 = vmul.f32 %v1745_v33, %v1730_v49  ;;  %v1755_v57 = vmul.f32 %v1750_v34, %v1731_v50  ;;  %v1228_v33 = vld [vmem:[%s3855_s30 + $0x10] sm:$0xff]  ;;  %v1229_v34 = vld [vmem:[%s3855_s30 + $0x18] sm:$0xff] }
 0x5d1   : > { %v1776_v58 = vadd.f32 %v1759_v60, %v1752_v52  ;;  %v1777_v62 = vadd.f32 %v1764_v61, %v1753_v53  ;;  %v1778_v56 = vadd.f32 %v1769_v35, %v1754_v54  ;;  %v1779_v63 = vadd.f32 %v1774_v36, %v1755_v57  ;;  %v1222_v35 = vld [vmem:[%s3850_s24] sm:$0xff]  ;;  %v3496_v53 = vld [vmem:[%s4644_s14 + $0x8] sm:$0xff] }
 0x5d2   : > { %v1226_v36 = vld [vmem:[%s3855_s30] sm:$0xff] }
 0x5d3   : > { %vm1782_vm11 = vcmp.ge.f32.partialorder %v1778_v56, 0.0  ;;  %vm1783_vm12 = vcmp.ge.f32.partialorder %v1779_v63, 0.0  ;;  %v1786_v59 = vmul.f32 0.2, %v1778_v56  ;;  %v1787_v0 = vmul.f32 0.2, %v1779_v63 }
 0x5d4   : > { %vm1780_vm13 = vcmp.ge.f32.partialorder %v1776_v58, 0.0  ;;  %vm1781_vm14 = vcmp.ge.f32.partialorder %v1777_v62, 0.0  ;;  %v1784_v1 = vmul.f32 0.2, %v1776_v58  ;;  %v1785_v2 = vmul.f32 0.2, %v1777_v62 }
 0x5d5   : > { %v1790_v3 = vsel %vm1782_vm11, %v1778_v56, %v1786_v59  ;;  %v1791_v4 = vsel %vm1783_vm12, %v1779_v63, %v1787_v0  ;;  %v3495_v52 = vld [vmem:[%s4644_s14] sm:$0xff] }
 0x5d6   : > { %v1794_v5 = vpack.c.bf16 %v1790_v3, %v1790_v3  ;;  %v1795_v6 = vpack.c.bf16 %v1791_v4, %v1791_v4  ;;  %v1788_v7 = vsel %vm1780_vm13, %v1776_v58, %v1784_v1  ;;  %v1789_v8 = vsel %vm1781_vm14, %v1777_v62, %v1785_v2 }
 0x5d7   : > { %v1792_v9 = vpack.c.bf16 %v1788_v7, %v1788_v7  ;;  %v1793_v10 = vpack.c.bf16 %v1789_v8, %v1789_v8 }
 0x5d8   : > { %v1802_v11 = vunpack.c.l.b16 %v1794_v5  ;;  %v1803_v12 = vunpack.c.l.b16 %v1795_v6 }
 0x5d9   : > { %v1800_v13 = vunpack.c.l.b16 %v1792_v9  ;;  %v1801_v14 = vunpack.c.l.b16 %v1793_v10 }
 0x5da   : > { %v1805_v15 = vpack.c.b16 %v1803_v12, %v1802_v11 }
 0x5db   : > { %v1804_v16 = vpack.c.b16 %v1801_v14, %v1800_v13  ;;  %v1223_v14 = vld [vmem:[%s3850_s24 + $0x8] sm:$0xff] }
 0x5dc   : > { %1816 = vrot.lane.b32.xlu0 %v1805_v15, %s4658_s8  ;;  %1808 = vrot.lane.b32.xlu2 %v1805_v15, %s4656_s11 }
 0x5dd   : > { %1810 = vrot.lane.b32.xlu1 %v1804_v16, %s4659_s2 }
 0x5e4   : > { %1812 = vrot.lane.b32.xlu2 %v1805_v15, %s4659_s2  ;;  %1814 = vrot.lane.b32.xlu0 %v1804_v16, %s4658_s8  ;;  %v1227_v15 = vld [vmem:[%s3855_s30 + $0x8] sm:$0xff] }
 0x5ec   : > { %1806 = vrot.lane.b32.xlu2 %v1804_v16, %s4656_s11 }
 0x636   : > { %v1809_v17 = vpop.permute.xlu2 %1808 }
 0x63e   : > { %v1813_v18 = vpop.permute.xlu2 %1812 }
 0x63f   : > { %v1824_v19 = vsel %vm1309_vm0, %v1809_v17, %v1813_v18 }
 0x640   : > { %1850 = vrot.lane.b32.xlu2 %v1824_v19, %s4657_s18 }
 0x646   : > { %v1807_v21 = vpop.permute.xlu2 %1806 }
 0x64e   : > { %v1817_v20 = vpop.permute.xlu0 %1816 }
 0x64f   : > { %v1811_v22 = vpop.permute.xlu1 %1810  ;;  %v1829_v23 = vsel %vm1309_vm0, %v1813_v18, %v1817_v20 }
 0x650   : > { %1852 = vrot.lane.b32.xlu1 %v1829_v23, %s4657_s18  ;;  %v1820_v24 = vsel %vm1309_vm0, %v1807_v21, %v1811_v22 }
 0x651   : > { %1846 = vrot.lane.b32.xlu0 %v1820_v24, %s4657_s18 }
 0x656   : > { %v1815_v25 = vpop.permute.xlu0 %1814 }
 0x657   : > { %v1827_v26 = vsel %vm1309_vm0, %v1811_v22, %v1815_v25 }
 0x658   : > { %1838 = vrot.lane.b32.xlu1 %v1824_v19, %s4656_s11  ;;  %1848 = vrot.lane.b32.xlu2 %v1827_v26, %s4657_s18 }
 0x659   : > { %1840 = vrot.lane.b32.xlu0 %v1829_v23, %s4656_s11 }
 0x660   : > { %1836 = vrot.lane.b32.xlu1 %v1827_v26, %s4656_s11  ;;  %1834 = vrot.lane.b32.xlu2 %v1820_v24, %s4656_s11 }
 0x661   : > { %1860 = vperm.xlu0 %3649, %v1218_v27  }
 0x668   : > { %1870 = vperm.xlu1 %3650, %v1220_v28   ;;  %1865 = vperm.xlu2 %3651, %v1219_v29  }
 0x669   : > { %1875 = vperm.xlu0 %3649, %v1221_v30  }
 0x671   : > { %2000 = vperm.xlu0 %3649, %v1224_v31  }
 0x679   : > { %2005 = vperm.xlu0 %3649, %v1225_v32  }
 0x681   : > { %2024 = vperm.xlu0 %3649, %v1228_v33  }
 0x689   : > { %2029 = vperm.xlu0 %3649, %v1229_v34  }
 0x691   : > { %1990 = vperm.xlu0 %3649, %v1222_v35  }
 0x699   : > { %2014 = vperm.xlu0 %3649, %v1226_v36  }
 0x69a   : > { %v1851_v37 = vpop.permute.xlu2 %1850 }
 0x6b2   : > { %v1849_v41 = vpop.permute.xlu2 %1848 }
 0x6ba   : > { %v1835_v49 = vpop.permute.xlu2 %1834 }
 0x6c2   : > { %v1853_v38 = vpop.permute.xlu1 %1852  ;;  %v1866_v60 = vpop.permute.xlu2 %1865 }
 0x6c3   : > { %v1847_v39 = vpop.permute.xlu0 %1846  ;;  %v1855_v40 = vsel %vm1335_vm5, %v1851_v37, %v1853_v38 }
 0x6c4   : > { %1896 = vmatpush.bf16.msra.mxu2 %v1855_v40  ;;  %v1854_v42 = vsel %vm1335_vm5, %v1847_v39, %v1849_v41 }
 0x6c8   : > { %1897 = vmatpush.bf16.msra.mxu2 %v1854_v42 }
 0x6ca   : > { %v1839_v43 = vpop.permute.xlu1 %1838 }
 0x6cb   : > { %v1841_v44 = vpop.permute.xlu0 %1840 }
 0x6cc   : > { %v1843_v45 = vsel %vm1328_vm6, %v1839_v43, %v1841_v44 }
 0x6cd   : > { %1898 = vmatpush.bf16.msra.mxu2 %v1843_v45 }
 0x6d2   : > { %v1837_v50 = vpop.permute.xlu1 %1836 }
 0x6d3   : > { %v1842_v51 = vsel %vm1328_vm6, %v1835_v49, %v1837_v50  ;;  %v1861_v61 = vpop.permute.xlu0 %1860 }
 0x6d4   : > { %1899 = vmatpush.bf16.msra.mxu2 %v1842_v51 }
 0x6d8   : > { %1900 = vmatpush.bf16.msra.mxu2 %v1824_v19 }
 0x6da   : > { %v1871_v62 = vpop.permute.xlu1 %1870 }
 0x6db   : > { %v1876_v4 = vpop.permute.xlu0 %1875 }
 0x6dc   : > { %1901 = vmatpush.bf16.msra.mxu2 %v1820_v24 }
 0x6df   : > { %3434 = vmatmul.msk.bf16.vlgmr.msra.gmra.mxu2 %vm1635_vm7, %v3495_v52 }
 0x6e3   : > { %v2001_v37 = vpop.permute.xlu0 %2000 }
 0x6eb   : > { %v2006_v38 = vpop.permute.xlu0 %2005 }
 0x6ef   : > { %3435 = vmatmul.msk.bf16.gmra.mxu2 %vm1635_vm7, %v3496_v53 }
 0x6f3   : > { %v2025_v39 = vpop.permute.xlu0 %2024 }
 0x6fb   : > { %v2030_v40 = vpop.permute.xlu0 %2029 }
 0x703   : > { %v1991_v41 = vpop.permute.xlu0 %1990 }
 0x762   : > { %v1903_v54 = vpop.f32.mrf.mxu2 }
 0x763   : > { %v1904_v63 = vadd.f32 %v1903_v54, %v1861_v61 }
 0x765   : > { %v4209_v1 = vadd.f32 %v1904_v63, %v4077_v47 }
 0x76a   : > { %v1905_v57 = vpop.f32.mrf.mxu2 }
 0x76b   : > { %v1906_v58 = vadd.f32 %v1905_v57, %v1866_v60 }
 0x76d   : > { %v4206_v0 = vadd.f32 %v1906_v58, %v4075_v46  ;;  %v1929_v46 = vmul.f32 %v4209_v1, %v4209_v1 }
 0x76f   : > { %v1930_v3 = vmul.f32 %v4206_v0, %v4206_v0  ;;  %v1917_v7 = vadd.f32 %v4206_v0, %v4209_v1 }
 0x771   : > { %v1933_v9 = vadd.f32 %v1930_v3, %v1929_v46 }
 0x772   : > { %v1908_v56 = vpop.f32.mrf.mxu2 }
 0x773   : > { %v1909_v59 = vadd.f32 %v1908_v56, %v1871_v62  ;;  %v2015_v56 = vpop.permute.xlu0 %2014 }
 0x775   : > { %v4212_v2 = vadd.f32 %v1909_v59, %v4079_v48 }
 0x777   : > { %v1931_v47 = vmul.f32 %v4212_v2, %v4212_v2  ;;  %v1918_v8 = vadd.f32 %v1917_v7, %v4212_v2 }
 0x779   : > { %v1934_v12 = vadd.f32 %v1933_v9, %v1931_v47 }
 0x77a   : > { %v1910_v5 = vpop.f32.mrf.mxu2 }
 0x77b   : > { %v1911_v6 = vadd.f32 %v1910_v5, %v1876_v4 }
 0x77d   : > { %v4223_v48 = vadd.f32 %v1911_v6, %v4089_v55 }
 0x77f   : > { %v1919_v10 = vadd.f32 %v1918_v8, %v4223_v48  ;;  %v1932_v11 = vmul.f32 %v4223_v48, %v4223_v48 }
 0x781   : > { %1920 = vadd.xlane.f32.xlu2 %v1919_v10  ;;  %v1935_v13 = vadd.f32 %v1934_v12, %v1932_v11 }
 0x783   : > { %1936 = vadd.xlane.f32.xlu1 %v1935_v13 }
 0x799   : > { %1995 = vperm.xlu2 %3651, %v1223_v14  }
 0x79c   : > { %2019 = vperm.xlu1 %3650, %v1227_v15  }
 0x7f4   : > { %v1921_v16 = vpop.xlane.xlu2 %1920 }
 0x7f5   : > { %v1922_v17 = vrot.slane %v1921_v16, 4 }
 0x7f6   : > { %v1937_v55 = vpop.xlane.xlu1 %1936 }
 0x7f7   : > { %v1923_v18 = vadd.f32 %v1922_v17, %v1921_v16  ;;  %v1938_v19 = vrot.slane %v1937_v55, 4 }
 0x7f9   : > { %v1939_v20 = vadd.f32 %v1938_v19, %v1937_v55  ;;  %v1924_v21 = vrot.slane %v1923_v18, 2 }
 0x7fb   : > { %v1940_v22 = vrot.slane %v1939_v20, 2  ;;  %v1925_v23 = vadd.f32 %v1924_v21, %v1923_v18 }
 0x7fc   : > { %v1996_v57 = vpop.permute.xlu2 %1995 }
 0x7fd   : > { %v1926_v24 = vrot.slane %v1925_v23, 1  ;;  %v1941_v25 = vadd.f32 %v1940_v22, %v1939_v20 }
 0x7ff   : > { %v1927_v26 = vadd.f32 %v1926_v24, %v1925_v23  ;;  %v1942_v27 = vrot.slane %v1941_v25, 1 }
 0x801   : > { %3521 = vpush %v1927_v26  ;;  %v1943_v28 = vadd.f32 %v1942_v27, %v1941_v25 }
 0x803   : > { %3523 = vpush %v1943_v28 }
 0x80e   : > { %v2020_v63 = vpop.permute.xlu1 %2019 }
 0x832   : > { %s3522_s10 = spop %3521 }
 0x833   : > { %s1953_s1 = smul.f32 %s3522_s10, %s4097_s26  ;;  %s4661_s10 = smov 6  }
 0x834   : > { %s3524_s7 = spop %3523 }
 0x835   : > { %s1963_s5 = smul.f32 %s1953_s1, %s1953_s1  ;;  %v1965_v42 = vstv %s1953_s1  ;;  %s4662_s1 = smov 2  }
 0x836   : > { %s1962_s3 = smul.f32 %s3524_s7, %s4097_s26  ;;  %v1966_v43 = vsub.f32 %v4209_v1, %v1965_v42  ;;  %v1967_v44 = vsub.f32 %v4206_v0, %v1965_v42  ;;  %v1968_v45 = vsub.f32 %v4212_v2, %v1965_v42  ;;  %v1969_v49 = vsub.f32 %v4223_v48, %v1965_v42  ;;  %s4663_s7 = smov 124  }
 0x838   : > { %s1964_s9 = ssub.f32 %s1962_s3, %s1963_s5 }
 0x839   : > { %s4664_s5 = sld [smem:[#allocation15_spill]] }
 0x83a   : > { %s1970_s13 = sadd.f32 1e-05, %s1964_s9 }
 0x83b   : > { %s4665_s3 = sld [smem:[#allocation16_spill]] }
 0x83c   : > { %v1971_v29 = vstv %s1970_s13  ;;  %s4660_s13 = smov 4  }
 0x83d   : > { %3658 = vrsqrt.f32 %v1971_v29  ;;  %vm1978_vm8 = vweird.f32 %v1971_v29 }
 0x83f   : > { %v1241_v42 = vld [vmem:[%s4664_s5 + $0x18] sm:$0xff] }
 0x843   : > { %v3659_v30 = vpop.eup %3658 }
 0x844   : > { %v1973_v31 = vmul.f32 %v3659_v30, %v1971_v29  ;;  %vm1979_vm15 = vweird.f32 %v3659_v30 }
 0x845   : > { %vm1980_vm9 = vmor %vm1978_vm8, %vm1979_vm15 }
 0x846   : > { %v1974_v32 = vmul.f32 %v3659_v30, %v1973_v31 }
 0x848   : > { %v1975_v33 = vmul.f32 0.5, %v1974_v32 }
 0x84a   : > { %v1976_v34 = vsub.f32 1.5, %v1975_v33  ;;  %v1234_v33 = vld [vmem:[%s4645_s12] sm:$0xff] }
 0x84c   : > { %v1977_v35 = vmul.f32 %v3659_v30, %v1976_v34 }
 0x84e   : > { %v1981_v36 = vsel %vm1980_vm9, %v3659_v30, %v1977_v35 }
 0x84f   : > { %3525 = vpush %v1981_v36 }
 0x880   : > { %s3526_s9 = spop %3525 }
 0x881   : > { %v1983_v50 = vstv %s3526_s9  ;;  %s4666_s9 = sld [smem:[#allocation13_spill]] }
 0x882   : > { %v1984_v51 = vmul.f32 %v1983_v50, %v1966_v43  ;;  %v1985_v52 = vmul.f32 %v1983_v50, %v1967_v44  ;;  %v1986_v53 = vmul.f32 %v1983_v50, %v1968_v45  ;;  %v1987_v54 = vmul.f32 %v1983_v50, %v1969_v49  ;;  %v1244_v43 = vld [vmem:[%s4665_s3 + $0x10] sm:$0xff]  ;;  %v1245_v44 = vld [vmem:[%s4665_s3 + $0x18] sm:$0xff]  ;;  %v1238_v45 = vld [vmem:[%s4664_s5] sm:$0xff] }
 0x883   : > { %v1243_v49 = vld [vmem:[%s4665_s3 + $0x8] sm:$0xff] }
 0x884   : > { %v2008_v60 = vmul.f32 %v1991_v41, %v1984_v51  ;;  %v2009_v61 = vmul.f32 %v1996_v57, %v1985_v52  ;;  %v2010_v58 = vmul.f32 %v2001_v37, %v1986_v53  ;;  %v2011_v62 = vmul.f32 %v2006_v38, %v1987_v54  ;;  %v1237_v38 = vld [vmem:[%s4645_s12 + $0x18] sm:$0xff]  ;;  %v1235_v41 = vld [vmem:[%s4645_s12 + $0x8] sm:$0xff] }
 0x886   : > { %v2032_v59 = vadd.f32 %v2015_v56, %v2008_v60  ;;  %v2033_v3 = vadd.f32 %v2020_v63, %v2009_v61  ;;  %v2034_v4 = vadd.f32 %v2025_v39, %v2010_v58  ;;  %v2035_v5 = vadd.f32 %v2030_v40, %v2011_v62  ;;  %v1236_v39 = vld [vmem:[%s4645_s12 + $0x10] sm:$0xff] }
 0x887   : > { %v1240_v40 = vld [vmem:[%s4664_s5 + $0x10] sm:$0xff] }
 0x888   : > { %vm2036_vm10 = vcmp.ge.f32.partialorder %v2032_v59, 0.0  ;;  %vm2037_vm11 = vcmp.ge.f32.partialorder %v2033_v3, 0.0  ;;  %vm2038_vm12 = vcmp.ge.f32.partialorder %v2034_v4, 0.0  ;;  %vm2039_vm13 = vcmp.ge.f32.partialorder %v2035_v5, 0.0 }
 0x889   : > { %v2040_v6 = vmul.f32 0.2, %v2032_v59  ;;  %v2041_v7 = vmul.f32 0.2, %v2033_v3  ;;  %v2042_v46 = vmul.f32 0.2, %v2034_v4 }
 0x88a   : > { %v2043_v47 = vmul.f32 0.2, %v2035_v5 }
 0x88b   : > { %v2044_v8 = vsel %vm2036_vm10, %v2032_v59, %v2040_v6  ;;  %v2045_v9 = vsel %vm2037_vm11, %v2033_v3, %v2041_v7  ;;  %v2046_v10 = vsel %vm2038_vm12, %v2034_v4, %v2042_v46  ;;  %v3497_v59 = vld [vmem:[%s4666_s9] sm:$0xff]  ;;  %v3498_v3 = vld [vmem:[%s4666_s9 + $0x8] sm:$0xff] }
 0x88c   : > { %v2047_v11 = vsel %vm2039_vm13, %v2035_v5, %v2043_v47  ;;  %v2048_v12 = vpack.c.bf16 %v2044_v8, %v2044_v8  ;;  %v2049_v13 = vpack.c.bf16 %v2045_v9, %v2045_v9  ;;  %v2050_v14 = vpack.c.bf16 %v2046_v10, %v2046_v10 }
 0x88d   : > { %v2051_v15 = vpack.c.bf16 %v2047_v11, %v2047_v11 }
 0x88e   : > { %v2056_v16 = vunpack.c.l.b16 %v2048_v12  ;;  %v2057_v17 = vunpack.c.l.b16 %v2049_v13  ;;  %v2058_v55 = vunpack.c.l.b16 %v2050_v14 }
 0x88f   : > { %v2059_v18 = vunpack.c.l.b16 %v2051_v15 }
 0x890   : > { %v2060_v19 = vpack.c.b16 %v2057_v17, %v2056_v16 }
 0x891   : > { %v2061_v20 = vpack.c.b16 %v2059_v18, %v2058_v55 }
 0x892   : > { %2062 = vrot.lane.b32.xlu1 %v2060_v19, %s4657_s18 }
 0x893   : > { %2072 = vrot.lane.b32.xlu2 %v2061_v20, %s4660_s13  ;;  %2064 = vrot.lane.b32.xlu0 %v2061_v20, %s4657_s18 }
 0x89a   : > { %2074 = vrot.lane.b32.xlu1 %v2060_v19, %s4661_s10 }
 0x89b   : > { %2068 = vrot.lane.b32.xlu0 %v2061_v20, %s4662_s1  ;;  %2066 = vrot.lane.b32.xlu2 %v2060_v19, %s4662_s1 }
 0x8a3   : > { %2076 = vrot.lane.b32.xlu0 %v2061_v20, %s4661_s10 }
 0x8ab   : > { %2070 = vrot.lane.b32.xlu0 %v2060_v19, %s4660_s13 }
 0x8ed   : > { %v2073_v21 = vpop.permute.xlu2 %2072 }
 0x8f5   : > { %v2067_v23 = vpop.permute.xlu2 %2066 }
 0x904   : > { %v2063_v22 = vpop.permute.xlu1 %2062 }
 0x905   : > { %v2065_v24 = vpop.permute.xlu0 %2064  ;;  %v2080_v25 = vsel %vm1309_vm0, %v2063_v22, %v2060_v19 }
 0x906   : > { %v2085_v26 = vsel %vm1313_vm1, %v2080_v25, %v2067_v23  ;;  %v2083_v27 = vsel %vm1309_vm0, %v2065_v24, %v2061_v20  ;;  %v1239_v24 = vld [vmem:[%s4664_s5 + $0x8] sm:$0xff] }
 0x907   : > { %2114 = vrot.lane.b32.xlu1 %v2085_v26, %s4663_s7 }
 0x90c   : > { %v2075_v35 = vpop.permute.xlu1 %2074 }
 0x90d   : > { %v2069_v28 = vpop.permute.xlu0 %2068 }
 0x90e   : > { %v2088_v29 = vsel %vm1313_vm1, %v2083_v27, %v2069_v28  ;;  %v2093_v30 = vsel %vm1313_vm1, %v2069_v28, %v2073_v21 }
 0x90f   : > { %2118 = vrot.lane.b32.xlu2 %v2088_v29, %s4663_s7 }
 0x915   : > { %v2077_v31 = vpop.permute.xlu0 %2076 }
 0x916   : > { %v2097_v32 = vsel %vm1319_vm2, %v2093_v30, %v2077_v31 }
 0x917   : > { %2120 = vrot.lane.b32.xlu0 %v2097_v32, %s4663_s7  ;;  %2108 = vrot.lane.b32.xlu1 %v2097_v32, %s4657_s18 }
 0x91d   : > { %v2071_v34 = vpop.permute.xlu0 %2070 }
 0x91e   : > { %v2091_v36 = vsel %vm1313_vm1, %v2067_v23, %v2071_v34  ;;  %v1242_v23 = vld [vmem:[%s4665_s3] sm:$0xff] }
 0x91f   : > { %2106 = vrot.lane.b32.xlu0 %v2088_v29, %s4657_s18  ;;  %2128 = vperm.xlu1 %3650, %v1234_v33   ;;  %v2095_v37 = vsel %vm1319_vm2, %v2091_v36, %v2075_v35 }
 0x920   : > { %2116 = vrot.lane.b32.xlu2 %v2095_v37, %s4663_s7 }
 0x927   : > { %2104 = vrot.lane.b32.xlu0 %v2095_v37, %s4657_s18  ;;  %2143 = vperm.xlu1 %3650, %v1237_v38  }
 0x928   : > { %2102 = vrot.lane.b32.xlu2 %v2085_v26, %s4657_s18 }
 0x92f   : > { %2138 = vperm.xlu0 %3649, %v1236_v39   ;;  %2264 = vperm.xlu1 %3650, %v1240_v40  }
 0x930   : > { %2133 = vperm.xlu2 %3651, %v1235_v41  }
 0x937   : > { %2269 = vperm.xlu1 %3650, %v1241_v42  }
 0x93f   : > { %2288 = vperm.xlu1 %3650, %v1244_v43  }
 0x947   : > { %2293 = vperm.xlu1 %3650, %v1245_v44  }
 0x94f   : > { %2254 = vperm.xlu1 %3650, %v1238_v45  }
 0x957   : > { %2283 = vperm.xlu1 %3650, %v1243_v49  }
 0x969   : > { %v2119_v50 = vpop.permute.xlu2 %2118 }
 0x979   : > { %v2115_v51 = vpop.permute.xlu1 %2114 }
 0x97a   : > { %v2117_v54 = vpop.permute.xlu2 %2116 }
 0x97b   : > { %v2122_v57 = vsel %vm1349_vm3, %v2115_v51, %v2117_v54 }
 0x982   : > { %v2103_v62 = vpop.permute.xlu2 %2102 }
 0x989   : > { %v2121_v52 = vpop.permute.xlu0 %2120  ;;  %v2109_v60 = vpop.permute.xlu1 %2108 }
 0x98a   : > { %v2123_v53 = vsel %vm1349_vm3, %v2119_v50, %v2121_v52  ;;  %v2134_v7 = vpop.permute.xlu2 %2133 }
 0x98b   : > { %2164 = vmatpush.bf16.msra.mxu3 %v2123_v53 }
 0x98f   : > { %2165 = vmatpush.bf16.msra.mxu3 %v2122_v57 }
 0x991   : > { %v2107_v61 = vpop.permute.xlu0 %2106  ;;  %v2129_v6 = vpop.permute.xlu1 %2128 }
 0x992   : > { %v2111_v58 = vsel %vm1335_vm5, %v2107_v61, %v2109_v60 }
 0x993   : > { %2166 = vmatpush.bf16.msra.mxu3 %v2111_v58 }
 0x999   : > { %v2105_v56 = vpop.permute.xlu0 %2104  ;;  %v2144_v15 = vpop.permute.xlu1 %2143 }
 0x99a   : > { %v2110_v63 = vsel %vm1335_vm5, %v2103_v62, %v2105_v56 }
 0x99b   : > { %2167 = vmatpush.bf16.msra.mxu3 %v2110_v63 }
 0x99f   : > { %2168 = vmatpush.bf16.msra.mxu3 %v2088_v29 }
 0x9a1   : > { %v2139_v8 = vpop.permute.xlu0 %2138  ;;  %v2265_v50 = vpop.permute.xlu1 %2264 }
 0x9a3   : > { %2169 = vmatpush.bf16.msra.mxu3 %v2085_v26 }
 0x9a6   : > { %3444 = vmatmul.msk.bf16.vlgmr.msra.gmra.mxu3 %vm1635_vm7, %v3497_v59 }
 0x9a9   : > { %v2270_v51 = vpop.permute.xlu1 %2269 }
 0x9b1   : > { %v2289_v52 = vpop.permute.xlu1 %2288 }
 0x9b6   : > { %3445 = vmatmul.msk.bf16.gmra.mxu3 %vm1635_vm7, %v3498_v3 }
 0x9b9   : > { %v2294_v53 = vpop.permute.xlu1 %2293 }
 0x9c1   : > { %v2255_v54 = vpop.permute.xlu1 %2254 }
 0xa29   : > { %v2171_v4 = vpop.f32.mrf.mxu3 }
 0xa2a   : > { %v4281_v9 = vadd.f32 %v2171_v4, %v2129_v6 }
 0xa2c   : > { %v2193_v12 = vmul.f32 %v4281_v9, %v4281_v9 }
 0xa31   : > { %v2173_v5 = vpop.f32.mrf.mxu3 }
 0xa32   : > { %v4279_v47 = vadd.f32 %v2173_v5, %v2134_v7 }
 0xa34   : > { %v2194_v11 = vmul.f32 %v4279_v47, %v4279_v47  ;;  %v2181_v13 = vadd.f32 %v4279_v47, %v4281_v9 }
 0xa36   : > { %v2197_v18 = vadd.f32 %v2194_v11, %v2193_v12  ;;  %v2284_v11 = vpop.permute.xlu1 %2283 }
 0xa39   : > { %v2176_v46 = vpop.f32.mrf.mxu3 }
 0xa3a   : > { %v4283_v10 = vadd.f32 %v2176_v46, %v2139_v8 }
 0xa3c   : > { %v2195_v14 = vmul.f32 %v4283_v10, %v4283_v10  ;;  %v2182_v55 = vadd.f32 %v2181_v13, %v4283_v10 }
 0xa3e   : > { %v2198_v21 = vadd.f32 %v2197_v18, %v2195_v14 }
 0xa41   : > { %v2178_v16 = vpop.f32.mrf.mxu3 }
 0xa42   : > { %v4293_v17 = vadd.f32 %v2178_v16, %v2144_v15 }
 0xa44   : > { %v2183_v19 = vadd.f32 %v2182_v55, %v4293_v17  ;;  %v2196_v20 = vmul.f32 %v4293_v17, %v4293_v17 }
 0xa46   : > { %2184 = vadd.xlane.f32.xlu2 %v2183_v19  ;;  %v2199_v22 = vadd.f32 %v2198_v21, %v2196_v20 }
 0xa48   : > { %2200 = vadd.xlane.f32.xlu0 %v2199_v22 }
 0xa5c   : > { %2278 = vperm.xlu0 %3649, %v1242_v23  }
 0xa5e   : > { %2259 = vperm.xlu2 %3651, %v1239_v24  }
 0xab9   : > { %v2185_v25 = vpop.xlane.xlu2 %2184 }
 0xaba   : > { %v2186_v26 = vrot.slane %v2185_v25, 4 }
 0xabb   : > { %v2201_v27 = vpop.xlane.xlu0 %2200 }
 0xabc   : > { %v2187_v28 = vadd.f32 %v2186_v26, %v2185_v25  ;;  %v2202_v29 = vrot.slane %v2201_v27, 4 }
 0xabe   : > { %v2188_v30 = vrot.slane %v2187_v28, 2  ;;  %v2203_v31 = vadd.f32 %v2202_v29, %v2201_v27 }
 0xac0   : > { %v2204_v32 = vrot.slane %v2203_v31, 2  ;;  %v2189_v33 = vadd.f32 %v2188_v30, %v2187_v28 }
 0xac1   : > { %v2260_v5 = vpop.permute.xlu2 %2259 }
 0xac2   : > { %v2190_v34 = vrot.slane %v2189_v33, 1  ;;  %v2205_v35 = vadd.f32 %v2204_v32, %v2203_v31 }
 0xac4   : > { %v2191_v36 = vadd.f32 %v2190_v34, %v2189_v33  ;;  %v2206_v37 = vrot.slane %v2205_v35, 1 }
 0xac6   : > { %3527 = vpush %v2191_v36  ;;  %v2207_v38 = vadd.f32 %v2206_v37, %v2205_v35 }
 0xac8   : > { %3529 = vpush %v2207_v38 }
 0xace   : > { %v2279_v12 = vpop.permute.xlu0 %2278 }
 0xaf7   : > { %s3528_s3 = spop %3527 }
 0xaf8   : > { %s2217_s5 = smul.f32 %s3528_s3, %s4097_s26  ;;  %s4672_s3 = sld [smem:[#allocation21_spill]] }
 0xaf9   : > { %s3530_s9 = spop %3529 }
 0xafa   : > { %s2227_s12 = smul.f32 %s2217_s5, %s2217_s5  ;;  %v2229_v57 = vstv %s2217_s5 }
 0xafb   : > { %s2226_s14 = smul.f32 %s3530_s9, %s4097_s26  ;;  %v2230_v60 = vsub.f32 %v4281_v9, %v2229_v57  ;;  %v2231_v61 = vsub.f32 %v4279_v47, %v2229_v57  ;;  %v2232_v58 = vsub.f32 %v4283_v10, %v2229_v57  ;;  %v2233_v62 = vsub.f32 %v4293_v17, %v2229_v57  ;;  %s4670_s26 = sld [smem:[#allocation20_spill]] }
 0xafc   : > { %s4673_s9 = sld [smem:[#allocation22_spill]] }
 0xafd   : > { %s2228_s17 = ssub.f32 %s2226_s14, %s2227_s12  ;;  %s4669_s12 = smov 125  }
 0xafe   : > { %s4667_s14 = sld [smem:[#allocation18_spill]] }
 0xaff   : > { %s2234_s19 = sadd.f32 1e-05, %s2228_s17 }
 0xb01   : > { %v2235_v39 = vstv %s2234_s19  ;;  %s4668_s19 = sld [smem:[#allocation17_spill]]  ;;  %s4671_s5 = smov %s4670_s26 }
 0xb02   : > { %3660 = vrsqrt.f32 %v2235_v39  ;;  %vm2242_vm15 = vweird.f32 %v2235_v39 }
 0xb08   : > { %v3661_v40 = vpop.eup %3660 }
 0xb09   : > { %v2237_v41 = vmul.f32 %v3661_v40, %v2235_v39  ;;  %vm2243_vm14 = vweird.f32 %v3661_v40 }
 0xb0a   : > { %vm2244_vm8 = vmor %vm2242_vm15, %vm2243_vm14 }
 0xb0b   : > { %v2238_v42 = vmul.f32 %v3661_v40, %v2237_v41 }
 0xb0d   : > { %v2239_v43 = vmul.f32 0.5, %v2238_v42 }
 0xb0f   : > { %v2240_v44 = vsub.f32 1.5, %v2239_v43 }
 0xb11   : > { %v2241_v45 = vmul.f32 %v3661_v40, %v2240_v44 }
 0xb13   : > { %v2245_v49 = vsel %vm2244_vm8, %v3661_v40, %v2241_v45 }
 0xb14   : > { %3531 = vpush %v2245_v49 }
 0xb45   : > { %s3532_s17 = spop %3531 }
 0xb46   : > { %v2247_v56 = vstv %s3532_s17  ;;  %s4674_s17 = sld [smem:[#allocation19_spill]] }
 0xb47   : > { %v2248_v63 = vmul.f32 %v2247_v56, %v2230_v60  ;;  %v2249_v59 = vmul.f32 %v2247_v56, %v2231_v61  ;;  %v2250_v3 = vmul.f32 %v2247_v56, %v2232_v58  ;;  %v2251_v4 = vmul.f32 %v2247_v56, %v2233_v62 }
 0xb49   : > { %v2272_v6 = vmul.f32 %v2255_v54, %v2248_v63  ;;  %v2273_v7 = vmul.f32 %v2260_v5, %v2249_v59  ;;  %v2274_v46 = vmul.f32 %v2265_v50, %v2250_v3  ;;  %v2275_v8 = vmul.f32 %v2270_v51, %v2251_v4  ;;  %v1252_v50 = vld [vmem:[%s4667_s14 + $0x10] sm:$0xff]  ;;  %v1250_v51 = vld [vmem:[%s4667_s14] sm:$0xff] }
 0xb4b   : > { %v2296_v9 = vadd.f32 %v2279_v12, %v2272_v6  ;;  %v2297_v13 = vadd.f32 %v2284_v11, %v2273_v7  ;;  %v2298_v47 = vadd.f32 %v2289_v52, %v2274_v46  ;;  %v2299_v14 = vadd.f32 %v2294_v53, %v2275_v8  ;;  %v1253_v52 = vld [vmem:[%s4667_s14 + $0x18] sm:$0xff]  ;;  %v1251_v53 = vld [vmem:[%s4667_s14 + $0x8] sm:$0xff]  ;;  %v3499_v6 = vld [vmem:[%s4668_s19] sm:$0xff] }
 0xb4c   : > { %v3500_v7 = vld [vmem:[%s4668_s19 + $0x8] sm:$0xff] }
 0xb4d   : > { %vm2302_vm9 = vcmp.ge.f32.partialorder %v2298_v47, 0.0  ;;  %vm2303_vm10 = vcmp.ge.f32.partialorder %v2299_v14, 0.0  ;;  %v2306_v10 = vmul.f32 0.2, %v2298_v47  ;;  %v2304_v15 = vmul.f32 0.2, %v2296_v9 }
 0xb4e   : > { %v2305_v16 = vmul.f32 0.2, %v2297_v13  ;;  %v2307_v17 = vmul.f32 0.2, %v2299_v14  ;;  %vm2300_vm11 = vcmp.ge.f32.partialorder %v2296_v9, 0.0  ;;  %vm2301_vm12 = vcmp.ge.f32.partialorder %v2297_v13, 0.0 }
 0xb4f   : > { %v2310_v55 = vsel %vm2302_vm9, %v2298_v47, %v2306_v10  ;;  %v2308_v21 = vsel %vm2300_vm11, %v2296_v9, %v2304_v15 }
 0xb50   : > { %v2311_v18 = vsel %vm2303_vm10, %v2299_v14, %v2307_v17  ;;  %v2314_v19 = vpack.c.bf16 %v2310_v55, %v2310_v55  ;;  %v2309_v22 = vsel %vm2301_vm12, %v2297_v13, %v2305_v16  ;;  %v2312_v25 = vpack.c.bf16 %v2308_v21, %v2308_v21 }
 0xb51   : > { %v2315_v20 = vpack.c.bf16 %v2311_v18, %v2311_v18  ;;  %v2313_v26 = vpack.c.bf16 %v2309_v22, %v2309_v22 }
 0xb52   : > { %v2322_v23 = vunpack.c.l.b16 %v2314_v19  ;;  %v2320_v28 = vunpack.c.l.b16 %v2312_v25 }
 0xb53   : > { %v2323_v24 = vunpack.c.l.b16 %v2315_v20  ;;  %v2321_v29 = vunpack.c.l.b16 %v2313_v26 }
 0xb55   : > { %v2325_v27 = vpack.c.b16 %v2323_v24, %v2322_v23  ;;  %v2324_v30 = vpack.c.b16 %v2321_v29, %v2320_v28 }
 0xb57   : > { %2340 = vrot.lane.b32.xlu2 %v2325_v27, %s4661_s10  ;;  %2336 = vrot.lane.b32.xlu0 %v2325_v27, %s4660_s13 }
 0xb58   : > { %2328 = vrot.lane.b32.xlu1 %v2325_v27, %s4657_s18 }
 0xb5f   : > { %2334 = vrot.lane.b32.xlu2 %v2324_v30, %s4660_s13  ;;  %2330 = vrot.lane.b32.xlu0 %v2324_v30, %s4662_s1 }
 0xb60   : > { %2332 = vrot.lane.b32.xlu1 %v2325_v27, %s4662_s1 }
 0xb68   : > { %2326 = vrot.lane.b32.xlu1 %v2324_v30, %s4657_s18 }
 0xb70   : > { %2338 = vrot.lane.b32.xlu1 %v2324_v30, %s4661_s10 }
 0xbb1   : > { %v2341_v35 = vpop.permute.xlu2 %2340 }
 0xbb9   : > { %v2335_v43 = vpop.permute.xlu2 %2334 }
 0xbc9   : > { %v2337_v32 = vpop.permute.xlu0 %2336 }
 0xbca   : > { %v2329_v31 = vpop.permute.xlu1 %2328 }
 0xbcb   : > { %v2347_v33 = vsel %vm1309_vm0, %v2329_v31, %v2325_v27 }
 0xbd1   : > { %v2331_v40 = vpop.permute.xlu0 %2330 }
 0xbd2   : > { %v2333_v34 = vpop.permute.xlu1 %2332  ;;  %v2355_v44 = vsel %vm1313_vm1, %v2331_v40, %v2335_v43 }
 0xbd3   : > { %v2357_v36 = vsel %vm1313_vm1, %v2333_v34, %v2337_v32  ;;  %v2352_v37 = vsel %vm1313_vm1, %v2347_v33, %v2333_v34 }
 0xbd4   : > { %2382 = vrot.lane.b32.xlu0 %v2352_v37, %s4663_s7  ;;  %v2361_v38 = vsel %vm1319_vm2, %v2357_v36, %v2341_v35 }
 0xbd5   : > { %2384 = vrot.lane.b32.xlu2 %v2361_v38, %s4663_s7 }
 0xbda   : > { %v2327_v39 = vpop.permute.xlu1 %2326 }
 0xbdb   : > { %v2344_v41 = vsel %vm1309_vm0, %v2327_v39, %v2324_v30 }
 0xbdc   : > { %v2349_v42 = vsel %vm1313_vm1, %v2344_v41, %v2331_v40 }
 0xbdd   : > { %2378 = vrot.lane.b32.xlu1 %v2349_v42, %s4663_s7  ;;  %2370 = vrot.lane.b32.xlu2 %v2352_v37, %s4657_s18 }
 0xbe2   : > { %v2339_v45 = vpop.permute.xlu1 %2338 }
 0xbe3   : > { %v2359_v49 = vsel %vm1319_vm2, %v2355_v44, %v2339_v45 }
 0xbe4   : > { %2380 = vrot.lane.b32.xlu0 %v2359_v49, %s4663_s7 }
 0xbe5   : > { %2372 = vrot.lane.b32.xlu1 %v2361_v38, %s4657_s18  ;;  %2368 = vrot.lane.b32.xlu2 %v2359_v49, %s4657_s18 }
 0xbec   : > { %2366 = vrot.lane.b32.xlu0 %v2349_v42, %s4657_s18 }
 0xbed   : > { %2402 = vperm.xlu1 %3650, %v1252_v50   ;;  %2392 = vperm.xlu2 %3651, %v1250_v51  }
 0xbf4   : > { %2407 = vperm.xlu0 %3649, %v1253_v52  }
 0xbf5   : > { %2397 = vperm.xlu1 %3650, %v1251_v53  }
 0xc2f   : > { %v2385_v54 = vpop.permute.xlu2 %2384 }
 0xc37   : > { %v2371_v58 = vpop.permute.xlu2 %2370 }
 0xc3f   : > { %v2369_v3 = vpop.permute.xlu2 %2368 }
 0xc46   : > { %v2383_v57 = vpop.permute.xlu0 %2382 }
 0xc47   : > { %v2387_v60 = vsel %vm1349_vm3, %v2383_v57, %v2385_v54  ;;  %v2393_v8 = vpop.permute.xlu2 %2392  ;;  %v1257_v54 = vld [vmem:[%s4670_s26 + $0x8] sm:$0xff]  ;;  %v1258_v57 = vld [vmem:[%s4672_s3] sm:$0xff] }
 0xc48   : > { %2428 = vmatpush.bf16.msrb.mxu0 %v2387_v60  ;;  %v1256_v60 = vld [vmem:[%s4671_s5] sm:$0xff] }
 0xc4f   : > { %v2379_v61 = vpop.permute.xlu1 %2378 }
 0xc56   : > { %v2381_v62 = vpop.permute.xlu0 %2380 }
 0xc57   : > { %v2386_v56 = vsel %vm1349_vm3, %v2379_v61, %v2381_v62  ;;  %v2373_v63 = vpop.permute.xlu1 %2372  ;;  %v1259_v61 = vld [vmem:[%s4672_s3 + $0x8] sm:$0xff] }
 0xc58   : > { %2429 = vmatpush.bf16.msrb.mxu0 %v2386_v56  ;;  %v2375_v59 = vsel %vm1335_vm5, %v2371_v58, %v2373_v63  ;;  %v1260_v58 = vld [vmem:[%s4673_s9] sm:$0xff]  ;;  %v1261_v62 = vld [vmem:[%s4673_s9 + $0x8] sm:$0xff] }
 0xc5c   : > { %2430 = vmatpush.bf16.msrb.mxu0 %v2375_v59 }
 0xc5e   : > { %v2367_v4 = vpop.permute.xlu0 %2366 }
 0xc5f   : > { %v2374_v5 = vsel %vm1335_vm5, %v2367_v4, %v2369_v3  ;;  %v2403_v46 = vpop.permute.xlu1 %2402 }
 0xc60   : > { %2431 = vmatpush.bf16.msrb.mxu0 %v2374_v5 }
 0xc64   : > { %2432 = vmatpush.bf16.msrb.mxu0 %v2352_v37 }
 0xc66   : > { %v2408_v26 = vpop.permute.xlu0 %2407 }
 0xc67   : > { %v2398_v47 = vpop.permute.xlu1 %2397 }
 0xc68   : > { %2433 = vmatpush.bf16.msrb.mxu0 %v2349_v42 }
 0xc6b   : > { %3454 = vmatmul.msk.bf16.vlgmr.msrb.gmra.mxu0 %vm1635_vm7, %v3499_v6 }
 0xc7b   : > { %3455 = vmatmul.msk.bf16.gmra.mxu0 %vm1635_vm7, %v3500_v7 }
 0xce8   : > { %v2435_v11 = vpop.f32.mrf.mxu0 }
 0xce9   : > { %v2436_v12 = vadd.f32 %v2435_v11, %v2393_v8 }
 0xceb   : > { %v2445_v9 = vadd.f32 %v2436_v12, %v4209_v1 }
 0xced   : > { %v2453_v13 = vmul.f32 0.2, %v2445_v9  ;;  %vm2449_vm13 = vcmp.ge.f32.partialorder %v2445_v9, 0.0 }
 0xcef   : > { %v2457_v15 = vsel %vm2449_vm13, %v2445_v9, %v2453_v13 }
 0xcf0   : > { %v2437_v14 = vpop.f32.mrf.mxu0  ;;  %v2461_v55 = vpack.c.bf16 %v2457_v15, %v2457_v15 }
 0xcf1   : > { %v2438_v10 = vadd.f32 %v2437_v14, %v2398_v47 }
 0xcf2   : > { %v2469_v22 = vunpack.c.l.b16 %v2461_v55 }
 0xcf3   : > { %v2446_v16 = vadd.f32 %v2438_v10, %v4206_v0 }
 0xcf5   : > { %vm2450_vm14 = vcmp.ge.f32.partialorder %v2446_v16, 0.0  ;;  %v2454_v17 = vmul.f32 0.2, %v2446_v16 }
 0xcf7   : > { %v2458_v18 = vsel %vm2450_vm14, %v2446_v16, %v2454_v17  ;;  %vm2753_vm14 = vcmask 392192  }
 0xcf8   : > { %v2462_v19 = vpack.c.bf16 %v2458_v18, %v2458_v18  ;;  %v2440_v20 = vpop.f32.mrf.mxu0  ;;  %v3501_v18 = vld [vmem:[%s4674_s17 + $0x4] sm:$0xf] }
 0xcf9   : > { %v2441_v21 = vadd.f32 %v2440_v20, %v2403_v46 }
 0xcfa   : > { %v2470_v23 = vunpack.c.l.b16 %v2462_v19  ;;  %v3460_v19 = vld [vmem:[%s4674_s17 + $0x8] sm:$0xf0] }
 0xcfb   : > { %v2447_v24 = vadd.f32 %v2441_v21, %v4212_v2 }
 0xcfc   : > { %v2473_v1 = vpack.c.b16 %v2470_v23, %v2469_v22  ;;  %v3463_v23 = vor.u32 %v3501_v18, %v3460_v19 }
 0xcfd   : > { %v2455_v25 = vmul.f32 0.2, %v2447_v24  ;;  %vm2451_vm7 = vcmp.ge.f32.partialorder %v2447_v24, 0.0 }
 0xcfe   : > { %2475 = vrot.lane.b32.xlu2 %v2473_v1, %s4657_s18 }
 0xcff   : > { %v2459_v0 = vsel %vm2451_vm7, %v2447_v24, %v2455_v25  ;;  %v3458_v24 = vld [vmem:[%s4674_s17] sm:$0xf] }
 0xd00   : > { %v2442_v27 = vpop.f32.mrf.mxu0  ;;  %v2463_v31 = vpack.c.bf16 %v2459_v0, %v2459_v0 }
 0xd01   : > { %v2443_v28 = vadd.f32 %v2442_v27, %v2408_v26 }
 0xd02   : > { %v2471_v34 = vunpack.c.l.b16 %v2463_v31 }
 0xd03   : > { %v2448_v29 = vadd.f32 %v2443_v28, %v4223_v48 }
 0xd05   : > { %vm2452_vm15 = vcmp.ge.f32.partialorder %v2448_v29, 0.0  ;;  %v2456_v30 = vmul.f32 0.2, %v2448_v29 }
 0xd07   : > { %v2460_v32 = vsel %vm2452_vm15, %v2448_v29, %v2456_v30 }
 0xd08   : > { %v2464_v33 = vpack.c.bf16 %v2460_v32, %v2460_v32 }
 0xd0a   : > { %v2472_v35 = vunpack.c.l.b16 %v2464_v33 }
 0xd0c   : > { %v2474_v36 = vpack.c.b16 %v2472_v35, %v2471_v34 }
 0xd0e   : > { %2485 = vrot.lane.b32.xlu1 %v2474_v36, %s4660_s13  ;;  %2477 = vrot.lane.b32.xlu0 %v2474_v36, %s4657_s18 }
 0xd0f   : > { %2481 = vrot.lane.b32.xlu2 %v2474_v36, %s4662_s1 }
 0xd16   : > { %2489 = vrot.lane.b32.xlu0 %v2474_v36, %s4661_s10  ;;  %2479 = vrot.lane.b32.xlu1 %v2473_v1, %s4662_s1 }
 0xd17   : > { %2487 = vrot.lane.b32.xlu2 %v2473_v1, %s4661_s10 }
 0xd1e   : > { %2483 = vrot.lane.b32.xlu0 %v2473_v1, %s4660_s13 }
 0xd58   : > { %v2476_v2 = vpop.permute.xlu2 %2475 }
 0xd59   : > { %v2493_v39 = vsel %vm1309_vm0, %v2476_v2, %v2473_v1  ;;  %v3502_v1 = vld [vmem:[%s4674_s17 + $0x4] sm:$0xf0] }
 0xd5a   : > { %v3459_v25 = vor.u32 %v3502_v1, %v3458_v24 }
 0xd69   : > { %v2482_v38 = vpop.permute.xlu2 %2481 }
 0xd71   : > { %v2488_v44 = vpop.permute.xlu2 %2487 }
 0xd80   : > { %v2486_v48 = vpop.permute.xlu1 %2485  ;;  %v2478_v37 = vpop.permute.xlu0 %2477 }
 0xd81   : > { %v2506_v50 = vsel %vm1313_vm1, %v2482_v38, %v2486_v48  ;;  %v2496_v52 = vsel %vm1309_vm0, %v2478_v37, %v2474_v36  ;;  %v3786_v37 = vmov 2048.0  }
 0xd82   : > { %v2501_v53 = vsel %vm1313_vm1, %v2496_v52, %v2482_v38  ;;  %3662 = vrcp.f32 %v3786_v37 }
 0xd88   : > { %v2490_v40 = vpop.permute.xlu0 %2489  ;;  %v2480_v41 = vpop.permute.xlu1 %2479 }
 0xd89   : > { %v4357_v42 = vsel %vm1313_vm1, %v2493_v39, %v2480_v41  ;;  %v2510_v51 = vsel %vm1319_vm2, %v2506_v50, %v2490_v40  ;;  %v3663_v38 = vpop.eup %3662 }
 0xd8a   : > { %2539 = vrot.lane.b32.xlu2 %v4357_v42, %s4669_s12  ;;  %v2637_v39 = vmul.f32 2048.0, %v3663_v38  ;;  %vm2641_vm8 = vweird.f32 %v3663_v38 }
 0xd90   : > { %v2484_v43 = vpop.permute.xlu0 %2483 }
 0xd91   : > { %v2504_v45 = vsel %vm1313_vm1, %v2480_v41, %v2484_v43 }
 0xd92   : > { %v2508_v49 = vsel %vm1319_vm2, %v2504_v45, %v2488_v44 }
 0xd93   : > { %2517 = vrot.lane.b32.xlu2 %v2508_v49, %s4656_s11  ;;  %2529 = vrot.lane.b32.xlu0 %v2508_v49, %s4657_s18 }
 0xd94   : > { %2541 = vrot.lane.b32.xlu1 %v2508_v49, %s4669_s12 }
 0xd9b   : > { %2533 = vrot.lane.b32.xlu2 %v2510_v51, %s4657_s18  ;;  %2545 = vrot.lane.b32.xlu0 %v2510_v51, %s4669_s12 }
 0xd9c   : > { %2527 = vrot.lane.b32.xlu1 %v4357_v42, %s4657_s18 }
 0xda3   : > { %2519 = vrot.lane.b32.xlu2 %v2501_v53, %s4656_s11  ;;  %2531 = vrot.lane.b32.xlu0 %v2501_v53, %s4657_s18 }
 0xda4   : > { %2543 = vrot.lane.b32.xlu1 %v2501_v53, %s4669_s12 }
 0xdab   : > { %2551 = vrot.lane.b32.xlu2 %v4357_v42, %s4663_s7  ;;  %2515 = vrot.lane.b32.xlu0 %v4357_v42, %s4656_s11 }
 0xdac   : > { %2521 = vrot.lane.b32.xlu1 %v2510_v51, %s4656_s11 }
 0xdb3   : > { %2570 = vperm.xlu2 %3651, %v1257_v54   ;;  %2557 = vrot.lane.b32.xlu0 %v2510_v51, %s4663_s7 }
 0xdb4   : > { %2555 = vrot.lane.b32.xlu1 %v2501_v53, %s4663_s7 }
 0xdbb   : > { %2677 = vperm.xlu2 %3651, %v1258_v57   ;;  %2565 = vperm.xlu0 %3649, %v1256_v60  }
 0xdbc   : > { %2553 = vrot.lane.b32.xlu1 %v2508_v49, %s4663_s7 }
 0xdc3   : > { %2682 = vperm.xlu2 %3651, %v1259_v61  }
 0xdcb   : > { %2689 = vperm.xlu2 %3651, %v1260_v58  }
 0xdd3   : > { %2694 = vperm.xlu2 %3651, %v1261_v62  }
 0xde4   : > { %v2540_v63 = vpop.permute.xlu2 %2539 }
 0xded   : > { %v2518_v5 = vpop.permute.xlu2 %2517 }
 0xdf5   : > { %v2534_v8 = vpop.permute.xlu2 %2533 }
 0xdfd   : > { %v2520_v14 = vpop.permute.xlu2 %2519 }
 0xe05   : > { %v2530_v56 = vpop.permute.xlu0 %2529  ;;  %v2552_v20 = vpop.permute.xlu2 %2551 }
 0xe06   : > { %v2542_v59 = vpop.permute.xlu1 %2541 }
 0xe07   : > { %v2547_v11 = vsel %vm1342_vm4, %v2540_v63, %v2542_v59 }
 0xe0d   : > { %v2546_v3 = vpop.permute.xlu0 %2545  ;;  %v2571_v29 = vpop.permute.xlu2 %2570 }
 0xe0e   : > { %v2528_v4 = vpop.permute.xlu1 %2527 }
 0xe0f   : > { %v2535_v47 = vsel %vm1335_vm5, %v2528_v4, %v2530_v56 }
 0xe15   : > { %v2532_v6 = vpop.permute.xlu0 %2531 }
 0xe16   : > { %v2544_v7 = vpop.permute.xlu1 %2543  ;;  %v2536_v13 = vsel %vm1335_vm5, %v2532_v6, %v2534_v8  ;;  %v2678_v8 = vpop.permute.xlu2 %2677 }
 0xe17   : > { %v2548_v46 = vsel %vm1342_vm4, %v2544_v7, %v2546_v3  ;;  %vm2582_vm4 = vcmask 261120  }
 0xe18   : > { %2586 = vmatpush.bf16.msrb.mxu1 %v2548_v46 }
 0xe1c   : > { %2587 = vmatpush.bf16.msrb.mxu1 %v2547_v11 }
 0xe1d   : > { %v2516_v12 = vpop.permute.xlu0 %2515 }
 0xe1e   : > { %v2522_v9 = vpop.permute.xlu1 %2521  ;;  %v2523_v55 = vsel %vm1328_vm6, %v2516_v12, %v2518_v5  ;;  %v2683_v11 = vpop.permute.xlu2 %2682 }
 0xe1f   : > { %v2524_v16 = vsel %vm1328_vm6, %v2520_v14, %v2522_v9 }
 0xe20   : > { %2588 = vmatpush.bf16.msrb.mxu1 %v2536_v13 }
 0xe24   : > { %2589 = vmatpush.bf16.msrb.mxu1 %v2535_v47 }
 0xe25   : > { %v2558_v10 = vpop.permute.xlu0 %2557 }
 0xe26   : > { %v2556_v15 = vpop.permute.xlu1 %2555  ;;  %v2690_v12 = vpop.permute.xlu2 %2689 }
 0xe27   : > { %v2560_v17 = vsel %vm1349_vm3, %v2556_v15, %v2558_v10 }
 0xe28   : > { %2590 = vmatpush.bf16.msrb.mxu1 %v2524_v16  ;;  %2606 = vmatpush.bf16.msrb.mxu2 %v2560_v17 }
 0xe2c   : > { %2591 = vmatpush.bf16.msrb.mxu1 %v2523_v55 }
 0xe2d   : > { %v2566_v28 = vpop.permute.xlu0 %2565 }
 0xe2e   : > { %v2554_v21 = vpop.permute.xlu1 %2553  ;;  %v2695_v55 = vpop.permute.xlu2 %2694 }
 0xe2f   : > { %v2559_v22 = vsel %vm1349_vm3, %v2552_v20, %v2554_v21 }
 0xe30   : > { %2592 = vmatpush.bf16.msrb.mxu1 %v2501_v53  ;;  %2607 = vmatpush.bf16.msrb.mxu2 %v2559_v22 }
 0xe33   : > { %3464 = vmatmul.msk.bf16.vlgmr.msrb.gmra.mxu2 %vm2582_vm4, %v3463_v23 }
 0xe34   : > { %2593 = vmatpush.bf16.msrb.mxu1 %v4357_v42  ;;  %v2638_v42 = vsub.f32 1.0, %v2637_v39 }
 0xe36   : > { %v2639_v51 = vmul.f32 %v3663_v38, %v2638_v42 }
 0xe37   : > { %2594 = vmatmul.bf16.vlgmr.msrb.gmra.mxu1 %v3459_v25 }
 0xe38   : > { %v2640_v60 = vadd.f32 %v3663_v38, %v2639_v51 }
 0xe3a   : > { %v2642_v56 = vsel %vm2641_vm8, %v3663_v38, %v2640_v60 }
 0xeb4   : > { %v2595_v26 = vpop.f32.mrf.mxu1 }
 0xeb5   : > { %v2596_v0 = vadd.f32 %v2595_v26, %v2566_v28 }
 0xeb6   : > { %v2609_v27 = vpop.f32.mrf.mxu2 }
 0xeb7   : > { %v4404_v31 = vadd.f32 %v2609_v27, %v2596_v0 }
 0xeb9   : > { %v2624_v36 = vmul.f32 %v4404_v31, %v4404_v31 }
 0xebc   : > { %v2597_v30 = vpop.f32.mrf.mxu1 }
 0xebd   : > { %v2598_v32 = vadd.f32 %v2597_v30, %v2571_v29 }
 0xebe   : > { %v2611_v33 = vpop.f32.mrf.mxu2 }
 0xebf   : > { %v4406_v34 = vadd.f32 %v2611_v33, %v2598_v32 }
 0xec1   : > { %v2614_v35 = vadd.f32 %v4406_v34, %v4404_v31  ;;  %v2625_v2 = vmul.f32 %v4406_v34, %v4406_v34 }
 0xec3   : > { %2615 = vadd.xlane.f32.xlu1 %v2614_v35  ;;  %v2626_v48 = vadd.f32 %v2625_v2, %v2624_v36 }
 0xec5   : > { %2627 = vadd.xlane.f32.xlu0 %v2626_v48 }
 0xf36   : > { %v2616_v40 = vpop.xlane.xlu1 %2615 }
 0xf37   : > { %v2617_v41 = vrot.slane %v2616_v40, 4 }
 0xf38   : > { %v2628_v43 = vpop.xlane.xlu0 %2627 }
 0xf39   : > { %v2618_v44 = vadd.f32 %v2617_v41, %v2616_v40  ;;  %v2629_v45 = vrot.slane %v2628_v43, 4 }
 0xf3b   : > { %v2619_v49 = vrot.slane %v2618_v44, 2  ;;  %v2630_v50 = vadd.f32 %v2629_v45, %v2628_v43 }
 0xf3d   : > { %v2631_v52 = vrot.slane %v2630_v50, 2  ;;  %v2620_v53 = vadd.f32 %v2619_v49, %v2618_v44 }
 0xf3f   : > { %v2621_v54 = vrot.slane %v2620_v53, 1  ;;  %v2632_v57 = vadd.f32 %v2631_v52, %v2630_v50 }
 0xf41   : > { %v2622_v61 = vadd.f32 %v2621_v54, %v2620_v53  ;;  %v2633_v58 = vrot.slane %v2632_v57, 1 }
 0xf43   : > { %3533 = vpush %v2622_v61  ;;  %v2634_v62 = vadd.f32 %v2633_v58, %v2632_v57 }
 0xf45   : > { %3535 = vpush %v2634_v62 }
 0xf46   : > { %3537 = vpush %v2642_v56 }
 0xf74   : > { %s3534_s12 = spop %3533 }
 0xf76   : > { %s3536_s26 = spop %3535 }
 0xf77   : > { %s4414_s3 = spop %3537 }
 0xf78   : > { %s2644_s5 = smul.f32 %s4414_s3, %s3534_s12 }
 0xf79   : > { %s2653_s9 = smul.f32 %s4414_s3, %s3536_s26 }
 0xf7a   : > { %s2654_s14 = smul.f32 %s2644_s5, %s2644_s5  ;;  %v2656_v9 = vstv %s2644_s5  ;;  %s4676_s5 = sld [smem:[#allocation25_spill]] }
 0xf7b   : > { %v2657_v13 = vsub.f32 %v4404_v31, %v2656_v9  ;;  %v2658_v47 = vsub.f32 %v4406_v34, %v2656_v9 }
 0xf7c   : > { %s2655_s17 = ssub.f32 %s2653_s9, %s2654_s14 }
 0xf7d   : > { %s4677_s9 = sld [smem:[#allocation26_spill]] }
 0xf7e   : > { %s2659_s19 = sadd.f32 1e-05, %s2655_s17 }
 0xf7f   : > { %s4678_s17 = sld [smem:[#allocation23_spill]] }
 0xf80   : > { %v2660_v63 = vstv %s2659_s19  ;;  %s4675_s19 = sld [smem:[#allocation24_spill]]  ;;  %v1266_v36 = vld [vmem:[%s4676_s5] sm:$0xff]  ;;  %v1267_v2 = vld [vmem:[%s4676_s5 + $0x8] sm:$0xff] }
 0xf81   : > { %3664 = vrsqrt.f32 %v2660_v63  ;;  %vm2667_vm10 = vweird.f32 %v2660_v63 }
 0xf83   : > { %v1268_v48 = vld [vmem:[%s4677_s9] sm:$0xff]  ;;  %v1269_v37 = vld [vmem:[%s4677_s9 + $0x8] sm:$0xff] }
 0xf85   : > { %v3503_v44 = vld [vmem:[%s4678_s17] sm:$0xff] }
 0xf86   : > { %v1264_v28 = vld [vmem:[%s4675_s19] sm:$0xff]  ;;  %v1265_v35 = vld [vmem:[%s4675_s19 + $0x8] sm:$0xff] }
 0xf87   : > { %v3665_v59 = vpop.eup %3664 }
 0xf88   : > { %v2662_v3 = vmul.f32 %v3665_v59, %v2660_v63  ;;  %vm2668_vm9 = vweird.f32 %v3665_v59 }
 0xf89   : > { %vm2669_vm11 = vmor %vm2667_vm10, %vm2668_vm9 }
 0xf8a   : > { %v2663_v4 = vmul.f32 %v3665_v59, %v2662_v3 }
 0xf8c   : > { %v2664_v5 = vmul.f32 0.5, %v2663_v4 }
 0xf8e   : > { %v2665_v6 = vsub.f32 1.5, %v2664_v5 }
 0xf90   : > { %v2666_v7 = vmul.f32 %v3665_v59, %v2665_v6 }
 0xf92   : > { %v2670_v46 = vsel %vm2669_vm11, %v3665_v59, %v2666_v7 }
 0xf93   : > { %3539 = vpush %v2670_v46 }
 0xfc4   : > { %s3540_s14 = spop %3539 }
 0xfc5   : > { %v2672_v14 = vstv %s3540_s14 }
 0xfc6   : > { %v2673_v10 = vmul.f32 %v2672_v14, %v2657_v13  ;;  %v2674_v15 = vmul.f32 %v2672_v14, %v2658_v47 }
 0xfc8   : > { %v2685_v16 = vmul.f32 %v2678_v8, %v2673_v10  ;;  %v2686_v17 = vmul.f32 %v2683_v11, %v2674_v15 }
 0xfca   : > { %v2697_v18 = vadd.f32 %v2690_v12, %v2685_v16  ;;  %v2698_v19 = vadd.f32 %v2695_v55, %v2686_v17 }
 0xfcc   : > { %vm2699_vm12 = vcmp.ge.f32.partialorder %v2697_v18, 0.0  ;;  %vm2700_vm13 = vcmp.ge.f32.partialorder %v2698_v19, 0.0  ;;  %v2701_v20 = vmul.f32 0.2, %v2697_v18  ;;  %v2702_v21 = vmul.f32 0.2, %v2698_v19 }
 0xfce   : > { %v2703_v22 = vsel %vm2699_vm12, %v2697_v18, %v2701_v20  ;;  %v2704_v23 = vsel %vm2700_vm13, %v2698_v19, %v2702_v21 }
 0xfcf   : > { %v2705_v24 = vpack.c.bf16 %v2703_v22, %v2703_v22  ;;  %v2706_v1 = vpack.c.bf16 %v2704_v23, %v2704_v23 }
 0xfd1   : > { %v2709_v25 = vunpack.c.l.b16 %v2705_v24  ;;  %v2710_v26 = vunpack.c.l.b16 %v2706_v1 }
 0xfd3   : > { %v2711_v27 = vpack.c.b16 %v2710_v26, %v2709_v25 }
 0xfd5   : > { %2714 = vrot.lane.b32.xlu1 %v2711_v27, %s4659_s2  ;;  %2712 = vrot.lane.b32.xlu2 %v2711_v27, %s4656_s11 }
 0xfdd   : > { %2740 = vperm.xlu1 %3650, %v1264_v28   ;;  %2716 = vrot.lane.b32.xlu2 %v2711_v27, %s4658_s8 }
0x102f   : > { %v2713_v0 = vpop.permute.xlu2 %2712 }
0x1037   : > { %v2717_v29 = vpop.permute.xlu2 %2716 }
0x1047   : > { %v2715_v30 = vpop.permute.xlu1 %2714 }
0x1048   : > { %v2720_v32 = vsel %vm1309_vm0, %v2713_v0, %v2715_v30  ;;  %v2723_v33 = vsel %vm1309_vm0, %v2715_v30, %v2717_v29 }
0x1049   : > { %2732 = vrot.lane.b32.xlu0 %v2720_v32, %s4657_s18  ;;  %2734 = vrot.lane.b32.xlu2 %v2723_v33, %s4657_s18 }
0x104f   : > { %v2741_v49 = vpop.permute.xlu1 %2740 }
0x1051   : > { %2728 = vrot.lane.b32.xlu0 %v2723_v33, %s4656_s11  ;;  %2726 = vrot.lane.b32.xlu2 %v2720_v32, %s4656_s11 }
0x1059   : > { %2745 = vperm.xlu2 %3651, %v1265_v35  }
0x1061   : > { %2834 = vperm.xlu2 %3651, %v1266_v36  }
0x1069   : > { %2839 = vperm.xlu2 %3651, %v1267_v2  }
0x1071   : > { %2846 = vperm.xlu2 %3651, %v1268_v48  }
0x1079   : > { %2851 = vperm.xlu2 %3651, %v1269_v37  }
0x10a3   : > { %v2735_v38 = vpop.permute.xlu2 %2734 }
0x10ab   : > { %v2727_v41 = vpop.permute.xlu2 %2726 }
0x10b3   : > { %v2746_v51 = vpop.permute.xlu2 %2745 }
0x10bb   : > { %v2733_v39 = vpop.permute.xlu0 %2732  ;;  %v2835_v55 = vpop.permute.xlu2 %2834 }
0x10bc   : > { %v2736_v40 = vsel %vm1335_vm5, %v2733_v39, %v2735_v38 }
0x10bd   : > { %2762 = vmatpush.bf16.msrb.mxu3 %v2736_v40 }
0x10c3   : > { %v2729_v42 = vpop.permute.xlu0 %2728  ;;  %v2840_v18 = vpop.permute.xlu2 %2839 }
0x10c4   : > { %v2730_v43 = vsel %vm1328_vm6, %v2727_v41, %v2729_v42 }
0x10c5   : > { %2763 = vmatpush.bf16.msrb.mxu3 %v2730_v43 }
0x10c9   : > { %2764 = vmatpush.bf16.msrb.mxu3 %v2720_v32 }
0x10cb   : > { %v2847_v19 = vpop.permute.xlu2 %2846 }
0x10cc   : > { %3469 = vmatmul.msk.bf16.vlgmr.msrb.gmra.mxu3 %vm2753_vm14, %v3503_v44 }
0x10d3   : > { %v2852_v27 = vpop.permute.xlu2 %2851 }
0x114f   : > { %v2766_v45 = vpop.f32.mrf.mxu3 }
0x1150   : > { %v2767_v50 = vadd.f32 %v2766_v45, %v2741_v49 }
0x1152   : > { %v2781_v54 = vmul.f32 %v2767_v50, %v2767_v50 }
0x1157   : > { %v2768_v52 = vpop.f32.mrf.mxu3 }
0x1158   : > { %v2769_v53 = vadd.f32 %v2768_v52, %v2746_v51 }
0x115a   : > { %v2782_v57 = vmul.f32 %v2769_v53, %v2769_v53  ;;  %v2771_v60 = vadd.f32 %v2769_v53, %v2767_v50 }
0x115c   : > { %2772 = vadd.xlane.f32.xlu0 %v2771_v60  ;;  %v2783_v61 = vadd.f32 %v2782_v57, %v2781_v54 }
0x115e   : > { %2784 = vadd.xlane.f32.xlu1 %v2783_v61 }
0x11cf   : > { %v2773_v58 = vpop.xlane.xlu0 %2772 }
0x11d0   : > { %v2774_v62 = vrot.slane %v2773_v58, 4 }
0x11d1   : > { %v2785_v56 = vpop.xlane.xlu1 %2784 }
0x11d2   : > { %v2775_v63 = vadd.f32 %v2774_v62, %v2773_v58  ;;  %v2786_v59 = vrot.slane %v2785_v56, 4 }
0x11d4   : > { %v2776_v3 = vrot.slane %v2775_v63, 2  ;;  %v2787_v4 = vadd.f32 %v2786_v59, %v2785_v56 }
0x11d6   : > { %v2788_v5 = vrot.slane %v2787_v4, 2  ;;  %v2777_v6 = vadd.f32 %v2776_v3, %v2775_v63 }
0x11d8   : > { %v2778_v7 = vrot.slane %v2777_v6, 1  ;;  %v2789_v46 = vadd.f32 %v2788_v5, %v2787_v4 }
0x11da   : > { %v2779_v8 = vadd.f32 %v2778_v7, %v2777_v6  ;;  %v2790_v11 = vrot.slane %v2789_v46, 1 }
0x11dc   : > { %3541 = vpush %v2779_v8  ;;  %v2791_v12 = vadd.f32 %v2790_v11, %v2789_v46 }
0x11de   : > { %3543 = vpush %v2791_v12 }
0x120d   : > { %s3542_s12 = spop %3541 }
0x120e   : > { %s2801_s26 = smul.f32 %s3542_s12, %s4414_s3  ;;  %s4681_s12 = sld [smem:[#allocation30_spill]] }
0x120f   : > { %s3544_s14 = spop %3543 }
0x1210   : > { %s2811_s17 = smul.f32 %s2801_s26, %s2801_s26  ;;  %v2813_v20 = vstv %s2801_s26 }
0x1211   : > { %s2810_s5 = smul.f32 %s3544_s14, %s4414_s3  ;;  %v2814_v21 = vsub.f32 %v2767_v50, %v2813_v20  ;;  %v2815_v22 = vsub.f32 %v2769_v53, %v2813_v20 }
0x1213   : > { %s2812_s9 = ssub.f32 %s2810_s5, %s2811_s17 }
0x1214   : > { %v1276_v41 = vld [vmem:[%s4681_s12] sm:$0xff]  ;;  %v1277_v42 = vld [vmem:[%s4681_s12 + $0x8] sm:$0xff] }
0x1215   : > { %s2816_s19 = sadd.f32 1e-05, %s2812_s9 }
0x1216   : > { %s4680_s9 = sld [smem:[#allocation29_spill]] }
0x1217   : > { %v2817_v9 = vstv %s2816_s19  ;;  %s4679_s19 = sld [smem:[#allocation28_spill]] }
0x1218   : > { %3666 = vrsqrt.f32 %v2817_v9  ;;  %vm2824_vm15 = vweird.f32 %v2817_v9 }
0x121c   : > { %v1274_v39 = vld [vmem:[%s4680_s9] sm:$0xff]  ;;  %v1275_v40 = vld [vmem:[%s4680_s9 + $0x8] sm:$0xff] }
0x121d   : > { %v1273_v38 = vld [vmem:[%s4679_s19 + $0x8] sm:$0xff]  ;;  %v1272_v51 = vld [vmem:[%s4679_s19] sm:$0xff] }
0x121e   : > { %v3667_v13 = vpop.eup %3666 }
0x121f   : > { %v2819_v47 = vmul.f32 %v3667_v13, %v2817_v9  ;;  %vm2825_vm7 = vweird.f32 %v3667_v13 }
0x1220   : > { %vm2826_vm4 = vmor %vm2824_vm15, %vm2825_vm7 }
0x1221   : > { %v2820_v14 = vmul.f32 %v3667_v13, %v2819_v47 }
0x1223   : > { %v2821_v10 = vmul.f32 0.5, %v2820_v14 }
0x1225   : > { %v2822_v15 = vsub.f32 1.5, %v2821_v10 }
0x1227   : > { %v2823_v16 = vmul.f32 %v3667_v13, %v2822_v15 }
0x1229   : > { %v2827_v17 = vsel %vm2826_vm4, %v3667_v13, %v2823_v16 }
0x122a   : > { %3545 = vpush %v2827_v17 }
0x125b   : > { %s3546_s5 = spop %3545 }
0x125c   : > { %v2829_v23 = vstv %s3546_s5 }
0x125d   : > { %v2830_v24 = vmul.f32 %v2829_v23, %v2814_v21  ;;  %v2831_v1 = vmul.f32 %v2829_v23, %v2815_v22 }
0x125f   : > { %v2842_v25 = vmul.f32 %v2835_v55, %v2830_v24  ;;  %v2843_v26 = vmul.f32 %v2840_v18, %v2831_v1 }
0x1261   : > { %v2854_v28 = vadd.f32 %v2847_v19, %v2842_v25  ;;  %v2855_v0 = vadd.f32 %v2852_v27, %v2843_v26 }
0x1263   : > { %vm2856_vm8 = vcmp.ge.f32.partialorder %v2854_v28, 0.0  ;;  %vm2857_vm9 = vcmp.ge.f32.partialorder %v2855_v0, 0.0  ;;  %v2858_v29 = vmul.f32 0.2, %v2854_v28  ;;  %v2859_v30 = vmul.f32 0.2, %v2855_v0 }
0x1265   : > { %v2860_v32 = vsel %vm2856_vm8, %v2854_v28, %v2858_v29  ;;  %v2861_v33 = vsel %vm2857_vm9, %v2855_v0, %v2859_v30 }
0x1266   : > { %v2862_v35 = vpack.c.bf16 %v2860_v32, %v2860_v32  ;;  %v2863_v36 = vpack.c.bf16 %v2861_v33, %v2861_v33 }
0x1268   : > { %v2866_v2 = vunpack.c.l.b16 %v2862_v35  ;;  %v2867_v48 = vunpack.c.l.b16 %v2863_v36 }
0x126a   : > { %v2868_v37 = vpack.c.b16 %v2867_v48, %v2866_v2 }
0x126c   : > { %2873 = vrot.lane.b32.xlu1 %v2868_v37, %s4658_s8  ;;  %2871 = vrot.lane.b32.xlu0 %v2868_v37, %s4659_s2  ;;  %s4682_s8 = sld [smem:[#allocation27_spill]] }
0x126d   : > { %2869 = vrot.lane.b32.xlu2 %v2868_v37, %s4656_s11 }
0x1272   : > { %v3504_v58 = vld [vmem:[%s4682_s8] sm:$0xff] }
0x1274   : > { %2902 = vperm.xlu1 %3650, %v1273_v38  }
0x127c   : > { %2992 = vperm.xlu1 %3650, %v1274_v39  }
0x1284   : > { %2997 = vperm.xlu1 %3650, %v1275_v40  }
0x128c   : > { %3004 = vperm.xlu1 %3650, %v1276_v41  }
0x1294   : > { %3009 = vperm.xlu1 %3650, %v1277_v42  }
0x12c7   : > { %v2870_v43 = vpop.permute.xlu2 %2869 }
0x12de   : > { %v2874_v44 = vpop.permute.xlu1 %2873  ;;  %v2872_v45 = vpop.permute.xlu0 %2871 }
0x12df   : > { %v2877_v49 = vsel %vm1309_vm0, %v2870_v43, %v2872_v45  ;;  %v2880_v50 = vsel %vm1309_vm0, %v2872_v45, %v2874_v44 }
0x12e0   : > { %2885 = vrot.lane.b32.xlu0 %v2880_v50, %s4656_s11  ;;  %2889 = vrot.lane.b32.xlu2 %v2877_v49, %s4657_s18 }
0x12e6   : > { %v2903_v59 = vpop.permute.xlu1 %2902 }
0x12e8   : > { %2891 = vrot.lane.b32.xlu2 %v2880_v50, %s4657_s18 }
0x12ee   : > { %v2993_v27 = vpop.permute.xlu1 %2992 }
0x12f0   : > { %2883 = vrot.lane.b32.xlu2 %v2877_v49, %s4656_s11 }
0x12f6   : > { %v2998_v28 = vpop.permute.xlu1 %2997 }
0x12f8   : > { %2897 = vperm.xlu2 %3651, %v1272_v51  }
0x12fe   : > { %v3005_v0 = vpop.permute.xlu1 %3004 }
0x1306   : > { %v3010_v37 = vpop.permute.xlu1 %3009 }
0x133a   : > { %v2890_v52 = vpop.permute.xlu2 %2889 }
0x1342   : > { %v2892_v53 = vpop.permute.xlu2 %2891 }
0x1343   : > { %v2893_v54 = vsel %vm1335_vm5, %v2890_v52, %v2892_v53 }
0x1344   : > { %2918 = vmatpush.bf16.msra.mxu1 %v2893_v54 }
0x134a   : > { %v2884_v57 = vpop.permute.xlu2 %2883 }
0x1352   : > { %v2886_v60 = vpop.permute.xlu0 %2885  ;;  %v2898_v56 = vpop.permute.xlu2 %2897 }
0x1353   : > { %v2887_v61 = vsel %vm1328_vm6, %v2884_v57, %v2886_v60 }
0x1354   : > { %2919 = vmatpush.bf16.msra.mxu1 %v2887_v61 }
0x1358   : > { %2920 = vmatpush.bf16.msra.mxu1 %v2877_v49 }
0x135b   : > { %3474 = vmatmul.msk.bf16.vlgmr.msra.gmra.mxu1 %vm2753_vm14, %v3504_v58 }
0x13d8   : > { %v2922_v62 = vpop.f32.mrf.mxu1 }
0x13d9   : > { %v2923_v63 = vadd.f32 %v2922_v62, %v2898_v56 }
0x13db   : > { %v4461_v4 = vadd.f32 %v2923_v63, %v4404_v31 }
0x13dd   : > { %v2939_v46 = vmul.f32 %v4461_v4, %v4461_v4 }
0x13e0   : > { %v2924_v3 = vpop.f32.mrf.mxu1 }
0x13e1   : > { %v2925_v5 = vadd.f32 %v2924_v3, %v2903_v59 }
0x13e3   : > { %v4464_v6 = vadd.f32 %v2925_v5, %v4406_v34 }
0x13e5   : > { %v2929_v7 = vadd.f32 %v4464_v6, %v4461_v4  ;;  %v2940_v8 = vmul.f32 %v4464_v6, %v4464_v6 }
0x13e7   : > { %2930 = vadd.xlane.f32.xlu0 %v2929_v7  ;;  %v2941_v11 = vadd.f32 %v2940_v8, %v2939_v46 }
0x13e9   : > { %2942 = vadd.xlane.f32.xlu2 %v2941_v11 }
0x145a   : > { %v2931_v12 = vpop.xlane.xlu0 %2930 }
0x145b   : > { %v2932_v9 = vrot.slane %v2931_v12, 4 }
0x145c   : > { %v2943_v31 = vpop.xlane.xlu2 %2942 }
0x145d   : > { %v2933_v13 = vadd.f32 %v2932_v9, %v2931_v12  ;;  %v2944_v47 = vrot.slane %v2943_v31, 4 }
0x145f   : > { %v2934_v34 = vrot.slane %v2933_v13, 2  ;;  %v2945_v14 = vadd.f32 %v2944_v47, %v2943_v31 }
0x1461   : > { %v2946_v10 = vrot.slane %v2945_v14, 2  ;;  %v2935_v15 = vadd.f32 %v2934_v34, %v2933_v13 }
0x1463   : > { %v2936_v16 = vrot.slane %v2935_v15, 1  ;;  %v2947_v17 = vadd.f32 %v2946_v10, %v2945_v14 }
0x1465   : > { %v2937_v55 = vadd.f32 %v2936_v16, %v2935_v15  ;;  %v2948_v18 = vrot.slane %v2947_v17, 1 }
0x1467   : > { %3547 = vpush %v2937_v55  ;;  %v2949_v19 = vadd.f32 %v2948_v18, %v2947_v17 }
0x1469   : > { %3549 = vpush %v2949_v19 }
0x1498   : > { %s3548_s11 = spop %3547 }
0x1499   : > { %s2959_s2 = smul.f32 %s3548_s11, %s4414_s3 }
0x149a   : > { %s3550_s26 = spop %3549 }
0x149b   : > { %s2969_s14 = smul.f32 %s2959_s2, %s2959_s2  ;;  %v2971_v29 = vstv %s2959_s2  ;;  %s4686_s2 = sld [smem:[#allocation34_spill]] }
0x149c   : > { %s2968_s17 = smul.f32 %s3550_s26, %s4414_s3  ;;  %v2972_v30 = vsub.f32 %v4461_v4, %v2971_v29  ;;  %v2973_v32 = vsub.f32 %v4464_v6, %v2971_v29  ;;  %s4683_s26 = sld [smem:[#allocation32_spill]] }
0x149e   : > { %s2970_s5 = ssub.f32 %s2968_s17, %s2969_s14 }
0x149f   : > { %s4685_s17 = sld [smem:[#allocation33_spill]] }
0x14a0   : > { %s2974_s8 = sadd.f32 1e-05, %s2970_s5 }
0x14a1   : > { %v1284_v57 = vld [vmem:[%s4686_s2] sm:$0xff]  ;;  %v1285_v60 = vld [vmem:[%s4686_s2 + $0x8] sm:$0xff]  ;;  %s4687_s5 = sld [smem:[#allocation31_spill]] }
0x14a2   : > { %v2975_v20 = vstv %s2974_s8  ;;  %s4684_s14 = smov %s4683_s26  ;;  %v1281_v52 = vld [vmem:[%s4683_s26 + $0x8] sm:$0xff] }
0x14a3   : > { %3668 = vrsqrt.f32 %v2975_v20  ;;  %vm2982_vm10 = vweird.f32 %v2975_v20  ;;  %v1280_v7 = vld [vmem:[%s4684_s14] sm:$0xff] }
0x14a5   : > { %v1282_v53 = vld [vmem:[%s4685_s17] sm:$0xff]  ;;  %v1283_v54 = vld [vmem:[%s4685_s17 + $0x8] sm:$0xff] }
0x14a7   : > { %v3505_v13 = vld [vmem:[%s4687_s5] sm:$0xff] }
0x14a9   : > { %v3669_v21 = vpop.eup %3668 }
0x14aa   : > { %v2977_v22 = vmul.f32 %v3669_v21, %v2975_v20  ;;  %vm2983_vm6 = vweird.f32 %v3669_v21 }
0x14ab   : > { %vm2984_vm11 = vmor %vm2982_vm10, %vm2983_vm6 }
0x14ac   : > { %v2978_v23 = vmul.f32 %v3669_v21, %v2977_v22 }
0x14ae   : > { %v2979_v24 = vmul.f32 0.5, %v2978_v23 }
0x14b0   : > { %v2980_v1 = vsub.f32 1.5, %v2979_v24 }
0x14b2   : > { %v2981_v25 = vmul.f32 %v3669_v21, %v2980_v1 }
0x14b4   : > { %v2985_v26 = vsel %vm2984_vm11, %v3669_v21, %v2981_v25 }
0x14b5   : > { %3551 = vpush %v2985_v26 }
0x14e6   : > { %s3552_s11 = spop %3551 }
0x14e7   : > { %v2987_v33 = vstv %s3552_s11 }
0x14e8   : > { %v2988_v35 = vmul.f32 %v2987_v33, %v2972_v30  ;;  %v2989_v36 = vmul.f32 %v2987_v33, %v2973_v32 }
0x14ea   : > { %v3000_v2 = vmul.f32 %v2993_v27, %v2988_v35  ;;  %v3001_v48 = vmul.f32 %v2998_v28, %v2989_v36 }
0x14ec   : > { %v3012_v38 = vadd.f32 %v3005_v0, %v3000_v2  ;;  %v3013_v39 = vadd.f32 %v3010_v37, %v3001_v48 }
0x14ee   : > { %vm3014_vm12 = vcmp.ge.f32.partialorder %v3012_v38, 0.0  ;;  %vm3015_vm13 = vcmp.ge.f32.partialorder %v3013_v39, 0.0  ;;  %v3016_v40 = vmul.f32 0.2, %v3012_v38  ;;  %v3017_v41 = vmul.f32 0.2, %v3013_v39 }
0x14f0   : > { %v3018_v42 = vsel %vm3014_vm12, %v3012_v38, %v3016_v40  ;;  %v3019_v43 = vsel %vm3015_vm13, %v3013_v39, %v3017_v41 }
0x14f1   : > { %v3020_v44 = vpack.c.bf16 %v3018_v42, %v3018_v42  ;;  %v3021_v45 = vpack.c.bf16 %v3019_v43, %v3019_v43 }
0x14f3   : > { %v3024_v49 = vunpack.c.l.b16 %v3020_v44  ;;  %v3025_v50 = vunpack.c.l.b16 %v3021_v45 }
0x14f5   : > { %v3026_v51 = vpack.c.b16 %v3025_v50, %v3024_v49 }
0x14f7   : > { %3033 = vrot.lane.b32.xlu2 %v3026_v51, %s4661_s10  ;;  %3029 = vrot.lane.b32.xlu0 %v3026_v51, %s4662_s1 }
0x14f8   : > { %3027 = vrot.lane.b32.xlu1 %v3026_v51, %s4657_s18 }
0x14ff   : > { %3066 = vperm.xlu2 %3651, %v1281_v52  }
0x1500   : > { %3031 = vrot.lane.b32.xlu1 %v3026_v51, %s4660_s13 }
0x1507   : > { %3154 = vperm.xlu2 %3651, %v1282_v53  }
0x150f   : > { %3159 = vperm.xlu2 %3651, %v1283_v54  }
0x1517   : > { %3166 = vperm.xlu2 %3651, %v1284_v57  }
0x151f   : > { %3171 = vperm.xlu2 %3651, %v1285_v60  }
0x1551   : > { %v3034_v59 = vpop.permute.xlu2 %3033 }
0x1559   : > { %v3067_v10 = vpop.permute.xlu2 %3066 }
0x1561   : > { %v3155_v40 = vpop.permute.xlu2 %3154 }
0x1569   : > { %v3030_v61 = vpop.permute.xlu0 %3029  ;;  %v3160_v41 = vpop.permute.xlu2 %3159 }
0x156a   : > { %v3028_v58 = vpop.permute.xlu1 %3027 }
0x156b   : > { %v3037_v62 = vsel %vm1309_vm0, %v3028_v58, %v3026_v51 }
0x156c   : > { %v3039_v56 = vsel %vm1313_vm1, %v3037_v62, %v3030_v61 }
0x156d   : > { %3053 = vrot.lane.b32.xlu1 %v3039_v56, %s4663_s7 }
0x1571   : > { %v3167_v42 = vpop.permute.xlu2 %3166 }
0x1572   : > { %v3032_v63 = vpop.permute.xlu1 %3031 }
0x1573   : > { %v3042_v3 = vsel %vm1313_vm1, %v3030_v61, %v3032_v63 }
0x1574   : > { %v3044_v5 = vsel %vm1319_vm2, %v3042_v3, %v3034_v59 }
0x1575   : > { %3047 = vrot.lane.b32.xlu1 %v3039_v56, %s4657_s18  ;;  %3055 = vrot.lane.b32.xlu0 %v3044_v5, %s4663_s7 }
0x1579   : > { %v3172_v54 = vpop.permute.xlu2 %3171 }
0x157d   : > { %3061 = vperm.xlu1 %3650, %v1280_v7   ;;  %3049 = vrot.lane.b32.xlu0 %v3044_v5, %s4657_s18 }
0x15df   : > { %v3054_v46 = vpop.permute.xlu1 %3053 }
0x15e7   : > { %v3056_v8 = vpop.permute.xlu0 %3055  ;;  %v3048_v12 = vpop.permute.xlu1 %3047 }
0x15e8   : > { %v3057_v11 = vsel %vm1349_vm3, %v3054_v46, %v3056_v8  ;;  %v1288_v46 = vld [vmem:[%s3975_s27] sm:$0xff] }
0x15e9   : > { %3082 = vmatpush.bf16.msra.mxu2 %v3057_v11 }
0x15ef   : > { %v3050_v9 = vpop.permute.xlu0 %3049  ;;  %v3062_v34 = vpop.permute.xlu1 %3061 }
0x15f0   : > { %v3051_v31 = vsel %vm1335_vm5, %v3048_v12, %v3050_v9 }
0x15f1   : > { %3083 = vmatpush.bf16.msra.mxu2 %v3051_v31  ;;  %v1289_v31 = vld [vmem:[%s3975_s27 + $0x8] sm:$0xff] }
0x15f5   : > { %3084 = vmatpush.bf16.msra.mxu2 %v3039_v56 }
0x15f8   : > { %3479 = vmatmul.msk.bf16.vlgmr.msra.gmra.mxu2 %vm2753_vm14, %v3505_v13 }
0x167b   : > { %v3086_v47 = vpop.f32.mrf.mxu2 }
0x167c   : > { %v3087_v14 = vadd.f32 %v3086_v47, %v3062_v34 }
0x167e   : > { %v3101_v17 = vmul.f32 %v3087_v14, %v3087_v14 }
0x1683   : > { %v3088_v15 = vpop.f32.mrf.mxu2 }
0x1684   : > { %v3089_v16 = vadd.f32 %v3088_v15, %v3067_v10  ;;  %v1291_v10 = vld [vmem:[%s3985_s6] sm:$0xff] }
0x1686   : > { %v3102_v55 = vmul.f32 %v3089_v16, %v3089_v16  ;;  %v3091_v18 = vadd.f32 %v3089_v16, %v3087_v14 }
0x1688   : > { %3092 = vadd.xlane.f32.xlu0 %v3091_v18  ;;  %v3103_v19 = vadd.f32 %v3102_v55, %v3101_v17 }
0x168a   : > { %3104 = vadd.xlane.f32.xlu1 %v3103_v19 }
0x16fb   : > { %v3093_v20 = vpop.xlane.xlu0 %3092 }
0x16fc   : > { %v3094_v21 = vrot.slane %v3093_v20, 4 }
0x16fd   : > { %v3105_v22 = vpop.xlane.xlu1 %3104 }
0x16fe   : > { %v3095_v23 = vadd.f32 %v3094_v21, %v3093_v20  ;;  %v3106_v24 = vrot.slane %v3105_v22, 4 }
0x1700   : > { %v3096_v1 = vrot.slane %v3095_v23, 2  ;;  %v3107_v25 = vadd.f32 %v3106_v24, %v3105_v22 }
0x1702   : > { %v3108_v26 = vrot.slane %v3107_v25, 2  ;;  %v3097_v27 = vadd.f32 %v3096_v1, %v3095_v23 }
0x1704   : > { %v3098_v28 = vrot.slane %v3097_v27, 1  ;;  %v3109_v0 = vadd.f32 %v3108_v26, %v3107_v25 }
0x1706   : > { %v3099_v29 = vadd.f32 %v3098_v28, %v3097_v27  ;;  %v3110_v30 = vrot.slane %v3109_v0, 1 }
0x1708   : > { %3553 = vpush %v3099_v29  ;;  %v3111_v32 = vadd.f32 %v3110_v30, %v3109_v0 }
0x170a   : > { %3555 = vpush %v3111_v32 }
0x1739   : > { %s3554_s8 = spop %3553 }
0x173a   : > { %s3121_s11 = smul.f32 %s3554_s8, %s4414_s3 }
0x173b   : > { %s3556_s26 = spop %3555 }
0x173c   : > { %s3131_s5 = smul.f32 %s3121_s11, %s3121_s11  ;;  %v3133_v43 = vstv %s3121_s11 }
0x173d   : > { %s3130_s2 = smul.f32 %s3556_s26, %s4414_s3  ;;  %v3134_v44 = vsub.f32 %v3087_v14, %v3133_v43  ;;  %v3135_v45 = vsub.f32 %v3089_v16, %v3133_v43 }
0x173f   : > { %s3132_s9 = ssub.f32 %s3130_s2, %s3131_s5 }
0x1741   : > { %s3136_s12 = sadd.f32 1e-05, %s3132_s9 }
0x1743   : > { %v3137_v33 = vstv %s3136_s12 }
0x1744   : > { %3670 = vrsqrt.f32 %v3137_v33  ;;  %vm3144_vm15 = vweird.f32 %v3137_v33 }
0x174a   : > { %v3671_v35 = vpop.eup %3670 }
0x174b   : > { %v3139_v36 = vmul.f32 %v3671_v35, %v3137_v33  ;;  %vm3145_vm7 = vweird.f32 %v3671_v35  ;;  %v1290_v33 = vld [vmem:[%s3980_s4] sm:$0xf] }
0x174c   : > { %vm3146_vm4 = vmor %vm3144_vm15, %vm3145_vm7 }
0x174d   : > { %v3140_v2 = vmul.f32 %v3671_v35, %v3139_v36 }
0x174f   : > { %v3141_v48 = vmul.f32 0.5, %v3140_v2 }
0x1751   : > { %v3142_v37 = vsub.f32 1.5, %v3141_v48 }
0x1753   : > { %v3143_v38 = vmul.f32 %v3671_v35, %v3142_v37 }
0x1755   : > { %v3147_v39 = vsel %vm3146_vm4, %v3671_v35, %v3143_v38 }
0x1756   : > { %3557 = vpush %v3147_v39 }
0x1787   : > { %s3558_s3 = spop %3557 }
0x1788   : > { %v3149_v49 = vstv %s3558_s3 }
0x1789   : > { %v3150_v50 = vmul.f32 %v3149_v49, %v3134_v44  ;;  %v3151_v51 = vmul.f32 %v3149_v49, %v3135_v45 }
0x178b   : > { %v3162_v52 = vmul.f32 %v3155_v40, %v3150_v50  ;;  %v3163_v53 = vmul.f32 %v3160_v41, %v3151_v51 }
0x178d   : > { %v3174_v57 = vadd.f32 %v3167_v42, %v3162_v52  ;;  %v3175_v60 = vadd.f32 %v3172_v54, %v3163_v53 }
0x178f   : > { %vm3176_vm8 = vcmp.ge.f32.partialorder %v3174_v57, 0.0  ;;  %vm3177_vm9 = vcmp.ge.f32.partialorder %v3175_v60, 0.0  ;;  %v3178_v61 = vmul.f32 0.2, %v3174_v57  ;;  %v3179_v58 = vmul.f32 0.2, %v3175_v60 }
0x1791   : > { %v3180_v62 = vsel %vm3176_vm8, %v3174_v57, %v3178_v61  ;;  %v3181_v56 = vsel %vm3177_vm9, %v3175_v60, %v3179_v58 }
0x1792   : > { %v3182_v63 = vpack.c.bf16 %v3180_v62, %v3180_v62  ;;  %v3183_v59 = vpack.c.bf16 %v3181_v56, %v3181_v56 }
0x1794   : > { %v3186_v3 = vunpack.c.l.b16 %v3182_v63  ;;  %v3187_v5 = vunpack.c.l.b16 %v3183_v59 }
0x1796   : > { %v3188_v7 = vpack.c.b16 %v3187_v5, %v3186_v3 }
0x1798   : > { %3195 = vrot.lane.b32.xlu1 %v3188_v7, %s4661_s10  ;;  %3193 = vrot.lane.b32.xlu0 %v3188_v7, %s4660_s13  ;;  %s4688_s13 = sld [smem:[#allocation35_spill]]  ;;  %s3487_s10 = sshll.u32 %s4013_s0, 3 }
0x1799   : > { %3189 = vrot.lane.b32.xlu2 %v3188_v7, %s4657_s18  ;;  %s3692_s0 = scalar_lea.hbm %s3990_s20, 16 }
0x179e   : > { %v3506_v20 = vld [vmem:[%s4688_s13] sm:$0xff] }
0x17a0   : > { %3223 = vperm.xlu1 %3650, %v1288_v46  }
0x17a1   : > { %3191 = vrot.lane.b32.xlu2 %v3188_v7, %s4662_s1 }
0x17f3   : > { %v3190_v8 = vpop.permute.xlu2 %3189 }
0x17f4   : > { %v3199_v11 = vsel %vm1309_vm0, %v3190_v8, %v3188_v7 }
0x17fb   : > { %v3192_v12 = vpop.permute.xlu2 %3191 }
0x17fc   : > { %v3201_v9 = vsel %vm1313_vm1, %v3199_v11, %v3192_v12 }
0x17fd   : > { %3209 = vrot.lane.b32.xlu0 %v3201_v9, %s4657_s18  ;;  %3215 = vrot.lane.b32.xlu2 %v3201_v9, %s4663_s7 }
0x1805   : > { %3228 = vperm.xlu0 %3649, %v1289_v31  }
0x180a   : > { %v3196_v13 = vpop.permute.xlu1 %3195  ;;  %v3194_v47 = vpop.permute.xlu0 %3193 }
0x180b   : > { %v3204_v34 = vsel %vm1313_vm1, %v3192_v12, %v3194_v47 }
0x180c   : > { %v3206_v14 = vsel %vm1319_vm2, %v3204_v34, %v3196_v13  ;;  %vm3267_vm2 = vcmask 130048  }
0x180d   : > { %3217 = vrot.lane.b32.xlu2 %v3206_v14, %s4663_s7  ;;  %s3296_s7 = scalar_lea.hbm %s3990_s20, %s3487_s10 }
0x180e   : > { %s3300_s2 = sshll.u32 %s3296_s7, 4  ;;  %s3301_s2 = int_to_ptr.hbm [resolvable:$true] %s3300_s2 }
0x180f   : > { %s3686_s11 = sshra.s32 %s3301_s2, 4  ;;  %s3687_s11 = int_to_ptr.hbm [resolvable:$true] %s3686_s11 }
0x1810   : > { %s3688_s26 = scalar_lea.hbm %s3687_s11, 8  ;;  %p3693_p0 = scmp.lt.s32.totalorder %s3687_s11, %s3990_s20 }
0x1811   : > { %p3689_p11 = scmp.ne.s32.totalorder %s3687_s11, %s3688_s26  ;;  %p3694_p1 = scmp.lt.s32.totalorder %s3692_s0, %s3688_s26 }
0x1812   : > { %v3224_v22 = vpop.permute.xlu1 %3223 }
0x1813   : > { %p3690_p12 = pnand %p3689_p11, %p4030_p5  ;;  %p3695_p2 = por %p3694_p1, %p3693_p0 }
0x1815   : > { %3211 = vrot.lane.b32.xlu2 %v3206_v14, %s4657_s18  ;;  %s1173_s18 = sand.u32 1, %s3726_s23   ;;  %p3691_p13 = pneg %p3690_p12 }
0x1816   : > { %s3403_s1 = sshll.u32 %s1173_s18, 3  ;;  %s3286_s8 = scalar_lea.sflag [#allocation3], %s1173_s18 }
0x1817   : > { %s1175_s9 = scalar_lea.vmem [#allocation2], %s3403_s1  ;;  %p3696_p3 = pnand %p3695_p2, %p3691_p13 }
0x1818   : > { %s3298_s12 = sshll.u32 %s1175_s9, 4  ;;  %s3299_s12 = int_to_ptr.vmem [resolvable:$true] %s3298_s12 }
0x181d   : > { %3264 = vperm.xlu2 %3651, %v1291_v10  }
0x1857   : > { %v3216_v15 = vpop.permute.xlu2 %3215 }
0x1867   : > { %v3218_v16 = vpop.permute.xlu2 %3217 }
0x1868   : > { %v3219_v17 = vsel %vm1349_vm3, %v3216_v15, %v3218_v16 }
0x1869   : > { %3244 = vmatpush.bf16.msra.mxu3 %v3219_v17 }
0x186f   : > { %v3210_v55 = vpop.permute.xlu0 %3209  ;;  %v3212_v18 = vpop.permute.xlu2 %3211 }
0x1870   : > { %v3213_v19 = vsel %vm1335_vm5, %v3210_v55, %v3212_v18 }
0x1871   : > { %3245 = vmatpush.bf16.msra.mxu3 %v3213_v19 }
0x1875   : > { %3246 = vmatpush.bf16.msra.mxu3 %v3201_v9 }
0x1877   : > { %v3229_v1 = vpop.permute.xlu0 %3228 }
0x1878   : > { %3484 = vmatmul.msk.bf16.vlgmr.msra.gmra.mxu3 %vm2753_vm14, %v3506_v20 }
0x18fb   : > { %v3248_v21 = vpop.f32.mrf.mxu3 }
0x18fc   : > { %v3249_v23 = vadd.f32 %v3248_v21, %v3224_v22 }
0x18fe   : > { %v3253_v24 = vadd.f32 %v3249_v23, %v4461_v4  ;;  %v3265_v4 = vpop.permute.xlu2 %3264 }
0x1900   : > { %v3257_v27 = vmul.f32 0.2, %v3253_v24  ;;  %vm3255_vm0 = vcmp.ge.f32.partialorder %v3253_v24, 0.0 }
0x1902   : > { %v3259_v29 = vsel %vm3255_vm0, %v3253_v24, %v3257_v27 }
0x1903   : > { %v3250_v25 = vpop.f32.mrf.mxu3 }
0x1904   : > { %v3251_v26 = vadd.f32 %v3250_v25, %v3229_v1 }
0x1906   : > { %v3254_v28 = vadd.f32 %v3251_v26, %v4464_v6 }
0x1908   : > { %vm3256_vm1 = vcmp.ge.f32.partialorder %v3254_v28, 0.0  ;;  %v3258_v0 = vmul.f32 0.2, %v3254_v28 }
0x190a   : > { %v3260_v30 = vsel %vm3256_vm1, %v3254_v28, %v3258_v0 }
0x190b   : > { %v3261_v32 = vpack.c.bf16 %v3260_v30, %v3259_v29 }
0x190d   : > { %3278 = vmatpush.bf16.msra.mxu0 %v3261_v32 }
0x1910   : > { %3485 = vmatmul.msk.bf16.vlgmr.msra.gmra.mxu0 %vm3267_vm2, %v1290_v33 }
0x198d   : > { %v3280_v6 = vpop.f32.mrf.mxu0 }
0x198e   : > { %v3281_v35 = vadd.f32 %v3280_v6, %v3265_v4 }
0x1990   : > { %3284 = vst [vmem:[%s1175_s9] sm:$0xff] %v3281_v35 }
0x1991   : > { %3699 = shalt.err (!%p3696_p3)
}
0x1992   : > { %3559 = dma.vmem_to_hbm [thread:$0]  (%p4030_p5), %s3299_s12, 128, %s3301_s2, %s3286_s8  }
0x1995   : > { %v3282_v36 = vpop.f32.mrf.mxu0 }
0x1996 PF: > { %p3565_p4 = scmp.ge.s32.totalorder %s3734_s28, 2  ;;  %s3312_s5 = sand.u32 1, %s3722_s22  }
0x1997   : > { %s3313_s3 = scalar_lea.sflag [#allocation3], %s3312_s5 }
0x1998   : > { %p3562_p7 = pnand %p3565_p4, %p4034_p6 }
0x199a   : > { %p3563_p8 = pneg %p3562_p7 }
0x199c   : > { %3717 = dma.done.wait (%p3563_p8), %s3313_s3, 128  }
0x199d   : > { %3719 = vsyncadd (%p3563_p8), %s3313_s3, 4294967168  ;;  %s4689_s28 = sld [smem:[#allocation37_spill]]  ;;  %s4692_s22 = smov %s3726_s23 }
0x199e   : > { %s4690_s13 = sld [smem:[#allocation36_spill]] }
0x199f   : > { %s4691_s26 = sld [smem:[#allocation38_spill]] }
0x19a3   : > { %p89_p9 = scmp.ge.s32.totalorder %s4689_s28, 4  }
0x19a4   : > { %s4693_s23 = smov %s4690_s13 }
0x19a5   :  { %91 = sbr.rel (!%p89_p9) target bundleno = 86 (0x56), region = 250 }
0x19aa   :  { %3319 = vsyncpa [#allocation3], 1 }
0x19ab   :  { %3321 = vsyncpa [#allocation3 + $0x1], 1 }

</bundles_post_ra>
